<compile_context>
chip_gen: v5e
topology: v5e:2x2
jax: 0.10.0
libtpu: 0.0.40
codegen_flags: <defaults>
</compile_context>

<pallas_src>
import functools

import jax
import jax.numpy as jnp
from jax import lax
from jax.experimental import pallas as pl
from jax.experimental.pallas import tpu as pltpu


def _round_up(v, m):
    return (v + m - 1) // m * m


# ----------------------------- Pallas kernels ------------------------------

def _mm_bias_act_kernel(x_ref, w_ref, b_ref, o_ref, *, slope):
    # x: (TM, Kp), w: (Kp, Cp), b: (1, Cp) -> o: (TM, Cp)
    y = jnp.dot(x_ref[...], w_ref[...],
                preferred_element_type=jnp.float32,
                precision=lax.Precision.HIGHEST)
    y = y + b_ref[...]
    if slope is not None:                      # LeakyReLU, static slope
        y = jnp.where(y > 0.0, y, slope * y)
    o_ref[...] = y.astype(o_ref.dtype)


def _mm_bias_res_kernel(x_ref, w_ref, b_ref, r_ref, o_ref):
    # down conv with the residual add fused in: o = x @ w + b + res
    y = jnp.dot(x_ref[...], w_ref[...],
                preferred_element_type=jnp.float32,
                precision=lax.Precision.HIGHEST)
    o_ref[...] = (y + b_ref[...] + r_ref[...]).astype(o_ref.dtype)


def conv_matmul(x_mat, w_mat, b_vec, *, slope=None, res_mat=None, tm=256):
    """(M,K) @ (K,C) + bias [+ res] [+ LeakyReLU], M-tiled, lane-padded.

    Returns the padded (Mp, Cp) result; the caller slices [:M, :C].
    """
    M, K = x_mat.shape
    C = w_mat.shape[1]
    Kp = _round_up(K, 128)
    Cp = _round_up(C, 128)
    tm = min(tm, _round_up(M, 8))
    Mp = _round_up(M, tm)

    xp = jnp.pad(x_mat, ((0, Mp - M), (0, Kp - K)))
    wp = jnp.pad(w_mat, ((0, Kp - K), (0, Cp - C)))
    bp = jnp.pad(b_vec.reshape(1, C), ((0, 0), (0, Cp - C)))

    in_specs = [
        pl.BlockSpec((tm, Kp), lambda i: (i, 0)),   # activations: tiled over M
        pl.BlockSpec((Kp, Cp), lambda i: (0, 0)),   # weight: resident
        pl.BlockSpec((1, Cp), lambda i: (0, 0)),    # bias: resident
    ]
    inputs = [xp, wp, bp]

    if res_mat is None:
        kernel = functools.partial(_mm_bias_act_kernel, slope=slope)
        bytes_accessed = (Mp * Kp + Kp * Cp + Cp + Mp * Cp) * 4
    else:
        assert res_mat.shape == (Mp, Cp)
        in_specs.append(pl.BlockSpec((tm, Cp), lambda i: (i, 0)))
        inputs.append(res_mat)
        kernel = _mm_bias_res_kernel
        bytes_accessed = (Mp * Kp + Kp * Cp + Cp + 2 * Mp * Cp) * 4

    return pl.pallas_call(
        kernel,
        out_shape=jax.ShapeDtypeStruct((Mp, Cp), jnp.float32),
        grid_spec=pltpu.PrefetchScalarGridSpec(
            num_scalar_prefetch=0,
            grid=(Mp // tm,),
            in_specs=in_specs,
            out_specs=pl.BlockSpec((tm, Cp), lambda i: (i, 0)),
        ),
        compiler_params=pltpu.CompilerParams(
            dimension_semantics=("parallel",)),
        cost_estimate=pl.CostEstimate(
            flops=2 * Mp * Kp * Cp,
            transcendentals=0,
            bytes_accessed=bytes_accessed),
    )(*inputs)


# -------------------------- layout glue (wrapper) ---------------------------

def _im2col_nhwc(x, kh, kw, stride, pad):
    """x: (N,H,W,C) -> patch matrix (N*Ho*Wo, kh*kw*C), plus (Ho, Wo)."""
    N, H, W, C = x.shape
    if pad:
        x = jnp.pad(x, ((0, 0), (pad, pad), (pad, pad), (0, 0)))
    Ho = (H + 2 * pad - kh) // stride + 1
    Wo = (W + 2 * pad - kw) // stride + 1
    cols = []
    for i in range(kh):
        for j in range(kw):
            cols.append(x[:, i:i + stride * Ho:stride, j:j + stride * Wo:stride, :])
    p = jnp.stack(cols, axis=3)            # (N, Ho, Wo, kh*kw, C)
    return p.reshape(N * Ho * Wo, kh * kw * C), Ho, Wo


def _w_to_mat(w):
    # PyTorch (Cout, Cin, kh, kw) -> (kh*kw*Cin, Cout), matching im2col K order.
    cout = w.shape[0]
    return jnp.transpose(w, (2, 3, 1, 0)).reshape(-1, cout)


def down_block(x, w_res, b_res, w1, b1, w2, b2, w_down, b_down):
    """DownBlock.forward (downsample=True). NCHW in, (x_out, unet_res) NCHW out."""
    N, Cin, H, W = x.shape
    F = w1.shape[0]
    x_nhwc = jnp.transpose(x, (0, 2, 3, 1))            # single input layout pass

    # res = conv_res(x): 1x1 conv, stride 2 (kept lane-padded for later fusion)
    pr, Hr, Wr = _im2col_nhwc(x_nhwc, 1, 1, 2, 0)
    res_pad = conv_matmul(pr, _w_to_mat(w_res), b_res)

    # net: Conv3x3 s1 p1 + LeakyReLU(0.2), twice
    p1, H1, W1 = _im2col_nhwc(x_nhwc, 3, 3, 1, 1)
    h1 = conv_matmul(p1, _w_to_mat(w1), b1, slope=0.2)
    h1 = h1[:N * H1 * W1, :F].reshape(N, H1, W1, F)

    p2, H2, W2 = _im2col_nhwc(h1, 3, 3, 1, 1)
    h2 = conv_matmul(p2, _w_to_mat(w2), b2, slope=0.2)
    unet_res = h2[:N * H2 * W2, :F].reshape(N, H2, W2, F)

    # down: Conv4x4 s2 p1, residual add fused into the kernel
    pd, Hd, Wd = _im2col_nhwc(unet_res, 4, 4, 2, 1)
    out_pad = conv_matmul(pd, _w_to_mat(w_down), b_down, res_mat=res_pad)
    out = out_pad[:N * Hd * Wd, :F].reshape(N, Hd, Wd, F)

    return (jnp.transpose(out, (0, 3, 1, 2)),
            jnp.transpose(unet_res, (0, 3, 1, 2)))


# ------------------------------ pure-JAX reference ---------------------------

def _conv_ref(x, w, b, stride, pad):
    y = lax.conv_general_dilated(
        x, w, (stride, stride), [(pad, pad), (pad, pad)],
        dimension_numbers=("NCHW", "OIHW", "NCHW"),
        precision=lax.Precision.HIGHEST)
    return y + b[None, :, None, None]


def _leaky(x, s=0.2):
    return jnp.where(x > 0, x, s * x)


def down_block_ref(x, w_res, b_res, w1, b1, w2, b2, w_down, b_down):
    res = _conv_ref(x, w_res, b_res, 2, 0)
    h = _leaky(_conv_ref(x, w1, b1, 1, 1))
    h = _leaky(_conv_ref(h, w2, b2, 1, 1))
    unet_res = h
    out = _conv_ref(h, w_down, b_down, 2, 1) + res
    return out, unet_res


# ----------------------------------- main ------------------------------------

if __name__ == "__main__":
    N, Cin, H, W = 2, 4, 16, 16
    F = 8  # filters

    key = jax.random.PRNGKey(0)
    ks = jax.random.split(key, 9)
    x = jax.random.normal(ks[0], (N, Cin, H, W), jnp.float32)
    w_res = jax.random.normal(ks[1], (F, Cin, 1, 1), jnp.float32) * 0.1
    b_res = jax.random.normal(ks[2], (F,), jnp.float32) * 0.1
    w1 = jax.random.normal(ks[3], (F, Cin, 3, 3), jnp.float32) * 0.1
    b1 = jax.random.normal(ks[4], (F,), jnp.float32) * 0.1
    w2 = jax.random.normal(ks[5], (F, F, 3, 3), jnp.float32) * 0.1
    b2 = jax.random.normal(ks[6], (F,), jnp.float32) * 0.1
    w_down = jax.random.normal(ks[7], (F, F, 4, 4), jnp.float32) * 0.1
    b_down = jax.random.normal(ks[8], (F,), jnp.float32) * 0.1

    fwd = jax.jit(down_block)
    out, unet_res = fwd(x, w_res, b_res, w1, b1, w2, b2, w_down, b_down)
    out = jax.block_until_ready(out)
    unet_res = jax.block_until_ready(unet_res)

    ref_out, ref_unet = down_block_ref(x, w_res, b_res, w1, b1, w2, b2,
                                       w_down, b_down)

    assert out.shape == (N, F, H // 2, W // 2)
    assert unet_res.shape == (N, F, H, W)
    assert jnp.allclose(out, ref_out, atol=1e-4, rtol=1e-4)
    assert jnp.allclose(unet_res, ref_unet, atol=1e-4, rtol=1e-4)

    print("KERNEL_OK")
</pallas_src>

<mosaic_0001>
module attributes {stable_mosaic.version = 11 : i64} {
  func.func @_mm_bias_act_kernel(%arg0: i32, %arg1: memref<256x128xf32, #tpu.memory_space<vmem>>, %arg2: memref<128x128xf32, #tpu.memory_space<vmem>>, %arg3: memref<1x128xf32, #tpu.memory_space<vmem>>, %arg4: memref<256x128xf32, #tpu.memory_space<vmem>>) attributes {dimension_semantics = [#tpu.dimension_semantics<parallel>], iteration_bounds = array<i64: 2>, scalar_prefetch = 0 : i64, scratch_operands = 0 : i64, tpu.core_type = #tpu.core_type<tc>, window_params = [{transform_indices = @transform_0, window_bounds = array<i64: 256, 128>}, {pipeline_mode = #tpu.pipeline_mode<synchronous>, transform_indices = @transform_1, window_bounds = array<i64: 128, 128>}, {pipeline_mode = #tpu.pipeline_mode<synchronous>, transform_indices = @transform_2, window_bounds = array<i64: 1, 128>}, {transform_indices = @transform_3, window_bounds = array<i64: 256, 128>}]} {
    %c0 = arith.constant 0 : index
    %c0_0 = arith.constant 0 : index
    %0 = vector.load %arg1[%c0, %c0_0] : memref<256x128xf32, #tpu.memory_space<vmem>>, vector<256x128xf32>
    %c0_1 = arith.constant 0 : index
    %c0_2 = arith.constant 0 : index
    %1 = vector.load %arg2[%c0_1, %c0_2] : memref<128x128xf32, #tpu.memory_space<vmem>>, vector<128x128xf32>
    %cst = arith.constant dense<0.000000e+00> : vector<256x128xf32>
    %2 = tpu.matmul %0, %1, %cst {dimension_numbers = #tpu.dot_dimension_numbers<[1], [0], [0], [1], [0, 0, 1, 1], [], []>, precision = #tpu.contract_precision<fp32>} : vector<256x128xf32>, vector<128x128xf32>, vector<256x128xf32> -> vector<256x128xf32>
    %c0_3 = arith.constant 0 : index
    %c0_4 = arith.constant 0 : index
    %3 = vector.load %arg3[%c0_3, %c0_4] : memref<1x128xf32, #tpu.memory_space<vmem>>, vector<1x128xf32>
    %4 = vector.broadcast %3 : vector<1x128xf32> to vector<256x128xf32>
    %5 = arith.addf %2, %4 : vector<256x128xf32>
    %cst_5 = arith.constant 0.000000e+00 : f32
    %6 = vector.broadcast %cst_5 : f32 to vector<256x128xf32>
    %7 = arith.cmpf ogt, %5, %6 : vector<256x128xf32>
    %cst_6 = arith.constant 2.000000e-01 : f32
    %8 = vector.broadcast %cst_6 : f32 to vector<256x128xf32>
    %9 = arith.mulf %8, %5 : vector<256x128xf32>
    %10 = arith.select %7, %5, %9 : vector<256x128xi1>, vector<256x128xf32>
    %c0_7 = arith.constant 0 : index
    %c0_8 = arith.constant 0 : index
    %11 = vector.load %arg4[%c0_7, %c0_8] : memref<256x128xf32, #tpu.memory_space<vmem>>, vector<256x128xf32>
    tpu.vector_store %arg4[%c0_7, %c0_8], %10 {strides = array<i32>} : memref<256x128xf32, #tpu.memory_space<vmem>>, vector<256x128xf32>,
    return
  }
  func.func @transform_0(%arg0: i32) -> (i32, i32) {
    %c0_i32 = arith.constant 0 : i32
    %c0_i32_0 = arith.constant 0 : i32
    return %arg0, %c0_i32 : i32, i32
  }
  func.func @transform_1(%arg0: i32) -> (i32, i32) {
    %c0_i32 = arith.constant 0 : i32
    %c0_i32_0 = arith.constant 0 : i32
    %c0_i32_1 = arith.constant 0 : i32
    return %c0_i32, %c0_i32_0 : i32, i32
  }
  func.func @transform_2(%arg0: i32) -> (i32, i32) {
    %c0_i32 = arith.constant 0 : i32
    %c0_i32_0 = arith.constant 0 : i32
    %c0_i32_1 = arith.constant 0 : i32
    return %c0_i32, %c0_i32_0 : i32, i32
  }
  func.func @transform_3(%arg0: i32) -> (i32, i32) {
    %c0_i32 = arith.constant 0 : i32
    %c0_i32_0 = arith.constant 0 : i32
    return %arg0, %c0_i32 : i32, i32
  }
}

module attributes {stable_mosaic.version = 11 : i64} {
  func.func @_mm_bias_act_kernel(%arg0: i32, %arg1: memref<128x128xf32, #tpu.memory_space<vmem>>, %arg2: memref<128x128xf32, #tpu.memory_space<vmem>>, %arg3: memref<1x128xf32, #tpu.memory_space<vmem>>, %arg4: memref<128x128xf32, #tpu.memory_space<vmem>>) attributes {dimension_semantics = [#tpu.dimension_semantics<parallel>], iteration_bounds = array<i64: 1>, scalar_prefetch = 0 : i64, scratch_operands = 0 : i64, tpu.core_type = #tpu.core_type<tc>, window_params = [{transform_indices = @transform_0, window_bounds = array<i64: 128, 128>}, {pipeline_mode = #tpu.pipeline_mode<synchronous>, transform_indices = @transform_1, window_bounds = array<i64: 128, 128>}, {pipeline_mode = #tpu.pipeline_mode<synchronous>, transform_indices = @transform_2, window_bounds = array<i64: 1, 128>}, {transform_indices = @transform_3, window_bounds = array<i64: 128, 128>}]} {
    %c0 = arith.constant 0 : index
    %c0_0 = arith.constant 0 : index
    %0 = vector.load %arg1[%c0, %c0_0] : memref<128x128xf32, #tpu.memory_space<vmem>>, vector<128x128xf32>
    %c0_1 = arith.constant 0 : index
    %c0_2 = arith.constant 0 : index
    %1 = vector.load %arg2[%c0_1, %c0_2] : memref<128x128xf32, #tpu.memory_space<vmem>>, vector<128x128xf32>
    %cst = arith.constant dense<0.000000e+00> : vector<128x128xf32>
    %2 = tpu.matmul %0, %1, %cst {dimension_numbers = #tpu.dot_dimension_numbers<[1], [0], [0], [1], [0, 0, 1, 1], [], []>, precision = #tpu.contract_precision<fp32>} : vector<128x128xf32>, vector<128x128xf32>, vector<128x128xf32> -> vector<128x128xf32>
    %c0_3 = arith.constant 0 : index
    %c0_4 = arith.constant 0 : index
    %3 = vector.load %arg3[%c0_3, %c0_4] : memref<1x128xf32, #tpu.memory_space<vmem>>, vector<1x128xf32>
    %4 = vector.broadcast %3 : vector<1x128xf32> to vector<128x128xf32>
    %5 = arith.addf %2, %4 : vector<128x128xf32>
    %c0_5 = arith.constant 0 : index
    %c0_6 = arith.constant 0 : index
    %6 = vector.load %arg4[%c0_5, %c0_6] : memref<128x128xf32, #tpu.memory_space<vmem>>, vector<128x128xf32>
    tpu.vector_store %arg4[%c0_5, %c0_6], %5 {strides = array<i32>} : memref<128x128xf32, #tpu.memory_space<vmem>>, vector<128x128xf32>,
    return
  }
  func.func @transform_0(%arg0: i32) -> (i32, i32) {
    %c0_i32 = arith.constant 0 : i32
    %c0_i32_0 = arith.constant 0 : i32
    return %arg0, %c0_i32 : i32, i32
  }
  func.func @transform_1(%arg0: i32) -> (i32, i32) {
    %c0_i32 = arith.constant 0 : i32
    %c0_i32_0 = arith.constant 0 : i32
    %c0_i32_1 = arith.constant 0 : i32
    return %c0_i32, %c0_i32_0 : i32, i32
  }
  func.func @transform_2(%arg0: i32) -> (i32, i32) {
    %c0_i32 = arith.constant 0 : i32
    %c0_i32_0 = arith.constant 0 : i32
    %c0_i32_1 = arith.constant 0 : i32
    return %c0_i32, %c0_i32_0 : i32, i32
  }
  func.func @transform_3(%arg0: i32) -> (i32, i32) {
    %c0_i32 = arith.constant 0 : i32
    %c0_i32_0 = arith.constant 0 : i32
    return %arg0, %c0_i32 : i32, i32
  }
}

module attributes {stable_mosaic.version = 11 : i64} {
  func.func @_mm_bias_res_kernel(%arg0: i32, %arg1: memref<128x128xf32, #tpu.memory_space<vmem>>, %arg2: memref<128x128xf32, #tpu.memory_space<vmem>>, %arg3: memref<1x128xf32, #tpu.memory_space<vmem>>, %arg4: memref<128x128xf32, #tpu.memory_space<vmem>>, %arg5: memref<128x128xf32, #tpu.memory_space<vmem>>) attributes {dimension_semantics = [#tpu.dimension_semantics<parallel>], iteration_bounds = array<i64: 1>, scalar_prefetch = 0 : i64, scratch_operands = 0 : i64, tpu.core_type = #tpu.core_type<tc>, window_params = [{transform_indices = @transform_0, window_bounds = array<i64: 128, 128>}, {pipeline_mode = #tpu.pipeline_mode<synchronous>, transform_indices = @transform_1, window_bounds = array<i64: 128, 128>}, {pipeline_mode = #tpu.pipeline_mode<synchronous>, transform_indices = @transform_2, window_bounds = array<i64: 1, 128>}, {transform_indices = @transform_3, window_bounds = array<i64: 128, 128>}, {transform_indices = @transform_4, window_bounds = array<i64: 128, 128>}]} {
    %c0 = arith.constant 0 : index
    %c0_0 = arith.constant 0 : index
    %0 = vector.load %arg1[%c0, %c0_0] : memref<128x128xf32, #tpu.memory_space<vmem>>, vector<128x128xf32>
    %c0_1 = arith.constant 0 : index
    %c0_2 = arith.constant 0 : index
    %1 = vector.load %arg2[%c0_1, %c0_2] : memref<128x128xf32, #tpu.memory_space<vmem>>, vector<128x128xf32>
    %cst = arith.constant dense<0.000000e+00> : vector<128x128xf32>
    %2 = tpu.matmul %0, %1, %cst {dimension_numbers = #tpu.dot_dimension_numbers<[1], [0], [0], [1], [0, 0, 1, 1], [], []>, precision = #tpu.contract_precision<fp32>} : vector<128x128xf32>, vector<128x128xf32>, vector<128x128xf32> -> vector<128x128xf32>
    %c0_3 = arith.constant 0 : index
    %c0_4 = arith.constant 0 : index
    %3 = vector.load %arg3[%c0_3, %c0_4] : memref<1x128xf32, #tpu.memory_space<vmem>>, vector<1x128xf32>
    %4 = vector.broadcast %3 : vector<1x128xf32> to vector<128x128xf32>
    %5 = arith.addf %2, %4 : vector<128x128xf32>
    %c0_5 = arith.constant 0 : index
    %c0_6 = arith.constant 0 : index
    %6 = vector.load %arg4[%c0_5, %c0_6] : memref<128x128xf32, #tpu.memory_space<vmem>>, vector<128x128xf32>
    %7 = arith.addf %5, %6 : vector<128x128xf32>
    %c0_7 = arith.constant 0 : index
    %c0_8 = arith.constant 0 : index
    %8 = vector.load %arg5[%c0_7, %c0_8] : memref<128x128xf32, #tpu.memory_space<vmem>>, vector<128x128xf32>
    tpu.vector_store %arg5[%c0_7, %c0_8], %7 {strides = array<i32>} : memref<128x128xf32, #tpu.memory_space<vmem>>, vector<128x128xf32>,
    return
  }
  func.func @transform_0(%arg0: i32) -> (i32, i32) {
    %c0_i32 = arith.constant 0 : i32
    %c0_i32_0 = arith.constant 0 : i32
    return %arg0, %c0_i32 : i32, i32
  }
  func.func @transform_1(%arg0: i32) -> (i32, i32) {
    %c0_i32 = arith.constant 0 : i32
    %c0_i32_0 = arith.constant 0 : i32
    %c0_i32_1 = arith.constant 0 : i32
    return %c0_i32, %c0_i32_0 : i32, i32
  }
  func.func @transform_2(%arg0: i32) -> (i32, i32) {
    %c0_i32 = arith.constant 0 : i32
    %c0_i32_0 = arith.constant 0 : i32
    %c0_i32_1 = arith.constant 0 : i32
    return %c0_i32, %c0_i32_0 : i32, i32
  }
  func.func @transform_3(%arg0: i32) -> (i32, i32) {
    %c0_i32 = arith.constant 0 : i32
    %c0_i32_0 = arith.constant 0 : i32
    return %arg0, %c0_i32 : i32, i32
  }
  func.func @transform_4(%arg0: i32) -> (i32, i32) {
    %c0_i32 = arith.constant 0 : i32
    %c0_i32_0 = arith.constant 0 : i32
    return %arg0, %c0_i32 : i32, i32
  }
}

</mosaic_0001>

<bundles_post_ra>
// kernel: down_block.5
= control target key start
LH: loop header
LB: loop body
LE: loop exit
PB: predicated region body
PF: predicated region fallthrough
CT: control target
= control target key end

     0   :  { %s1792_s12 = smov 0   ;;  %s2849_s0 = inlined_call_operand.vmem [shape: f32[512,128], index: 0, kind: input, shape index: {}]   ;;  %s2850_s1 = inlined_call_operand.vmem [shape: f32[128,128], index: 1, kind: input, shape index: {}]   ;;  %s2851_s2 = inlined_call_operand.vmem [shape: f32[1,128], index: 2, kind: input, shape index: {}]   ;;  %s2852_s3 = inlined_call_operand.vmem [shape: f32[512,128], index: 3, kind: output, shape index: {}]  }
   0x1 LB: > { %s1712_s13 = sadd.s32 4294967295, %s1770_s12   ;;  %p1716_p0 = scmp.ge.s32.totalorder %s1770_s12, 1  ;;  %s1770_s12 = sphi %s1792_s12, %s13_s12  }
   0x2   : > { %p138_p1 = scmp.lt.s32.totalorder %s1770_s12, 3 }
   0x4   : > { %p139_p2 = pnand %p1716_p0, %p138_p1 }
   0x6   : > { %142 = sbr.rel (%p139_p2) target bundleno = 571 (0x23b), region = 32 }
   0xb   : > { %v221_v0 = vld [vmem:[%s2850_s1 + $0x78] sm:$0xff]  ;;  %v220_v1 = vld [vmem:[%s2850_s1 + $0x70] sm:$0xff]  ;;  %v219_v2 = vld [vmem:[%s2850_s1 + $0x68] sm:$0xff]  ;;  %s1717_s20 = sshll.u32 %s1712_s13, 5 }
   0xc   : > { %v1809_v3 = vand.u32 4294901760, %v221_v0  ;;  %v1811_v4 = vand.u32 4294901760, %v220_v1  ;;  %v1813_v5 = vand.u32 4294901760, %v219_v2  ;;  %v218_v6 = vld [vmem:[%s2850_s1 + $0x60] sm:$0xff]  ;;  %v217_v7 = vld [vmem:[%s2850_s1 + $0x58] sm:$0xff]  ;;  %v216_v8 = vld [vmem:[%s2850_s1 + $0x50] sm:$0xff] }
   0xd   : > { %v1824_v9 = vand.u32 4294901760, %v218_v6  ;;  %v1826_v10 = vand.u32 4294901760, %v217_v7  ;;  %v1828_v11 = vand.u32 4294901760, %v216_v8  ;;  %v215_v12 = vld [vmem:[%s2850_s1 + $0x48] sm:$0xff]  ;;  %v214_v13 = vld [vmem:[%s2850_s1 + $0x40] sm:$0xff]  ;;  %v213_v17 = vld [vmem:[%s2850_s1 + $0x38] sm:$0xff] }
   0xe   : > { %1723 = vmatpush.msra.mxu2 %v1809_v3  ;;  %v1838_v14 = vsub.f32 %v221_v0, %v1809_v3  ;;  %v1841_v15 = vsub.f32 %v220_v1, %v1811_v4  ;;  %v1844_v16 = vsub.f32 %v219_v2, %v1813_v5  ;;  %227 = vmatpush.msra.mxu0 %v1809_v3  ;;  %p163_p3 = scmp.lt.s32.totalorder %s1717_s20, 63  ;;  %v1850_v18 = vand.u32 4294901760, %v215_v12  ;;  %v212_v25 = vld [vmem:[%s2850_s1 + $0x30] sm:$0xff]  ;;  %v211_v33 = vld [vmem:[%s2850_s1 + $0x28] sm:$0xff]  ;;  %v210_v42 = vld [vmem:[%s2850_s1 + $0x20] sm:$0xff] }
   0xf   : > { %v1853_v19 = vsub.f32 %v218_v6, %v1824_v9  ;;  %v1856_v20 = vsub.f32 %v217_v7, %v1826_v10  ;;  %v1862_v24 = vand.u32 4294901760, %v214_v13  ;;  %v1871_v27 = vand.u32 4294901760, %v213_v17  ;;  %v209_v49 = vld [vmem:[%s2850_s1 + $0x18] sm:$0xff]  ;;  %v208_v55 = vld [vmem:[%s2850_s1 + $0x10] sm:$0xff]  ;;  %v207_v62 = vld [vmem:[%s2850_s1 + $0x8] sm:$0xff] }
  0x10   : > { %1724 = vmatpush.msra.mxu2 %v1811_v4  ;;  %v517_v21 = vand.u32 4294901760, %v1838_v14  ;;  %v523_v22 = vand.u32 4294901760, %v1841_v15  ;;  %v529_v23 = vand.u32 4294901760, %v1844_v16  ;;  %229 = vmatpush.msra.mxu0 %v1811_v4  ;;  %s3024_s20 = smov (!%p163_p3, %s1717_s20), 63  ;;  %v1874_v28 = vsub.f32 %v216_v8, %v1828_v11  ;;  %v206_v2 = vld [vmem:[%s2850_s1] sm:$0xff] }
  0x11   : > { %v535_v26 = vand.u32 4294901760, %v1853_v19  ;;  %v541_v32 = vand.u32 4294901760, %v1856_v20  ;;  %s1718_s10 = sshll.u32 %s3024_s20, 3  ;;  %v1895_v35 = vand.u32 4294901760, %v212_v25  ;;  %v1898_v36 = vsub.f32 %v215_v12, %v1850_v18 }
  0x12   : > { %1725 = vmatpush.msra.mxu2 %v1813_v5  ;;  %v518_v29 = vsub.f32 %v1838_v14, %v517_v21  ;;  %v524_v30 = vsub.f32 %v1841_v15, %v523_v22  ;;  %v530_v31 = vsub.f32 %v1844_v16, %v529_v23  ;;  %231 = vmatpush.msra.mxu0 %v1813_v5  ;;  %s1905_s14 = scalar_lea.vmem %s2849_s0, %s1718_s10  ;;  %v2864_v39 = vand.u32 4294901760, %v1874_v28  ;;  %s2684_s30 = scalar_lea.vmem %s2852_s3, %s1718_s10 }
  0x13   : > { %v536_v34 = vsub.f32 %v1853_v19, %v535_v26  ;;  %v1911_v40 = vsub.f32 %v214_v13, %v1862_v24  ;;  %v1913_v41 = vand.u32 4294901760, %v211_v33  ;;  %v542_v44 = vsub.f32 %v1856_v20, %v541_v32  ;;  %v190_v47 = vld [vmem:[%s1905_s14 + $0x80] sm:$0xff] }
  0x14   : > { %1726 = vmatpush.msra.mxu2 %v1824_v9  ;;  %v519_v37 = vand.u32 4294901760, %v518_v29  ;;  %v525_v38 = vand.u32 4294901760, %v524_v30  ;;  %233 = vmatpush.msra.mxu0 %v1824_v9  ;;  %v531_v43 = vand.u32 4294901760, %v530_v31  ;;  %v2863_v45 = vand.u32 4294901760, %v1898_v36  ;;  %v174_v12 = vld [vmem:[%s1905_s14] sm:$0xff]  ;;  %v191_v30 = vld [vmem:[%s1905_s14 + $0x88] sm:$0xff] }
  0x15   : > { %v1924_v46 = vsub.f32 %v213_v17, %v1871_v27  ;;  %v2861_v48 = vand.u32 4294901760, %v1911_v40  ;;  %v537_v50 = vand.u32 4294901760, %v536_v34  ;;  %v548_v51 = vsub.f32 %v1874_v28, %v2864_v39 }
  0x16   : > { %1727 = vmatpush.msra.mxu2 %v1826_v10  ;;  %1739 = vmatpush.msra.mxu3 %v519_v37  ;;  %v1936_v52 = vand.u32 4294901760, %v210_v42  ;;  %v1939_v53 = vsub.f32 %v212_v25, %v1895_v35  ;;  %v1946_v56 = vand.u32 4294901760, %v190_v47  ;;  %v543_v57 = vand.u32 4294901760, %v542_v44 }
  0x17   : > { %520 = vmatpush.msra.mxu1 %v519_v37  ;;  %235 = vmatpush.msra.mxu0 %v1826_v10  ;;  %v2857_v54 = vand.u32 4294901760, %v1924_v46  ;;  %v554_v58 = vsub.f32 %v1898_v36, %v2863_v45  ;;  %v1952_v59 = vand.u32 4294901760, %v209_v49  ;;  %v1955_v60 = vsub.f32 %v211_v33, %v1913_v41  ;;  %v193_v45 = vld [vmem:[%s1905_s14 + $0x98] sm:$0xff] }
  0x18   : > { %1728 = vmatpush.msra.mxu2 %v1828_v11  ;;  %1740 = vmatpush.msra.mxu3 %v525_v38  ;;  %v560_v61 = vsub.f32 %v1911_v40, %v2861_v48  ;;  %v549_v63 = vand.u32 4294901760, %v548_v51  ;;  %v1965_v0 = vand.u32 4294901760, %v208_v55  ;;  %v2856_v1 = vand.u32 4294901760, %v1939_v53 }
  0x19   : > { %526 = vmatpush.msra.mxu1 %v525_v38  ;;  %237 = vmatpush.msra.mxu0 %v1828_v11  ;;  %v1972_v6 = vsub.f32 %v210_v42, %v1936_v52  ;;  %v566_v7 = vsub.f32 %v1924_v46, %v2857_v54  ;;  %v1979_v8 = vsub.f32 %v190_v47, %v1946_v56  ;;  %v555_v13 = vand.u32 4294901760, %v554_v58 }
  0x1a   : > { %1729 = vmatpush.msra.mxu2 %v1850_v18  ;;  %1741 = vmatpush.msra.mxu3 %v531_v43  ;;  %v1983_v17 = vand.u32 4294901760, %v207_v62  ;;  %v2853_v25 = vand.u32 4294901760, %v1955_v60  ;;  %v1987_v29 = vsub.f32 %v209_v49, %v1952_v59  ;;  %v561_v31 = vand.u32 4294901760, %v560_v61 }
  0x1b   : > { %532 = vmatpush.msra.mxu1 %v531_v43  ;;  %239 = vmatpush.msra.mxu0 %v1850_v18  ;;  %v1990_v33 = vand.u32 4294901760, %v206_v2  ;;  %v572_v34 = vsub.f32 %v1939_v53, %v2856_v1  ;;  %v2854_v37 = vand.u32 4294901760, %v1972_v6  ;;  %v1999_v38 = vsub.f32 %v208_v55, %v1965_v0 }
  0x1c   : > { %1730 = vmatpush.msra.mxu2 %v1862_v24  ;;  %1742 = vmatpush.msra.mxu3 %v537_v50  ;;  %v2001_v42 = vand.u32 4294901760, %v174_v12  ;;  %v567_v43 = vand.u32 4294901760, %v566_v7  ;;  %v2855_v44 = vand.u32 4294901760, %v1979_v8  ;;  %v2005_v47 = vand.u32 4294901760, %v191_v30 }
  0x1d   : > { %538 = vmatpush.msra.mxu1 %v537_v50  ;;  %241 = vmatpush.msra.mxu0 %v1862_v24  ;;  %v578_v49 = vsub.f32 %v1955_v60, %v2853_v25  ;;  %v2858_v50 = vand.u32 4294901760, %v1987_v29  ;;  %v2013_v51 = vsub.f32 %v207_v62, %v1983_v17  ;;  %v573_v58 = vand.u32 4294901760, %v572_v34  ;;  %v192_v34 = vld [vmem:[%s1905_s14 + $0x90] sm:$0xff] }
  0x1e   : > { %1731 = vmatpush.msra.mxu2 %v1871_v27  ;;  %1743 = vmatpush.msra.mxu3 %v543_v57  ;;  %v2016_v55 = vsub.f32 %v174_v12, %v2001_v42  ;;  %v584_v61 = vsub.f32 %v1972_v6, %v2854_v37  ;;  %v2026_v62 = vsub.f32 %v206_v2, %v1990_v33  ;;  %v2050_v1 = vand.u32 4294901760, %v192_v34 }
  0x1f   : > { %544 = vmatpush.msra.mxu1 %v543_v57  ;;  %243 = vmatpush.msra.mxu0 %v1871_v27  ;;  %v175_v57 = vld [vmem:[%s1905_s14 + $0x8] sm:$0xff]  ;;  %v389_v7 = vsub.f32 %v1979_v8, %v2855_v44  ;;  %v2033_v12 = vsub.f32 %v191_v30, %v2005_v47  ;;  %v579_v2 = vand.u32 4294901760, %v578_v49  ;;  %v590_v37 = vsub.f32 %v1987_v29, %v2858_v50 }
  0x20   : > { %1732 = vmatpush.msra.mxu2 %v1895_v35  ;;  %1744 = vmatpush.msra.mxu3 %v549_v63  ;;  %v2037_v25 = vand.u32 4294901760, %v175_v57  ;;  %v585_v30 = vand.u32 4294901760, %v584_v61  ;;  %v607_v49 = vand.u32 4294901760, %v2026_v62  ;;  %v2071_v48 = vsub.f32 %v192_v34, %v2050_v1 }
  0x21   : > { %550 = vmatpush.msra.mxu1 %v549_v63  ;;  %245 = vmatpush.msra.mxu0 %v1895_v35  ;;  %v2859_v63 = vand.u32 4294901760, %v1999_v38  ;;  %v390_v54 = vand.u32 4294901760, %v389_v7  ;;  %v2873_v50 = vand.u32 4294901760, %v2033_v12  ;;  %v176_v7 = vld [vmem:[%s1905_s14 + $0x10] sm:$0xff]  ;;  %v2083_v34 = vand.u32 4294901760, %v193_v45 }
  0x22   : > { %1733 = vmatpush.msra.mxu2 %v1913_v41  ;;  %1745 = vmatpush.msra.mxu3 %v555_v13  ;;  %v2058_v61 = vsub.f32 %v175_v57, %v2037_v25  ;;  %v608_v57 = vsub.f32 %v2026_v62, %v607_v49  ;;  %v2078_v39 = vand.u32 4294901760, %v176_v7 }
  0x23   : > { %556 = vmatpush.msra.mxu1 %v555_v13  ;;  %247 = vmatpush.msra.mxu0 %v1913_v41  ;;  %v2860_v13 = vand.u32 4294901760, %v2016_v55  ;;  %v596_v44 = vsub.f32 %v1999_v38, %v2859_v63  ;;  %v591_v63 = vand.u32 4294901760, %v590_v37  ;;  %v397_v37 = vsub.f32 %v2033_v12, %v2873_v50 }
  0x24   : > { %1734 = vmatpush.msra.mxu2 %v1936_v52  ;;  %1746 = vmatpush.msra.mxu3 %v561_v31 }
  0x25   : > { %562 = vmatpush.msra.mxu1 %v561_v31  ;;  %249 = vmatpush.msra.mxu0 %v1936_v52  ;;  %v2862_v31 = vand.u32 4294901760, %v2013_v51 }
  0x26   : > { %1735 = vmatpush.msra.mxu2 %v1952_v59  ;;  %1747 = vmatpush.msra.mxu3 %v567_v43 }
  0x27   : > { %568 = vmatpush.msra.mxu1 %v567_v43  ;;  %251 = vmatpush.msra.mxu0 %v1952_v59  ;;  %v261_v43 = vsub.f32 %v2016_v55, %v2860_v13  ;;  %v597_v13 = vand.u32 4294901760, %v596_v44 }
  0x28   : > { %1736 = vmatpush.msra.mxu2 %v1965_v0  ;;  %1748 = vmatpush.msra.mxu3 %v573_v58 }
  0x29   : > { %574 = vmatpush.msra.mxu1 %v573_v58  ;;  %253 = vmatpush.msra.mxu0 %v1965_v0  ;;  %v602_v58 = vsub.f32 %v2013_v51, %v2862_v31  ;;  %v2886_v31 = vand.u32 4294901760, %v2058_v61 }
  0x2a   : > { %1737 = vmatpush.msra.mxu2 %v1983_v17  ;;  %1749 = vmatpush.msra.mxu3 %v579_v2 }
  0x2b   : > { %580 = vmatpush.msra.mxu1 %v579_v2  ;;  %255 = vmatpush.msra.mxu0 %v1983_v17  ;;  %v262_v2 = vand.u32 4294901760, %v261_v43  ;;  %v603_v44 = vand.u32 4294901760, %v602_v58  ;;  %v2872_v43 = vand.u32 4294901760, %v2071_v48  ;;  %v269_v58 = vsub.f32 %v2058_v61, %v2886_v31  ;;  %v204_v31 = vld [vmem:[%s1905_s14 + $0xf0] sm:$0xff] }
  0x2c   : > { %1738 = vmatpush.msra.mxu2 %v1990_v33  ;;  %1750 = vmatpush.msra.mxu3 %v585_v30 }
  0x2d   : > { %391 = vmatmul.f32.vlgmr.msra.gmra.mxu2 %v390_v54  ;;  %586 = vmatpush.msra.mxu1 %v585_v30  ;;  %v609_v54 = vand.u32 4294901760, %v608_v57  ;;  %v398_v30 = vand.u32 4294901760, %v397_v37  ;;  %v177_v57 = vld [vmem:[%s1905_s14 + $0x18] sm:$0xff]  ;;  %v194_v37 = vld [vmem:[%s1905_s14 + $0xa0] sm:$0xff] }
  0x2e   : > { %1751 = vmatpush.msra.mxu3 %v591_v63  ;;  %742 = vmatpush.msrb.mxu2 %v1838_v14  ;;  %v270_v14 = vand.u32 4294901760, %v269_v58 }
  0x2f   : > { %592 = vmatpush.msra.mxu1 %v591_v63  ;;  %257 = vmatpush.msra.mxu0 %v1990_v33  ;;  %v2090_v63 = vsub.f32 %v176_v7, %v2078_v39  ;;  %v405_v7 = vsub.f32 %v2071_v48, %v2872_v43 }
  0x30   : > { %1752 = vmatpush.msra.mxu3 %v597_v13  ;;  %745 = vmatpush.msrb.mxu2 %v1841_v15  ;;  %v2114_v15 = vand.u32 4294901760, %v194_v37 }
  0x31   : > { %598 = vmatpush.msra.mxu1 %v597_v13  ;;  %263 = vmatmul.f32.vlgmr.msra.gmra.mxu0 %v262_v2  ;;  %v2097_v13 = vsub.f32 %v193_v45, %v2083_v34  ;;  %v2107_v2 = vand.u32 4294901760, %v177_v57 }
  0x32   : > { %1753 = vmatpush.msra.mxu3 %v603_v44  ;;  %1177 = vmatpush.msrb.mxu0 %v517_v21  ;;  %v2884_v21 = vand.u32 4294901760, %v2090_v63 }
  0x33   : > { %604 = vmatpush.msra.mxu1 %v603_v44  ;;  %748 = vmatpush.msrb.mxu2 %v1844_v16  ;;  %v2870_v45 = vand.u32 4294901760, %v2097_v13 }
  0x34   : > { %1754 = vmatpush.msra.mxu3 %v609_v54  ;;  %1181 = vmatpush.msrb.mxu0 %v523_v22  ;;  %v406_v22 = vand.u32 4294901760, %v405_v7  ;;  %v277_v44 = vsub.f32 %v2090_v63, %v2884_v21 }
  0x35   : > { %399 = vmatmul.f32.gmra.mxu2 %v398_v30  ;;  %676 = vmatmul.f32.vlgmr.msra.gmra.mxu3 %v1946_v56  ;;  %v2131_v30 = vsub.f32 %v194_v37, %v2114_v15 }
  0x36   : > { %950 = vmatpush.msrb.mxu3 %v1809_v3  ;;  %610 = vmatpush.msra.mxu1 %v609_v54  ;;  %v2122_v54 = vsub.f32 %v177_v57, %v2107_v2  ;;  %v278_v58 = vand.u32 4294901760, %v277_v44  ;;  %v195_v57 = vld [vmem:[%s1905_s14 + $0xa8] sm:$0xff]  ;;  %v196_v44 = vld [vmem:[%s1905_s14 + $0xb0] sm:$0xff] }
  0x37   : > { %612 = vmatmul.f32.vlgmr.msra.gmra.mxu1 %v2001_v42  ;;  %751 = vmatpush.msrb.mxu2 %v1853_v19  ;;  %v2154_v37 = vand.u32 4294901760, %v195_v57 }
  0x38   : > { %952 = vmatpush.msrb.mxu3 %v1811_v4  ;;  %1368 = vmatpush.msrb.mxu1 %v1809_v3  ;;  %v178_v3 = vld [vmem:[%s1905_s14 + $0x20] sm:$0xff]  ;;  %v2882_v16 = vand.u32 4294901760, %v2122_v54 }
  0x39   : > { %271 = vmatmul.f32.gmra.mxu0 %v270_v14  ;;  %754 = vmatpush.msrb.mxu2 %v1856_v20 }
  0x3a   : > { %954 = vmatpush.msrb.mxu3 %v1813_v5  ;;  %1370 = vmatpush.msrb.mxu1 %v1811_v4  ;;  %v413_v4 = vsub.f32 %v2097_v13, %v2870_v45  ;;  %v285_v14 = vsub.f32 %v2122_v54, %v2882_v16 }
  0x3b   : > { %1185 = vmatpush.msrb.mxu0 %v529_v23  ;;  %757 = vmatpush.msrb.mxu2 %v1874_v28  ;;  %v2140_v23 = vand.u32 4294901760, %v178_v3 }
  0x3c   : > { %956 = vmatpush.msrb.mxu3 %v1824_v9  ;;  %1372 = vmatpush.msrb.mxu1 %v1813_v5  ;;  %v2869_v5 = vand.u32 4294901760, %v2131_v30  ;;  %v414_v7 = vand.u32 4294901760, %v413_v4  ;;  %v286_v20 = vand.u32 4294901760, %v285_v14  ;;  %v2923_v14 = vand.u32 4294901760, %v1911_v40 }
  0x3d   : > { %407 = vmatmul.f32.gmra.mxu2 %v406_v22  ;;  %680 = vmatmul.f32.gmra.mxu3 %v2005_v47  ;;  %v2157_v19 = vsub.f32 %v178_v3, %v2140_v23  ;;  %v2921_v22 = vand.u32 4294901760, %v1874_v28  ;;  %v2922_v28 = vand.u32 4294901760, %v1898_v36 }
  0x3e   : > { %958 = vmatpush.msrb.mxu3 %v1826_v10  ;;  %1189 = vmatpush.msrb.mxu0 %v535_v26  ;;  %v421_v26 = vsub.f32 %v2131_v30, %v2869_v5 }
  0x3f   : > { %616 = vmatmul.f32.gmra.mxu1 %v2037_v25  ;;  %760 = vmatpush.msrb.mxu2 %v1898_v36 }
  0x40   : > { %1374 = vmatpush.msrb.mxu1 %v1824_v9  ;;  %960 = vmatpush.msrb.mxu3 %v1828_v11  ;;  %v179_v9 = vld [vmem:[%s1905_s14 + $0x28] sm:$0xff]  ;;  %v422_v4 = vand.u32 4294901760, %v421_v26  ;;  %v2924_v26 = vand.u32 4294901760, %v1924_v46 }
  0x41   : > { %279 = vmatmul.f32.gmra.mxu0 %v278_v58  ;;  %763 = vmatpush.msrb.mxu2 %v1911_v40  ;;  %v2178_v3 = vand.u32 4294901760, %v179_v9 }
  0x42   : > { %1193 = vmatpush.msrb.mxu0 %v541_v32  ;;  %1376 = vmatpush.msrb.mxu1 %v1826_v10  ;;  %v2174_v10 = vsub.f32 %v195_v57, %v2154_v37  ;;  %v2880_v32 = vand.u32 4294901760, %v2157_v19 }
  0x43   : > { %962 = vmatpush.msrb.mxu3 %v1850_v18  ;;  %766 = vmatpush.msrb.mxu2 %v1924_v46  ;;  %v2194_v36 = vsub.f32 %v179_v9, %v2178_v3  ;;  %v2925_v46 = vand.u32 4294901760, %v1939_v53 }
  0x44   : > { %1197 = vmatpush.msrb.mxu0 %v2921_v22  ;;  %1378 = vmatpush.msrb.mxu1 %v1828_v11  ;;  %v2185_v11 = vand.u32 4294901760, %v196_v44  ;;  %v2868_v58 = vand.u32 4294901760, %v2174_v10  ;;  %v293_v57 = vsub.f32 %v2157_v19, %v2880_v32 }
  0x45   : > { %415 = vmatmul.f32.gmra.mxu2 %v414_v7  ;;  %684 = vmatmul.f32.gmra.mxu3 %v2050_v1  ;;  %v180_v7 = vld [vmem:[%s1905_s14 + $0x30] sm:$0xff]  ;;  %v2879_v9 = vand.u32 4294901760, %v2194_v36 }
  0x46   : > { %964 = vmatpush.msrb.mxu3 %v1862_v24  ;;  %1201 = vmatpush.msrb.mxu0 %v2922_v28  ;;  %v429_v40 = vsub.f32 %v2174_v10, %v2868_v58  ;;  %v2214_v22 = vand.u32 4294901760, %v180_v7 }
  0x47   : > { %620 = vmatmul.f32.gmra.mxu1 %v2078_v39  ;;  %769 = vmatpush.msrb.mxu2 %v1939_v53  ;;  %v301_v28 = vsub.f32 %v2194_v36, %v2879_v9 }
  0x48   : > { %1380 = vmatpush.msrb.mxu1 %v1850_v18  ;;  %966 = vmatpush.msrb.mxu3 %v1871_v27  ;;  %v2204_v18 = vsub.f32 %v196_v44, %v2185_v11  ;;  %v430_v44 = vand.u32 4294901760, %v429_v40  ;;  %v2231_v53 = vsub.f32 %v180_v7, %v2214_v22  ;;  %v198_v40 = vld [vmem:[%s1905_s14 + $0xc0] sm:$0xff] }
  0x49   : > { %287 = vmatmul.f32.gmra.mxu0 %v286_v20  ;;  %772 = vmatpush.msrb.mxu2 %v1955_v60  ;;  %v197_v20 = vld [vmem:[%s1905_s14 + $0xb8] sm:$0xff] }
  0x4a   : > { %1205 = vmatpush.msrb.mxu0 %v2923_v14  ;;  %1382 = vmatpush.msrb.mxu1 %v1862_v24  ;;  %v294_v24 = vand.u32 4294901760, %v293_v57  ;;  %v181_v57 = vld [vmem:[%s1905_s14 + $0x38] sm:$0xff]  ;;  %v2926_v14 = vand.u32 4294901760, %v1955_v60  ;;  %v302_v60 = vand.u32 4294901760, %v301_v28  ;;  %v182_v28 = vld [vmem:[%s1905_s14 + $0x40] sm:$0xff] }
  0x4b   : > { %968 = vmatpush.msrb.mxu3 %v1895_v35  ;;  %775 = vmatpush.msrb.mxu2 %v1972_v6 }
  0x4c   : > { %1209 = vmatpush.msrb.mxu0 %v2924_v26  ;;  %1384 = vmatpush.msrb.mxu1 %v1871_v27  ;;  %v2867_v27 = vand.u32 4294901760, %v2204_v18  ;;  %v2927_v26 = vand.u32 4294901760, %v1972_v6  ;;  %v2928_v6 = vand.u32 4294901760, %v1987_v29 }
  0x4d   : > { %423 = vmatmul.f32.gmra.mxu2 %v422_v4  ;;  %688 = vmatmul.f32.gmra.mxu3 %v2083_v34  ;;  %v2228_v4 = vand.u32 4294901760, %v197_v20 }
  0x4e   : > { %970 = vmatpush.msrb.mxu3 %v1913_v41  ;;  %1213 = vmatpush.msrb.mxu0 %v2925_v46 }
  0x4f   : > { %624 = vmatmul.f32.gmra.mxu1 %v2107_v2  ;;  %778 = vmatpush.msrb.mxu2 %v1987_v29  ;;  %v2248_v7 = vsub.f32 %v197_v20, %v2228_v4 }
  0x50   : > { %1386 = vmatpush.msrb.mxu1 %v1895_v35  ;;  %972 = vmatpush.msrb.mxu3 %v1936_v52  ;;  %v437_v35 = vsub.f32 %v2204_v18, %v2867_v27 }
  0x51   : > { %295 = vmatmul.f32.gmra.mxu0 %v294_v24  ;;  %781 = vmatpush.msrb.mxu2 %v1999_v38  ;;  %v2252_v24 = vand.u32 4294901760, %v181_v57  ;;  %v2866_v46 = vand.u32 4294901760, %v2248_v7 }
  0x52   : > { %1217 = vmatpush.msrb.mxu0 %v2926_v14  ;;  %1388 = vmatpush.msrb.mxu1 %v1913_v41  ;;  %v2878_v41 = vand.u32 4294901760, %v2231_v53  ;;  %v438_v20 = vand.u32 4294901760, %v437_v35  ;;  %v2930_v14 = vand.u32 4294901760, %v1999_v38  ;;  %v2931_v35 = vand.u32 4294901760, %v2013_v51 }
  0x53   : > { %974 = vmatpush.msrb.mxu3 %v1952_v59  ;;  %784 = vmatpush.msrb.mxu2 %v2013_v51  ;;  %v445_v38 = vsub.f32 %v2248_v7, %v2866_v46 }
  0x54   : > { %1221 = vmatpush.msrb.mxu0 %v2927_v26  ;;  %1390 = vmatpush.msrb.mxu1 %v1936_v52  ;;  %v2259_v52 = vand.u32 4294901760, %v198_v40  ;;  %v309_v29 = vsub.f32 %v2231_v53, %v2878_v41  ;;  %v2286_v26 = vand.u32 4294901760, %v182_v28 }
  0x55   : > { %431 = vmatmul.f32.gmra.mxu2 %v430_v44  ;;  %692 = vmatmul.f32.gmra.mxu3 %v2114_v15  ;;  %v2268_v44 = vsub.f32 %v181_v57, %v2252_v24  ;;  %v446_v51 = vand.u32 4294901760, %v445_v38 }
  0x56   : > { %976 = vmatpush.msrb.mxu3 %v1965_v0  ;;  %1225 = vmatpush.msrb.mxu0 %v2928_v6  ;;  %2929 = vst [vmem:[#allocation2_spill] sm:$0xff] %v2259_v52  ;;  %v310_v57 = vand.u32 4294901760, %v309_v29 }
  0x57   : > { %628 = vmatmul.f32.gmra.mxu1 %v2140_v23  ;;  %787 = vmatpush.msrb.mxu2 %v2026_v62  ;;  %v183_v62 = vld [vmem:[%s1905_s14 + $0x48] sm:$0xff] }
  0x58   : > { %1392 = vmatpush.msrb.mxu1 %v1952_v59  ;;  %978 = vmatpush.msrb.mxu3 %v1983_v17  ;;  %v2276_v59 = vsub.f32 %v198_v40, %v2259_v52  ;;  %v2312_v38 = vand.u32 4294901760, %v183_v62 }
  0x59   : > { %303 = vmatmul.f32.gmra.mxu0 %v302_v60  ;;  %v199_v60 = vld [vmem:[%s1905_s14 + $0xc8] sm:$0xff] }
  0x5a   : > { %1229 = vmatpush.msrb.mxu0 %v2930_v14  ;;  %1394 = vmatpush.msrb.mxu1 %v1965_v0  ;;  %v2876_v0 = vand.u32 4294901760, %v2268_v44  ;;  %v2297_v6 = vand.u32 4294901760, %v199_v60 }
  0x5b   : > { %980 = vmatpush.msrb.mxu3 %v1990_v33 }
  0x5c   : > { %1233 = vmatpush.msrb.mxu0 %v2931_v35  ;;  %1396 = vmatpush.msrb.mxu1 %v1983_v17  ;;  %v2865_v17 = vand.u32 4294901760, %v2276_v59  ;;  %v317_v40 = vsub.f32 %v2268_v44, %v2876_v0  ;;  %2932 = vst [vmem:[#allocation3_spill] sm:$0xff] %v2297_v6  ;;  %v2308_v29 = vsub.f32 %v199_v60, %v2297_v6  ;;  %v200_v35 = vld [vmem:[%s1905_s14 + $0xd0] sm:$0xff] }
  0x5d   : > { %439 = vmatmul.f32.gmra.mxu2 %v438_v20  ;;  %696 = vmatmul.f32.gmra.mxu3 %v2154_v37  ;;  %v2300_v20 = vsub.f32 %v182_v28, %v2286_v26  ;;  %v2315_v28 = vand.u32 4294901760, %v200_v35  ;;  %v2322_v60 = vsub.f32 %v183_v62, %v2312_v38  ;;  %v201_v62 = vld [vmem:[%s1905_s14 + $0xd8] sm:$0xff] }
  0x5e   : > { %1237 = vmatpush.msrb.mxu0 %v607_v49  ;;  %1398 = vmatpush.msrb.mxu1 %v1990_v33  ;;  %v453_v33 = vsub.f32 %v2276_v59, %v2865_v17  ;;  %v318_v49 = vand.u32 4294901760, %v317_v40  ;;  %2933 = vst [vmem:[#allocation4_spill] sm:$0xff] %v2308_v29  ;;  %v184_v17 = vld [vmem:[%s1905_s14 + $0x50] sm:$0xff]  ;;  %v2341_v45 = vand.u32 4294901760, %v201_v62 }
  0x5f   : > { %632 = vmatmul.f32.gmra.mxu1 %v2178_v3  ;;  %v2875_v14 = vand.u32 4294901760, %v2300_v20  ;;  %2934 = vst [vmem:[#allocation5_spill] sm:$0xff] %v2315_v28  ;;  %v2326_v46 = vsub.f32 %v200_v35, %v2315_v28  ;;  %v2874_v27 = vand.u32 4294901760, %v2322_v60  ;;  %v2333_v58 = vand.u32 4294901760, %v184_v17 }
  0x60   : > { %2936 = vst [vmem:[#allocation7_spill] sm:$0xff] %v2341_v45 }
  0x61   : > { %311 = vmatmul.f32.gmra.mxu0 %v310_v57  ;;  %v454_v57 = vand.u32 4294901760, %v453_v33  ;;  %v325_v40 = vsub.f32 %v2300_v20, %v2875_v14  ;;  %2935 = vst [vmem:[#allocation6_spill] sm:$0xff] %v2326_v46  ;;  %v2877_v5 = vand.u32 4294901760, %v2326_v46 }
  0x63   : > { %v469_v43 = vsub.f32 %v2326_v46, %v2877_v5  ;;  %v186_v5 = vld [vmem:[%s1905_s14 + $0x60] sm:$0xff] }
  0x64   : > { %v2377_v32 = vand.u32 4294901760, %v186_v5 }
  0x65   : > { %447 = vmatmul.f32.gmra.mxu2 %v446_v51  ;;  %700 = vmatmul.f32.gmra.mxu3 %v2185_v11  ;;  %v2871_v51 = vand.u32 4294901760, %v2308_v29  ;;  %v470_v0 = vand.u32 4294901760, %v469_v43 }
  0x67   : > { %636 = vmatmul.f32.gmra.mxu1 %v2214_v22  ;;  %v461_v33 = vsub.f32 %v2308_v29, %v2871_v51  ;;  %v185_v51 = vld [vmem:[%s1905_s14 + $0x58] sm:$0xff] }
  0x68   : > { %v2356_v14 = vand.u32 4294901760, %v185_v51 }
  0x69   : > { %319 = vmatmul.f32.gmra.mxu0 %v318_v49  ;;  %v326_v49 = vand.u32 4294901760, %v325_v40  ;;  %v462_v35 = vand.u32 4294901760, %v461_v33  ;;  %v2344_v40 = vsub.f32 %v184_v17, %v2333_v58 }
  0x6b   : > { %v2881_v50 = vand.u32 4294901760, %v2344_v40 }
  0x6d   : > { %455 = vmatmul.f32.gmra.mxu2 %v454_v57  ;;  %704 = vmatmul.f32.gmra.mxu3 %v2228_v4  ;;  %v333_v57 = vsub.f32 %v2322_v60, %v2874_v27  ;;  %v202_v27 = vld [vmem:[%s1905_s14 + $0xe0] sm:$0xff] }
  0x6e   : > { %v2359_v17 = vand.u32 4294901760, %v202_v27 }
  0x6f   : > { %640 = vmatmul.f32.gmra.mxu1 %v2252_v24  ;;  %v334_v33 = vand.u32 4294901760, %v333_v57  ;;  %v341_v57 = vsub.f32 %v2344_v40, %v2881_v50 }
  0x70   : > { %v2370_v41 = vsub.f32 %v202_v27, %v2359_v17 }
  0x71   : > { %327 = vmatmul.f32.gmra.mxu0 %v326_v49  ;;  %v2352_v49 = vsub.f32 %v201_v62, %v2341_v45  ;;  %v2366_v62 = vsub.f32 %v185_v51, %v2356_v14  ;;  %v203_v51 = vld [vmem:[%s1905_s14 + $0xe8] sm:$0xff] }
  0x72   : > { %2938 = vst [vmem:[#allocation9_spill] sm:$0xff] %v2370_v41  ;;  %v2891_v50 = vand.u32 4294901760, %v2370_v41  ;;  %v2385_v16 = vand.u32 4294901760, %v203_v51 }
  0x73   : > { %2937 = vst [vmem:[#allocation8_spill] sm:$0xff] %v2352_v49  ;;  %v2885_v9 = vand.u32 4294901760, %v2366_v62 }
  0x74   : > { %v485_v21 = vsub.f32 %v2370_v41, %v2891_v50  ;;  %v188_v50 = vld [vmem:[%s1905_s14 + $0x70] sm:$0xff] }
  0x75   : > { %463 = vmatmul.f32.gmra.mxu2 %v462_v35  ;;  %708 = vmatmul.f32.gmra.mxu3 %v2259_v52  ;;  %v2883_v35 = vand.u32 4294901760, %v2352_v49 }
  0x76   : > { %v486_v46 = vand.u32 4294901760, %v485_v21 }
  0x77   : > { %644 = vmatmul.f32.gmra.mxu1 %v2286_v26  ;;  %v477_v43 = vsub.f32 %v2352_v49, %v2883_v35  ;;  %v187_v35 = vld [vmem:[%s1905_s14 + $0x68] sm:$0xff] }
  0x78   : > { %v2400_v49 = vand.u32 4294901760, %v187_v35 }
  0x79   : > { %335 = vmatmul.f32.gmra.mxu0 %v334_v33  ;;  %v342_v33 = vand.u32 4294901760, %v341_v57  ;;  %v478_v27 = vand.u32 4294901760, %v477_v43  ;;  %v2388_v57 = vsub.f32 %v186_v5, %v2377_v32  ;;  %v2403_v5 = vand.u32 4294901760, %v204_v31 }
  0x7b   : > { %2940 = vst [vmem:[#allocation11_spill] sm:$0xff] %v2403_v5  ;;  %v2414_v41 = vsub.f32 %v204_v31, %v2403_v5 }
  0x7d   : > { %471 = vmatmul.f32.gmra.mxu2 %v470_v0  ;;  %712 = vmatmul.f32.gmra.mxu3 %v2297_v6  ;;  %v349_v0 = vsub.f32 %v2366_v62, %v2885_v9  ;;  %v2898_v9 = vand.u32 4294901760, %v2388_v57  ;;  %2941 = vst [vmem:[#allocation12_spill] sm:$0xff] %v2414_v41  ;;  %v2421_v6 = vand.u32 4294901760, %v188_v50 }
  0x7f   : > { %648 = vmatmul.f32.gmra.mxu1 %v2312_v38  ;;  %v350_v43 = vand.u32 4294901760, %v349_v0  ;;  %v357_v0 = vsub.f32 %v2388_v57, %v2898_v9  ;;  %v205_v9 = vld [vmem:[%s1905_s14 + $0xf8] sm:$0xff] }
  0x81   : > { %343 = vmatmul.f32.gmra.mxu0 %v342_v33  ;;  %v2396_v33 = vsub.f32 %v203_v51, %v2385_v16  ;;  %v2410_v51 = vsub.f32 %v187_v35, %v2400_v49  ;;  %v2909_v35 = vand.u32 4294901760, %v2414_v41 }
  0x83   : > { %2939 = vst [vmem:[#allocation10_spill] sm:$0xff] %v2396_v33 }
  0x85   : > { %479 = vmatmul.f32.gmra.mxu2 %v478_v27  ;;  %716 = vmatmul.f32.gmra.mxu3 %v2315_v28  ;;  %v2901_v27 = vand.u32 4294901760, %v2396_v33  ;;  %v2906_v28 = vand.u32 4294901760, %v2410_v51 }
  0x87   : > { %652 = vmatmul.f32.gmra.mxu1 %v2333_v58  ;;  %v493_v21 = vsub.f32 %v2396_v33, %v2901_v27  ;;  %v365_v31 = vsub.f32 %v2410_v51, %v2906_v28  ;;  %v2432_v27 = vsub.f32 %v188_v50, %v2421_v6  ;;  %v501_v33 = vsub.f32 %v2414_v41, %v2909_v35 }
  0x89   : > { %351 = vmatmul.f32.gmra.mxu0 %v350_v43  ;;  %v358_v43 = vand.u32 4294901760, %v357_v0  ;;  %v494_v29 = vand.u32 4294901760, %v493_v21  ;;  %v189_v0 = vld [vmem:[%s1905_s14 + $0x78] sm:$0xff]  ;;  %v502_v50 = vand.u32 4294901760, %v501_v33 }
  0x8a   : > { %v2443_v28 = vand.u32 4294901760, %v189_v0 }
  0x8c   : > { %v2451_v35 = vsub.f32 %v189_v0, %v2443_v28 }
  0x8d   : > { %487 = vmatmul.f32.gmra.mxu2 %v486_v46  ;;  %720 = vmatmul.f32.gmra.mxu3 %v2341_v45  ;;  %v2429_v46 = vand.u32 4294901760, %v205_v9  ;;  %v366_v45 = vand.u32 4294901760, %v365_v31 }
  0x8e   : > { %v2912_v33 = vand.u32 4294901760, %v2451_v35 }
  0x8f   : > { %656 = vmatmul.f32.gmra.mxu1 %v2356_v14  ;;  %2942 = vst [vmem:[#allocation13_spill] sm:$0xff] %v2429_v46  ;;  %v2440_v21 = vsub.f32 %v205_v9, %v2429_v46 }
  0x91   : > { %359 = vmatmul.f32.gmra.mxu0 %v358_v43  ;;  %2943 = vst [vmem:[#allocation14_spill] sm:$0xff] %v2440_v21  ;;  %v2910_v43 = vand.u32 4294901760, %v2432_v27  ;;  %v2911_v52 = vand.u32 4294901760, %v2440_v21 }
  0x93   : > { %v509_v9 = vsub.f32 %v2440_v21, %v2911_v52 }
  0x95   : > { %495 = vmatmul.f32.gmra.mxu2 %v494_v29  ;;  %724 = vmatmul.f32.gmra.mxu3 %v2359_v17  ;;  %v373_v29 = vsub.f32 %v2432_v27, %v2910_v43  ;;  %v381_v43 = vsub.f32 %v2451_v35, %v2912_v33 }
  0x97   : > { %660 = vmatmul.f32.gmra.mxu1 %v2377_v32  ;;  %v374_v31 = vand.u32 4294901760, %v373_v29  ;;  %v382_v0 = vand.u32 4294901760, %v381_v43 }
  0x99   : > { %367 = vmatmul.f32.gmra.mxu0 %v366_v45  ;;  %v510_v45 = vand.u32 4294901760, %v509_v9  ;;  %v2472_v9 = vld [vmem:[%s2851_s2] ss:$0 sm:$0xff] }
  0x9d   : > { %503 = vmatmul.f32.gmra.mxu2 %v502_v50  ;;  %728 = vmatmul.f32.gmra.mxu3 %v2385_v16 }
  0x9f   : > { %664 = vmatmul.f32.gmra.mxu1 %v2400_v49 }
  0xa1   : > { %375 = vmatmul.f32.gmra.mxu0 %v374_v31 }
  0xa5   : > { %511 = vmatmul.f32.gmra.mxu2 %v510_v45  ;;  %732 = vmatmul.f32.gmra.mxu3 %v2403_v5  ;;  %v2944_v45 = vand.u32 4294901760, %v2016_v55 }
  0xa7   : > { %668 = vmatmul.f32.gmra.mxu1 %v2421_v6 }
  0xa9   : > { %383 = vmatmul.f32.gmra.mxu0 %v382_v0 }
  0xad   : > { %736 = vmatmul.f32.gmra.mxu3 %v2429_v46  ;;  %790 = vmatmul.f32.vlgmr.msrb.gmra.mxu2 %v2016_v55 }
  0xae   : > { %v2466_v50 = vpop.f32.mrf.mxu0 }
  0xaf   : > { %672 = vmatmul.f32.gmra.mxu1 %v2443_v28 }
  0xb0   : > { %v392_v29 = vpop.f32.mrf.mxu2 }
  0xb1   : > { %1239 = vmatmul.f32.vlgmr.msrb.gmra.mxu0 %v2001_v42  ;;  %v393_v31 = vadd.f32 %v2472_v9, %v392_v29  ;;  %v2946_v29 = vand.u32 4294901760, %v2058_v61 }
  0xb4   : > { %v2475_v43 = vpop.f32.mrf.mxu1 }
  0xb5   : > { %795 = vmatmul.f32.gmra.mxu2 %v2058_v61  ;;  %984 = vmatmul.f32.vlgmr.msrb.gmra.mxu3 %v2944_v45 }
  0xb6   : > { %v2481_v0 = vpop.f32.mrf.mxu0 }
  0xb7   : > { %1400 = vmatmul.f32.vlgmr.msrb.gmra.mxu1 %v2001_v42 }
  0xb8   : > { %v400_v52 = vpop.f32.mrf.mxu2  ;;  %v677_v33 = vpop.f32.mrf.mxu3 }
  0xb9   : > { %v2484_v46 = vadd.f32 %v677_v33, %v393_v31  ;;  %1243 = vmatmul.f32.gmra.mxu0 %v2037_v25  ;;  %v401_v5 = vadd.f32 %v2472_v9, %v400_v52  ;;  %v2948_v52 = vand.u32 4294901760, %v2090_v63 }
  0xbb   : > { %2945 = vst [vmem:[#allocation15_spill] sm:$0xff] %v2484_v46 }
  0xbc   : > { %v2487_v21 = vpop.f32.mrf.mxu1 }
  0xbd   : > { %800 = vmatmul.f32.gmra.mxu2 %v2090_v63  ;;  %990 = vmatmul.f32.gmra.mxu3 %v2946_v29 }
  0xbe   : > { %v2493_v55 = vpop.f32.mrf.mxu0 }
  0xbf   : > { %1404 = vmatmul.f32.gmra.mxu1 %v2037_v25 }
  0xc0   : > { %v408_v42 = vpop.f32.mrf.mxu2  ;;  %v681_v45 = vpop.f32.mrf.mxu3 }
  0xc1   : > { %v2496_v41 = vadd.f32 %v681_v45, %v401_v5  ;;  %1247 = vmatmul.f32.gmra.mxu0 %v2078_v39  ;;  %v409_v31 = vadd.f32 %v2472_v9, %v408_v42  ;;  %v2950_v42 = vand.u32 4294901760, %v2122_v54 }
  0xc3   : > { %2947 = vst [vmem:[#allocation16_spill] sm:$0xff] %v2496_v41 }
  0xc4   : > { %v2499_v33 = vpop.f32.mrf.mxu1 }
  0xc5   : > { %805 = vmatmul.f32.gmra.mxu2 %v2122_v54  ;;  %996 = vmatmul.f32.gmra.mxu3 %v2948_v52 }
  0xc6   : > { %v2505_v61 = vpop.f32.mrf.mxu0 }
  0xc7   : > { %1408 = vmatmul.f32.gmra.mxu1 %v2078_v39 }
  0xc8   : > { %v416_v25 = vpop.f32.mrf.mxu2  ;;  %v685_v29 = vpop.f32.mrf.mxu3 }
  0xc9   : > { %v2508_v46 = vadd.f32 %v685_v29, %v409_v31  ;;  %1251 = vmatmul.f32.gmra.mxu0 %v2107_v2  ;;  %v417_v45 = vadd.f32 %v2472_v9, %v416_v25  ;;  %v2952_v25 = vand.u32 4294901760, %v2157_v19 }
  0xcb   : > { %2949 = vst [vmem:[#allocation17_spill] sm:$0xff] %v2508_v46 }
  0xcc   : > { %v2511_v5 = vpop.f32.mrf.mxu1 }
  0xcd   : > { %810 = vmatmul.f32.gmra.mxu2 %v2157_v19  ;;  %1002 = vmatmul.f32.gmra.mxu3 %v2950_v42 }
  0xce   : > { %v2517_v63 = vpop.f32.mrf.mxu0 }
  0xcf   : > { %1412 = vmatmul.f32.gmra.mxu1 %v2107_v2 }
  0xd0   : > { %v424_v39 = vpop.f32.mrf.mxu2  ;;  %v689_v52 = vpop.f32.mrf.mxu3 }
  0xd1   : > { %v2520_v41 = vadd.f32 %v689_v52, %v417_v45  ;;  %1255 = vmatmul.f32.gmra.mxu0 %v2140_v23  ;;  %v425_v29 = vadd.f32 %v2472_v9, %v424_v39  ;;  %v2954_v39 = vand.u32 4294901760, %v2194_v36 }
  0xd3   : > { %2951 = vst [vmem:[#allocation18_spill] sm:$0xff] %v2520_v41 }
  0xd4   : > { %v2523_v31 = vpop.f32.mrf.mxu1 }
  0xd5   : > { %815 = vmatmul.f32.gmra.mxu2 %v2194_v36  ;;  %1008 = vmatmul.f32.gmra.mxu3 %v2952_v25 }
  0xd6   : > { %v2529_v54 = vpop.f32.mrf.mxu0 }
  0xd7   : > { %1416 = vmatmul.f32.gmra.mxu1 %v2140_v23 }
  0xd8   : > { %v432_v2 = vpop.f32.mrf.mxu2  ;;  %v693_v42 = vpop.f32.mrf.mxu3 }
  0xd9   : > { %v2532_v46 = vadd.f32 %v693_v42, %v425_v29  ;;  %1259 = vmatmul.f32.gmra.mxu0 %v2178_v3  ;;  %v433_v52 = vadd.f32 %v2472_v9, %v432_v2  ;;  %v2956_v2 = vand.u32 4294901760, %v2231_v53 }
  0xdb   : > { %2953 = vst [vmem:[#allocation19_spill] sm:$0xff] %v2532_v46 }
  0xdc   : > { %v2535_v45 = vpop.f32.mrf.mxu1 }
  0xdd   : > { %820 = vmatmul.f32.gmra.mxu2 %v2231_v53  ;;  %1014 = vmatmul.f32.gmra.mxu3 %v2954_v39 }
  0xde   : > { %v2541_v19 = vpop.f32.mrf.mxu0 }
  0xdf   : > { %1420 = vmatmul.f32.gmra.mxu1 %v2178_v3 }
  0xe0   : > { %v440_v23 = vpop.f32.mrf.mxu2  ;;  %v697_v25 = vpop.f32.mrf.mxu3 }
  0xe1   : > { %v2544_v41 = vadd.f32 %v697_v25, %v433_v52  ;;  %1263 = vmatmul.f32.gmra.mxu0 %v2214_v22  ;;  %v441_v42 = vadd.f32 %v2472_v9, %v440_v23  ;;  %v2958_v23 = vand.u32 4294901760, %v2268_v44 }
  0xe3   : > { %2955 = vst [vmem:[#allocation20_spill] sm:$0xff] %v2544_v41 }
  0xe4   : > { %v2547_v29 = vpop.f32.mrf.mxu1 }
  0xe5   : > { %825 = vmatmul.f32.gmra.mxu2 %v2268_v44  ;;  %1020 = vmatmul.f32.gmra.mxu3 %v2956_v2 }
  0xe6   : > { %v2553_v36 = vpop.f32.mrf.mxu0 }
  0xe7   : > { %1424 = vmatmul.f32.gmra.mxu1 %v2214_v22 }
  0xe8   : > { %v448_v3 = vpop.f32.mrf.mxu2  ;;  %v701_v39 = vpop.f32.mrf.mxu3 }
  0xe9   : > { %v2556_v46 = vadd.f32 %v701_v39, %v441_v42  ;;  %1267 = vmatmul.f32.gmra.mxu0 %v2252_v24  ;;  %v449_v25 = vadd.f32 %v2472_v9, %v448_v3  ;;  %v2960_v3 = vand.u32 4294901760, %v2300_v20 }
  0xeb   : > { %2957 = vst [vmem:[#allocation21_spill] sm:$0xff] %v2556_v46 }
  0xec   : > { %v2559_v52 = vpop.f32.mrf.mxu1 }
  0xed   : > { %830 = vmatmul.f32.gmra.mxu2 %v2300_v20  ;;  %1026 = vmatmul.f32.gmra.mxu3 %v2958_v23 }
  0xee   : > { %v2565_v53 = vpop.f32.mrf.mxu0 }
  0xef   : > { %1428 = vmatmul.f32.gmra.mxu1 %v2252_v24 }
  0xf0   : > { %v456_v22 = vpop.f32.mrf.mxu2  ;;  %v705_v2 = vpop.f32.mrf.mxu3 }
  0xf1   : > { %v2568_v41 = vadd.f32 %v705_v2, %v449_v25  ;;  %1271 = vmatmul.f32.gmra.mxu0 %v2286_v26  ;;  %v457_v39 = vadd.f32 %v2472_v9, %v456_v22  ;;  %v2962_v22 = vand.u32 4294901760, %v2322_v60 }
  0xf3   : > { %2959 = vst [vmem:[#allocation22_spill] sm:$0xff] %v2568_v41 }
  0xf4   : > { %v2571_v42 = vpop.f32.mrf.mxu1 }
  0xf5   : > { %835 = vmatmul.f32.gmra.mxu2 %v2322_v60  ;;  %1032 = vmatmul.f32.gmra.mxu3 %v2960_v3 }
  0xf6   : > { %v2577_v44 = vpop.f32.mrf.mxu0 }
  0xf7   : > { %1432 = vmatmul.f32.gmra.mxu1 %v2286_v26 }
  0xf8   : > { %v464_v24 = vpop.f32.mrf.mxu2  ;;  %v709_v23 = vpop.f32.mrf.mxu3 }
  0xf9   : > { %v2580_v46 = vadd.f32 %v709_v23, %v457_v39  ;;  %1275 = vmatmul.f32.gmra.mxu0 %v2312_v38  ;;  %v465_v2 = vadd.f32 %v2472_v9, %v464_v24  ;;  %v2964_v24 = vand.u32 4294901760, %v2344_v40 }
  0xfb   : > { %2961 = vst [vmem:[#allocation23_spill] sm:$0xff] %v2580_v46 }
  0xfc   : > { %v2583_v25 = vpop.f32.mrf.mxu1 }
  0xfd   : > { %840 = vmatmul.f32.gmra.mxu2 %v2344_v40  ;;  %1038 = vmatmul.f32.gmra.mxu3 %v2962_v22 }
  0xfe   : > { %v2589_v20 = vpop.f32.mrf.mxu0 }
  0xff   : > { %1436 = vmatmul.f32.gmra.mxu1 %v2312_v38 }
 0x100   : > { %v472_v26 = vpop.f32.mrf.mxu2  ;;  %v713_v3 = vpop.f32.mrf.mxu3 }
 0x101   : > { %v2592_v41 = vadd.f32 %v713_v3, %v465_v2  ;;  %1279 = vmatmul.f32.gmra.mxu0 %v2333_v58  ;;  %v473_v23 = vadd.f32 %v2472_v9, %v472_v26  ;;  %v2966_v26 = vand.u32 4294901760, %v2366_v62 }
 0x103   : > { %2963 = vst [vmem:[#allocation24_spill] sm:$0xff] %v2592_v41 }
 0x104   : > { %v2595_v39 = vpop.f32.mrf.mxu1 }
 0x105   : > { %845 = vmatmul.f32.gmra.mxu2 %v2366_v62  ;;  %1044 = vmatmul.f32.gmra.mxu3 %v2964_v24 }
 0x106   : > { %v2601_v60 = vpop.f32.mrf.mxu0 }
 0x107   : > { %1440 = vmatmul.f32.gmra.mxu1 %v2333_v58 }
 0x108   : > { %v480_v38 = vpop.f32.mrf.mxu2  ;;  %v717_v22 = vpop.f32.mrf.mxu3 }
 0x109   : > { %v2604_v46 = vadd.f32 %v717_v22, %v473_v23  ;;  %1283 = vmatmul.f32.gmra.mxu0 %v2356_v14  ;;  %v481_v3 = vadd.f32 %v2472_v9, %v480_v38  ;;  %v2968_v38 = vand.u32 4294901760, %v2388_v57 }
 0x10b   : > { %2965 = vst [vmem:[#allocation25_spill] sm:$0xff] %v2604_v46 }
 0x10c   : > { %v2607_v2 = vpop.f32.mrf.mxu1 }
 0x10d   : > { %850 = vmatmul.f32.gmra.mxu2 %v2388_v57  ;;  %1050 = vmatmul.f32.gmra.mxu3 %v2966_v26 }
 0x10e   : > { %v2613_v40 = vpop.f32.mrf.mxu0 }
 0x10f   : > { %1444 = vmatmul.f32.gmra.mxu1 %v2356_v14 }
 0x110   : > { %v488_v58 = vpop.f32.mrf.mxu2  ;;  %v721_v24 = vpop.f32.mrf.mxu3 }
 0x111   : > { %v2616_v41 = vadd.f32 %v721_v24, %v481_v3  ;;  %1287 = vmatmul.f32.gmra.mxu0 %v2377_v32  ;;  %v489_v22 = vadd.f32 %v2472_v9, %v488_v58  ;;  %v2970_v58 = vand.u32 4294901760, %v2410_v51 }
 0x113   : > { %2967 = vst [vmem:[#allocation26_spill] sm:$0xff] %v2616_v41 }
 0x114   : > { %v2619_v23 = vpop.f32.mrf.mxu1 }
 0x115   : > { %855 = vmatmul.f32.gmra.mxu2 %v2410_v51  ;;  %1056 = vmatmul.f32.gmra.mxu3 %v2968_v38 }
 0x116   : > { %v2625_v62 = vpop.f32.mrf.mxu0 }
 0x117   : > { %1448 = vmatmul.f32.gmra.mxu1 %v2377_v32 }
 0x118   : > { %v496_v14 = vpop.f32.mrf.mxu2  ;;  %v725_v26 = vpop.f32.mrf.mxu3 }
 0x119   : > { %v2628_v46 = vadd.f32 %v725_v26, %v489_v22  ;;  %1291 = vmatmul.f32.gmra.mxu0 %v2400_v49  ;;  %v497_v24 = vadd.f32 %v2472_v9, %v496_v14  ;;  %v2972_v14 = vand.u32 4294901760, %v2432_v27 }
 0x11b   : > { %2969 = vst [vmem:[#allocation27_spill] sm:$0xff] %v2628_v46 }
 0x11c   : > { %v2631_v3 = vpop.f32.mrf.mxu1 }
 0x11d   : > { %860 = vmatmul.f32.gmra.mxu2 %v2432_v27  ;;  %1062 = vmatmul.f32.gmra.mxu3 %v2970_v58 }
 0x11e   : > { %v2637_v57 = vpop.f32.mrf.mxu0 }
 0x11f   : > { %1452 = vmatmul.f32.gmra.mxu1 %v2400_v49 }
 0x120   : > { %v504_v32 = vpop.f32.mrf.mxu2  ;;  %v729_v38 = vpop.f32.mrf.mxu3 }
 0x121   : > { %v2640_v41 = vadd.f32 %v729_v38, %v497_v24  ;;  %1295 = vmatmul.f32.gmra.mxu0 %v2421_v6  ;;  %v505_v26 = vadd.f32 %v2472_v9, %v504_v32  ;;  %v2975_v32 = vand.u32 4294901760, %v2451_v35 }
 0x123   : > { %2971 = vst [vmem:[#allocation28_spill] sm:$0xff] %v2640_v41 }
 0x124   : > { %v2643_v22 = vpop.f32.mrf.mxu1 }
 0x125   : > { %865 = vmatmul.f32.gmra.mxu2 %v2451_v35  ;;  %1068 = vmatmul.f32.gmra.mxu3 %v2972_v14  ;;  %v2977_v35 = vand.u32 4294901760, %v1979_v8 }
 0x126   : > { %v2649_v51 = vpop.f32.mrf.mxu0 }
 0x127   : > { %1456 = vmatmul.f32.gmra.mxu1 %v2421_v6 }
 0x128   : > { %v512_v49 = vpop.f32.mrf.mxu2  ;;  %v733_v58 = vpop.f32.mrf.mxu3 }
 0x129   : > { %v2652_v46 = vadd.f32 %v733_v58, %v505_v26  ;;  %1299 = vmatmul.f32.gmra.mxu0 %v2443_v28  ;;  %v513_v38 = vadd.f32 %v2472_v9, %v512_v49  ;;  %v265_v26 = vadd.f32 %v2472_v9, %v2466_v50  ;;  %v273_v50 = vadd.f32 %v2472_v9, %v2481_v0 }
 0x12b   : > { %2973 = vst [vmem:[#allocation29_spill] sm:$0xff] %v2652_v46  ;;  %v614_v49 = vadd.f32 %v2475_v43, %v265_v26  ;;  %v618_v26 = vadd.f32 %v2487_v21, %v273_v50 }
 0x12c   : > { %v2655_v24 = vpop.f32.mrf.mxu1 }
 0x12d   : > { %2974 = vst [vmem:[#allocation30_spill] sm:$0xff] %v2655_v24  ;;  %870 = vmatmul.f32.gmra.mxu2 %v1979_v8  ;;  %1074 = vmatmul.f32.gmra.mxu3 %v2975_v32  ;;  %v2978_v8 = vand.u32 4294901760, %v2033_v12 }
 0x12e   : > { %v1240_v27 = vpop.f32.mrf.mxu0 }
 0x12f   : > { %1460 = vmatmul.f32.gmra.mxu1 %v2443_v28 }
 0x130   : > { %v737_v14 = vpop.f32.mrf.mxu3  ;;  %v791_v6 = vpop.f32.mrf.mxu2 }
 0x131   : > { %v2664_v58 = vadd.f32 %v737_v14, %v513_v38  ;;  %1303 = vmatmul.f32.gmra.mxu0 %v1946_v56  ;;  %v792_v28 = vadd.f32 %v791_v6, %v614_v49 }
 0x133   : > { %2976 = vst [vmem:[#allocation31_spill] sm:$0xff] %v2664_v58 }
 0x134   : > { %v1401_v46 = vpop.f32.mrf.mxu1 }
 0x135   : > { %875 = vmatmul.f32.gmra.mxu2 %v2033_v12  ;;  %1080 = vmatmul.f32.gmra.mxu3 %v2977_v35 }
 0x136   : > { %v1244_v32 = vpop.f32.mrf.mxu0 }
 0x137   : > { %1464 = vmatmul.f32.gmra.mxu1 %v1946_v56 }
 0x138   : > { %v796_v41 = vpop.f32.mrf.mxu2  ;;  %v985_v24 = vpop.f32.mrf.mxu3 }
 0x139   : > { %v986_v38 = vadd.f32 %v985_v24, %v792_v28  ;;  %1307 = vmatmul.f32.gmra.mxu0 %v2005_v47  ;;  %v797_v56 = vadd.f32 %v796_v41, %v618_v26  ;;  %v281_v24 = vadd.f32 %v2472_v9, %v2493_v55 }
 0x13b   : > { %v1241_v14 = vadd.f32 %v1240_v27, %v986_v38  ;;  %v622_v35 = vadd.f32 %v2499_v33, %v281_v24 }
 0x13c   : > { %v1405_v43 = vpop.f32.mrf.mxu1 }
 0x13d   : > { %v1402_v58 = vadd.f32 %v1401_v46, %v1241_v14  ;;  %880 = vmatmul.f32.gmra.mxu2 %v2071_v48  ;;  %1086 = vmatmul.f32.gmra.mxu3 %v2978_v8 }
 0x13e   : > { %v1248_v6 = vpop.f32.mrf.mxu0 }
 0x13f   : > { %vm1528_vm0 = vcmp.gt.f32.partialorder %v1402_v58, 0.0  ;;  %v1560_v0 = vmul.f32 0.2, %v1402_v58  ;;  %1468 = vmatmul.f32.gmra.mxu1 %v2005_v47  ;;  %v2979_v47 = vand.u32 4294901760, %v2071_v48 }
 0x140   : > { %v801_v21 = vpop.f32.mrf.mxu2  ;;  %v991_v46 = vpop.f32.mrf.mxu3 }
 0x141   : > { %v1592_v12 = vsel %vm1528_vm0, %v1402_v58, %v1560_v0  ;;  %v992_v27 = vadd.f32 %v991_v46, %v797_v56  ;;  %1311 = vmatmul.f32.gmra.mxu0 %v2050_v1  ;;  %v802_v38 = vadd.f32 %v801_v21, %v622_v35 }
 0x142   : > { %1624 = vst [vmem:[%s2684_s30] sm:$0xff] %v1592_v12 }
 0x143   : > { %v1245_v41 = vadd.f32 %v1244_v32, %v992_v27  ;;  %v289_v32 = vadd.f32 %v2472_v9, %v2505_v61 }
 0x144   : > { %v1409_v49 = vpop.f32.mrf.mxu1 }
 0x145   : > { %v1406_v28 = vadd.f32 %v1405_v43, %v1245_v41  ;;  %885 = vmatmul.f32.gmra.mxu2 %v2097_v13  ;;  %1092 = vmatmul.f32.gmra.mxu3 %v2979_v47  ;;  %v626_v48 = vadd.f32 %v2511_v5, %v289_v32 }
 0x146   : > { %v1252_v50 = vpop.f32.mrf.mxu0 }
 0x147   : > { %vm1529_vm1 = vcmp.gt.f32.partialorder %v1406_v28, 0.0  ;;  %v1561_v55 = vmul.f32 0.2, %v1406_v28  ;;  %1472 = vmatmul.f32.gmra.mxu1 %v2050_v1  ;;  %v2980_v1 = vand.u32 4294901760, %v2097_v13 }
 0x148   : > { %v806_v58 = vpop.f32.mrf.mxu2  ;;  %v997_v14 = vpop.f32.mrf.mxu3 }
 0x149   : > { %v1593_v26 = vsel %vm1529_vm1, %v1406_v28, %v1561_v55  ;;  %v998_v8 = vadd.f32 %v997_v14, %v802_v38  ;;  %1315 = vmatmul.f32.gmra.mxu0 %v2083_v34  ;;  %v807_v21 = vadd.f32 %v806_v58, %v626_v48  ;;  %v313_v48 = vadd.f32 %v2472_v9, %v2541_v19 }
 0x14a   : > { %1625 = vst [vmem:[%s2684_s30 + $0x8] sm:$0xff] %v1593_v26 }
 0x14b   : > { %v1249_v33 = vadd.f32 %v1248_v6, %v998_v8  ;;  %v297_v6 = vadd.f32 %v2472_v9, %v2517_v63 }
 0x14c   : > { %v1413_v43 = vpop.f32.mrf.mxu1 }
 0x14d   : > { %v1410_v56 = vadd.f32 %v1409_v49, %v1249_v33  ;;  %890 = vmatmul.f32.gmra.mxu2 %v2131_v30  ;;  %1098 = vmatmul.f32.gmra.mxu3 %v2980_v1  ;;  %v630_v13 = vadd.f32 %v2523_v31, %v297_v6 }
 0x14e   : > { %v1256_v0 = vpop.f32.mrf.mxu0 }
 0x14f   : > { %vm1530_vm2 = vcmp.gt.f32.partialorder %v1410_v56, 0.0  ;;  %v1562_v61 = vmul.f32 0.2, %v1410_v56  ;;  %1476 = vmatmul.f32.gmra.mxu1 %v2083_v34  ;;  %v2981_v34 = vand.u32 4294901760, %v2131_v30 }
 0x150   : > { %v811_v46 = vpop.f32.mrf.mxu2  ;;  %v1003_v24 = vpop.f32.mrf.mxu3 }
 0x151   : > { %v1594_v12 = vsel %vm1530_vm2, %v1410_v56, %v1562_v61  ;;  %v1004_v27 = vadd.f32 %v1003_v24, %v807_v21  ;;  %1319 = vmatmul.f32.gmra.mxu0 %v2114_v15  ;;  %v812_v28 = vadd.f32 %v811_v46, %v630_v13 }
 0x152   : > { %1626 = vst [vmem:[%s2684_s30 + $0x10] sm:$0xff] %v1594_v12  ;;  %v321_v12 = vadd.f32 %v2472_v9, %v2553_v36 }
 0x153   : > { %v1253_v5 = vadd.f32 %v1252_v50, %v1004_v27  ;;  %v305_v50 = vadd.f32 %v2472_v9, %v2529_v54 }
 0x154   : > { %v1417_v41 = vpop.f32.mrf.mxu1 }
 0x155   : > { %v1414_v49 = vadd.f32 %v1413_v43, %v1253_v5  ;;  %895 = vmatmul.f32.gmra.mxu2 %v2174_v10  ;;  %1104 = vmatmul.f32.gmra.mxu3 %v2981_v34  ;;  %v634_v30 = vadd.f32 %v2535_v45, %v305_v50 }
 0x156   : > { %v1260_v35 = vpop.f32.mrf.mxu0 }
 0x157   : > { %vm1531_vm3 = vcmp.gt.f32.partialorder %v1414_v49, 0.0  ;;  %v1563_v63 = vmul.f32 0.2, %v1414_v49  ;;  %1480 = vmatmul.f32.gmra.mxu1 %v2114_v15  ;;  %v2982_v15 = vand.u32 4294901760, %v2174_v10  ;;  %v638_v10 = vadd.f32 %v2547_v29, %v313_v48 }
 0x158   : > { %v816_v47 = vpop.f32.mrf.mxu2  ;;  %v1009_v38 = vpop.f32.mrf.mxu3 }
 0x159   : > { %v1595_v55 = vsel %vm1531_vm3, %v1414_v49, %v1563_v63  ;;  %v1010_v58 = vadd.f32 %v1009_v38, %v812_v28  ;;  %1323 = vmatmul.f32.gmra.mxu0 %v2154_v37  ;;  %v817_v8 = vadd.f32 %v816_v47, %v634_v30  ;;  %v329_v63 = vadd.f32 %v2472_v9, %v2565_v53 }
 0x15a   : > { %1627 = vst [vmem:[%s2684_s30 + $0x18] sm:$0xff] %v1595_v55 }
 0x15b   : > { %v1257_v31 = vadd.f32 %v1256_v0, %v1010_v58 }
 0x15c   : > { %v1421_v14 = vpop.f32.mrf.mxu1 }
 0x15d   : > { %v1418_v32 = vadd.f32 %v1417_v41, %v1257_v31  ;;  %900 = vmatmul.f32.gmra.mxu2 %v2204_v18  ;;  %1110 = vmatmul.f32.gmra.mxu3 %v2982_v15  ;;  %v2986_v31 = vld [vmem:[#allocation4_spill] sm:$0xff] }
 0x15e   : > { %v1264_v26 = vpop.f32.mrf.mxu0 }
 0x15f   : > { %vm1532_vm4 = vcmp.gt.f32.partialorder %v1418_v32, 0.0  ;;  %v1564_v54 = vmul.f32 0.2, %v1418_v32  ;;  %1484 = vmatmul.f32.gmra.mxu1 %v2154_v37  ;;  %v2983_v37 = vand.u32 4294901760, %v2204_v18  ;;  %v642_v18 = vadd.f32 %v2559_v52, %v321_v12  ;;  %v2985_v52 = vld [vmem:[#allocation2_spill] sm:$0xff] }
 0x160   : > { %v821_v33 = vpop.f32.mrf.mxu2  ;;  %v1015_v43 = vpop.f32.mrf.mxu3 }
 0x161   : > { %v1596_v56 = vsel %vm1532_vm4, %v1418_v32, %v1564_v54  ;;  %v1016_v1 = vadd.f32 %v1015_v43, %v817_v8  ;;  %1327 = vmatmul.f32.gmra.mxu0 %v2185_v11  ;;  %v822_v46 = vadd.f32 %v821_v33, %v638_v10 }
 0x162   : > { %1628 = vst [vmem:[%s2684_s30 + $0x20] sm:$0xff] %v1596_v56  ;;  %v2989_v56 = vld [vmem:[#allocation6_spill] sm:$0xff] }
 0x163   : > { %v1261_v45 = vadd.f32 %v1260_v35, %v1016_v1  ;;  %v2990_v1 = vand.u32 4294901760, %v2986_v31 }
 0x164   : > { %v1425_v0 = vpop.f32.mrf.mxu1 }
 0x165   : > { %v1422_v21 = vadd.f32 %v1421_v14, %v1261_v45  ;;  %905 = vmatmul.f32.gmra.mxu2 %v2248_v7  ;;  %1116 = vmatmul.f32.gmra.mxu3 %v2983_v37  ;;  %v345_v37 = vadd.f32 %v2472_v9, %v2589_v20 }
 0x166   : > { %v1268_v61 = vpop.f32.mrf.mxu0 }
 0x167   : > { %vm1533_vm5 = vcmp.gt.f32.partialorder %v1422_v21, 0.0  ;;  %v1565_v19 = vmul.f32 0.2, %v1422_v21  ;;  %1488 = vmatmul.f32.gmra.mxu1 %v2185_v11  ;;  %v2984_v11 = vand.u32 4294901760, %v2248_v7  ;;  %v646_v7 = vadd.f32 %v2571_v42, %v329_v63  ;;  %v2988_v42 = vld [vmem:[#allocation3_spill] sm:$0xff] }
 0x168   : > { %v826_v24 = vpop.f32.mrf.mxu2  ;;  %v1021_v6 = vpop.f32.mrf.mxu3 }
 0x169   : > { %v1597_v27 = vsel %vm1533_vm5, %v1422_v21, %v1565_v19  ;;  %v1022_v5 = vadd.f32 %v1021_v6, %v822_v46  ;;  %1331 = vmatmul.f32.gmra.mxu0 %v2228_v4  ;;  %v827_v34 = vadd.f32 %v826_v24, %v642_v18  ;;  %v654_v6 = vadd.f32 %v2595_v39, %v345_v37  ;;  %v2994_v39 = vld [vmem:[#allocation7_spill] sm:$0xff] }
 0x16a   : > { %1629 = vst [vmem:[%s2684_s30 + $0x28] sm:$0xff] %v1597_v27  ;;  %v2992_v27 = vld [vmem:[#allocation8_spill] sm:$0xff]  ;;  %v377_v37 = vadd.f32 %v2472_v9, %v2637_v57 }
 0x16b   : > { %v1265_v29 = vadd.f32 %v1264_v26, %v1022_v5  ;;  %v337_v26 = vadd.f32 %v2472_v9, %v2577_v44  ;;  %v2993_v5 = vand.u32 4294901760, %v2989_v56 }
 0x16c   : > { %v1429_v41 = vpop.f32.mrf.mxu1 }
 0x16d   : > { %v1426_v13 = vadd.f32 %v1425_v0, %v1265_v29  ;;  %910 = vmatmul.f32.gmra.mxu2 %v2276_v59  ;;  %1122 = vmatmul.f32.gmra.mxu3 %v2984_v11  ;;  %v353_v11 = vadd.f32 %v2472_v9, %v2601_v60 }
 0x16e   : > { %v1272_v49 = vpop.f32.mrf.mxu0 }
 0x16f   : > { %vm1534_vm6 = vcmp.gt.f32.partialorder %v1426_v13, 0.0  ;;  %v1566_v36 = vmul.f32 0.2, %v1426_v13  ;;  %1492 = vmatmul.f32.gmra.mxu1 %v2228_v4  ;;  %v2987_v4 = vand.u32 4294901760, %v2276_v59  ;;  %v650_v59 = vadd.f32 %v2583_v25, %v337_v26  ;;  %v2991_v25 = vld [vmem:[#allocation5_spill] sm:$0xff] }
 0x170   : > { %v831_v35 = vpop.f32.mrf.mxu2  ;;  %v1027_v28 = vpop.f32.mrf.mxu3 }
 0x171   : > { %v1598_v47 = vsel %vm1534_vm6, %v1426_v13, %v1566_v36  ;;  %v1028_v38 = vadd.f32 %v1027_v28, %v827_v34  ;;  %1335 = vmatmul.f32.gmra.mxu0 %v2985_v52  ;;  %v832_v30 = vadd.f32 %v831_v35, %v646_v7  ;;  %v658_v28 = vadd.f32 %v2607_v2, %v353_v11 }
 0x172   : > { %1630 = vst [vmem:[%s2684_s30 + $0x30] sm:$0xff] %v1598_v47  ;;  %v2995_v47 = vld [vmem:[#allocation9_spill] sm:$0xff] }
 0x173   : > { %v1269_v50 = vadd.f32 %v1268_v61, %v1028_v38  ;;  %v2996_v38 = vand.u32 4294901760, %v2992_v27 }
 0x174   : > { %v1433_v55 = vpop.f32.mrf.mxu1 }
 0x175   : > { %v1430_v58 = vadd.f32 %v1429_v41, %v1269_v50  ;;  %915 = vmatmul.f32.gmra.mxu2 %v2986_v31  ;;  %1128 = vmatmul.f32.gmra.mxu3 %v2987_v4 }
 0x176   : > { %v1276_v14 = vpop.f32.mrf.mxu0 }
 0x177   : > { %vm1535_vm7 = vcmp.gt.f32.partialorder %v1430_v58, 0.0  ;;  %v1567_v53 = vmul.f32 0.2, %v1430_v58  ;;  %1496 = vmatmul.f32.gmra.mxu1 %v2985_v52 }
 0x178   : > { %v836_v32 = vpop.f32.mrf.mxu2  ;;  %v1033_v15 = vpop.f32.mrf.mxu3 }
 0x179   : > { %v1599_v8 = vsel %vm1535_vm7, %v1430_v58, %v1567_v53  ;;  %v1034_v54 = vadd.f32 %v1033_v15, %v832_v30  ;;  %1339 = vmatmul.f32.gmra.mxu0 %v2988_v42  ;;  %v837_v0 = vadd.f32 %v836_v32, %v650_v59  ;;  %v361_v58 = vadd.f32 %v2472_v9, %v2613_v40  ;;  %v2997_v32 = vld [vmem:[#allocation10_spill] sm:$0xff] }
 0x17a   : > { %1631 = vst [vmem:[%s2684_s30 + $0x38] sm:$0xff] %v1599_v8  ;;  %v2998_v15 = vand.u32 4294901760, %v2995_v47 }
 0x17b   : > { %v1273_v33 = vadd.f32 %v1272_v49, %v1034_v54  ;;  %v662_v30 = vadd.f32 %v2619_v23, %v361_v58  ;;  %v3007_v58 = vld [vmem:[#allocation15_spill] sm:$0xff] }
 0x17c   : > { %v1437_v43 = vpop.f32.mrf.mxu1 }
 0x17d   : > { %v1434_v48 = vadd.f32 %v1433_v55, %v1273_v33  ;;  %920 = vmatmul.f32.gmra.mxu2 %v2989_v56  ;;  %1134 = vmatmul.f32.gmra.mxu3 %v2990_v1  ;;  %v369_v33 = vadd.f32 %v2472_v9, %v2625_v62 }
 0x17e   : > { %v1280_v45 = vpop.f32.mrf.mxu0 }
 0x17f   : > { %vm1536_vm8 = vcmp.gt.f32.partialorder %v1434_v48, 0.0  ;;  %v1568_v44 = vmul.f32 0.2, %v1434_v48  ;;  %1500 = vmatmul.f32.gmra.mxu1 %v2988_v42  ;;  %v666_v56 = vadd.f32 %v2631_v3, %v369_v33  ;;  %v3001_v3 = vld [vmem:[#allocation11_spill] sm:$0xff] }
 0x180   : > { %v841_v10 = vpop.f32.mrf.mxu2  ;;  %v1039_v21 = vpop.f32.mrf.mxu3 }
 0x181   : > { %v1600_v61 = vsel %vm1536_vm8, %v1434_v48, %v1568_v44  ;;  %v1040_v46 = vadd.f32 %v1039_v21, %v837_v0  ;;  %1343 = vmatmul.f32.gmra.mxu0 %v2991_v25  ;;  %v842_v41 = vadd.f32 %v841_v10, %v654_v6 }
 0x182   : > { %1632 = vst [vmem:[%s2684_s30 + $0x40] sm:$0xff] %v1600_v61 }
 0x183   : > { %v1277_v19 = vadd.f32 %v1276_v14, %v1040_v46 }
 0x184   : > { %v1441_v24 = vpop.f32.mrf.mxu1 }
 0x185   : > { %v1438_v12 = vadd.f32 %v1437_v43, %v1277_v19  ;;  %925 = vmatmul.f32.gmra.mxu2 %v2992_v27  ;;  %1140 = vmatmul.f32.gmra.mxu3 %v2993_v5 }
 0x186   : > { %v1284_v29 = vpop.f32.mrf.mxu0 }
 0x187   : > { %vm1537_vm9 = vcmp.gt.f32.partialorder %v1438_v12, 0.0  ;;  %v1569_v20 = vmul.f32 0.2, %v1438_v12  ;;  %1504 = vmatmul.f32.gmra.mxu1 %v2991_v25 }
 0x188   : > { %v846_v18 = vpop.f32.mrf.mxu2  ;;  %v1045_v13 = vpop.f32.mrf.mxu3 }
 0x189   : > { %v1601_v49 = vsel %vm1537_vm9, %v1438_v12, %v1569_v20  ;;  %v1046_v34 = vadd.f32 %v1045_v13, %v842_v41  ;;  %1347 = vmatmul.f32.gmra.mxu0 %v2994_v39  ;;  %v847_v50 = vadd.f32 %v846_v18, %v658_v28  ;;  %v3002_v12 = vld [vmem:[#allocation14_spill] sm:$0xff]  ;;  %v385_v20 = vadd.f32 %v2472_v9, %v2649_v51 }
 0x18a   : > { %1633 = vst [vmem:[%s2684_s30 + $0x48] sm:$0xff] %v1601_v49 }
 0x18b   : > { %v1281_v36 = vadd.f32 %v1280_v45, %v1046_v34  ;;  %v2999_v45 = vld [vmem:[#allocation12_spill] sm:$0xff]  ;;  %v3005_v34 = vld [vmem:[#allocation30_spill] sm:$0xff] }
 0x18c   : > { %v1445_v35 = vpop.f32.mrf.mxu1 }
 0x18d   : > { %v1442_v63 = vadd.f32 %v1441_v24, %v1281_v36  ;;  %930 = vmatmul.f32.gmra.mxu2 %v2995_v47  ;;  %1146 = vmatmul.f32.gmra.mxu3 %v2996_v38  ;;  %v670_v24 = vadd.f32 %v2643_v22, %v377_v37  ;;  %v3004_v22 = vld [vmem:[#allocation13_spill] sm:$0xff] }
 0x18e   : > { %v1288_v52 = vpop.f32.mrf.mxu0 }
 0x18f   : > { %vm1538_vm10 = vcmp.gt.f32.partialorder %v1442_v63, 0.0  ;;  %v1570_v60 = vmul.f32 0.2, %v1442_v63  ;;  %1508 = vmatmul.f32.gmra.mxu1 %v2994_v39  ;;  %v674_v39 = vadd.f32 %v3005_v34, %v385_v20 }
 0x190   : > { %v851_v55 = vpop.f32.mrf.mxu2  ;;  %v1051_v7 = vpop.f32.mrf.mxu3 }
 0x191   : > { %v1602_v31 = vsel %vm1538_vm10, %v1442_v63, %v1570_v60  ;;  %v1052_v4 = vadd.f32 %v1051_v7, %v847_v50  ;;  %1351 = vmatmul.f32.gmra.mxu0 %v2359_v17  ;;  %v852_v8 = vadd.f32 %v851_v55, %v662_v30 }
 0x192   : > { %1634 = vst [vmem:[%s2684_s30 + $0x50] sm:$0xff] %v1602_v31 }
 0x193   : > { %v1285_v2 = vadd.f32 %v1284_v29, %v1052_v4 }
 0x194   : > { %v1449_v14 = vpop.f32.mrf.mxu1 }
 0x195   : > { %v1446_v53 = vadd.f32 %v1445_v35, %v1285_v2  ;;  %935 = vmatmul.f32.gmra.mxu2 %v2997_v32  ;;  %1152 = vmatmul.f32.gmra.mxu3 %v2998_v15  ;;  %v3006_v35 = vand.u32 4294901760, %v3002_v12 }
 0x196   : > { %v1292_v26 = vpop.f32.mrf.mxu0 }
 0x197   : > { %vm1539_vm11 = vcmp.gt.f32.partialorder %v1446_v53, 0.0  ;;  %v1571_v40 = vmul.f32 0.2, %v1446_v53  ;;  %1512 = vmatmul.f32.gmra.mxu1 %v2359_v17  ;;  %v3000_v17 = vand.u32 4294901760, %v2997_v32 }
 0x198   : > { %v856_v54 = vpop.f32.mrf.mxu2  ;;  %v1057_v42 = vpop.f32.mrf.mxu3 }
 0x199   : > { %v1603_v43 = vsel %vm1539_vm11, %v1446_v53, %v1571_v40  ;;  %v1058_v59 = vadd.f32 %v1057_v42, %v852_v8  ;;  %1355 = vmatmul.f32.gmra.mxu0 %v2385_v16  ;;  %v857_v44 = vadd.f32 %v856_v54, %v666_v56  ;;  %v3008_v40 = vld [vmem:[#allocation16_spill] sm:$0xff] }
 0x19a   : > { %1635 = vst [vmem:[%s2684_s30 + $0x58] sm:$0xff] %v1603_v43 }
 0x19b   : > { %v1289_v23 = vadd.f32 %v1288_v52, %v1058_v59 }
 0x19c   : > { %v1453_v48 = vpop.f32.mrf.mxu1 }
 0x19d   : > { %v1450_v1 = vadd.f32 %v1449_v14, %v1289_v23  ;;  %940 = vmatmul.f32.gmra.mxu2 %v2999_v45  ;;  %1158 = vmatmul.f32.gmra.mxu3 %v3000_v17  ;;  %v3009_v17 = vld [vmem:[#allocation17_spill] sm:$0xff] }
 0x19e   : > { %v1296_v0 = vpop.f32.mrf.mxu0 }
 0x19f   : > { %vm1540_vm12 = vcmp.gt.f32.partialorder %v1450_v1, 0.0  ;;  %v1572_v62 = vmul.f32 0.2, %v1450_v1  ;;  %1516 = vmatmul.f32.gmra.mxu1 %v2385_v16  ;;  %v3003_v16 = vand.u32 4294901760, %v2999_v45 }
 0x1a0   : > { %v861_v10 = vpop.f32.mrf.mxu2  ;;  %v1063_v21 = vpop.f32.mrf.mxu3 }
 0x1a1   : > { %v1604_v61 = vsel %vm1540_vm12, %v1450_v1, %v1572_v62  ;;  %v1064_v46 = vadd.f32 %v1063_v21, %v857_v44  ;;  %1359 = vmatmul.f32.gmra.mxu0 %v3001_v3  ;;  %v862_v5 = vadd.f32 %v861_v10, %v670_v24 }
 0x1a2   : > { %1636 = vst [vmem:[%s2684_s30 + $0x60] sm:$0xff] %v1604_v61 }
 0x1a3   : > { %v1293_v25 = vadd.f32 %v1292_v26, %v1064_v46 }
 0x1a4   : > { %v1457_v19 = vpop.f32.mrf.mxu1 }
 0x1a5   : > { %v1454_v6 = vadd.f32 %v1453_v48, %v1293_v25  ;;  %945 = vmatmul.f32.gmra.mxu2 %v3002_v12  ;;  %1164 = vmatmul.f32.gmra.mxu3 %v3003_v16 }
 0x1a6   : > { %v1300_v27 = vpop.f32.mrf.mxu0 }
 0x1a7   : > { %vm1541_vm13 = vcmp.gt.f32.partialorder %v1454_v6, 0.0  ;;  %v1573_v57 = vmul.f32 0.2, %v1454_v6  ;;  %1520 = vmatmul.f32.gmra.mxu1 %v3001_v3 }
 0x1a8   : > { %v866_v29 = vpop.f32.mrf.mxu2  ;;  %v1069_v41 = vpop.f32.mrf.mxu3 }
 0x1a9   : > { %v1605_v18 = vsel %vm1541_vm13, %v1454_v6, %v1573_v57  ;;  %v1070_v13 = vadd.f32 %v1069_v41, %v862_v5  ;;  %1363 = vmatmul.f32.gmra.mxu0 %v3004_v22  ;;  %v867_v63 = vadd.f32 %v866_v29, %v674_v39 }
 0x1aa   : > { %1637 = vst [vmem:[%s2684_s30 + $0x68] sm:$0xff] %v1605_v18  ;;  %v3011_v18 = vld [vmem:[#allocation19_spill] sm:$0xff] }
 0x1ab   : > { %v1297_v11 = vadd.f32 %v1296_v0, %v1070_v13 }
 0x1ac   : > { %v1461_v49 = vpop.f32.mrf.mxu1 }
 0x1ad   : > { %v1458_v36 = vadd.f32 %v1457_v19, %v1297_v11  ;;  %1170 = vmatmul.f32.gmra.mxu3 %v3006_v35  ;;  %v3010_v19 = vld [vmem:[#allocation18_spill] sm:$0xff] }
 0x1ae   : > { %v1304_v28 = vpop.f32.mrf.mxu0 }
 0x1af   : > { %vm1542_vm14 = vcmp.gt.f32.partialorder %v1458_v36, 0.0  ;;  %v1574_v47 = vmul.f32 0.2, %v1458_v36  ;;  %1524 = vmatmul.f32.gmra.mxu1 %v3004_v22 }
 0x1b0   : > { %v871_v9 = vpop.f32.mrf.mxu2  ;;  %v1075_v51 = vpop.f32.mrf.mxu3 }
 0x1b1   : > { %v1606_v38 = vsel %vm1542_vm14, %v1458_v36, %v1574_v47  ;;  %v1076_v52 = vadd.f32 %v1075_v51, %v867_v63  ;;  %v872_v31 = vadd.f32 %v871_v9, %v3007_v58  ;;  %v3012_v47 = vld [vmem:[#allocation20_spill] sm:$0xff] }
 0x1b2   : > { %1638 = vst [vmem:[%s2684_s30 + $0x70] sm:$0xff] %v1606_v38 }
 0x1b3   : > { %v1301_v50 = vadd.f32 %v1300_v27, %v1076_v52 }
 0x1b4   : > { %v1465_v60 = vpop.f32.mrf.mxu1 }
 0x1b5   : > { %v1462_v55 = vadd.f32 %v1461_v49, %v1301_v50 }
 0x1b6   : > { %v1308_v7 = vpop.f32.mrf.mxu0 }
 0x1b7   : > { %vm1543_vm15 = vcmp.gt.f32.partialorder %v1462_v55, 0.0  ;;  %v1575_v4 = vmul.f32 0.2, %v1462_v55 }
 0x1b8   : > { %v876_v2 = vpop.f32.mrf.mxu2  ;;  %v1081_v14 = vpop.f32.mrf.mxu3 }
 0x1b9   : > { %v1607_v30 = vsel %vm1543_vm15, %v1462_v55, %v1575_v4  ;;  %v1082_v53 = vadd.f32 %v1081_v14, %v872_v31  ;;  %v877_v54 = vadd.f32 %v876_v2, %v3008_v40  ;;  %v3013_v4 = vld [vmem:[#allocation21_spill] sm:$0xff] }
 0x1ba   : > { %1639 = vst [vmem:[%s2684_s30 + $0x78] sm:$0xff] %v1607_v30 }
 0x1bb   : > { %v1305_v32 = vadd.f32 %v1304_v28, %v1082_v53 }
 0x1bc   : > { %v1469_v15 = vpop.f32.mrf.mxu1 }
 0x1bd   : > { %v1466_v26 = vadd.f32 %v1465_v60, %v1305_v32 }
 0x1be   : > { %v1312_v8 = vpop.f32.mrf.mxu0 }
 0x1bf   : > { %vm1544_vm0 = vcmp.gt.f32.partialorder %v1466_v26, 0.0  ;;  %v1576_v42 = vmul.f32 0.2, %v1466_v26 }
 0x1c0   : > { %v881_v33 = vpop.f32.mrf.mxu2  ;;  %v1087_v43 = vpop.f32.mrf.mxu3 }
 0x1c1   : > { %v1608_v59 = vsel %vm1544_vm0, %v1466_v26, %v1576_v42  ;;  %v1088_v23 = vadd.f32 %v1087_v43, %v877_v54  ;;  %v882_v0 = vadd.f32 %v881_v33, %v3009_v17  ;;  %v3014_v42 = vld [vmem:[#allocation22_spill] sm:$0xff] }
 0x1c2   : > { %1640 = vst [vmem:[%s2684_s30 + $0x80] sm:$0xff] %v1608_v59 }
 0x1c3   : > { %v1309_v48 = vadd.f32 %v1308_v7, %v1088_v23 }
 0x1c4   : > { %v1473_v56 = vpop.f32.mrf.mxu1 }
 0x1c5   : > { %v1470_v1 = vadd.f32 %v1469_v15, %v1309_v48 }
 0x1c6   : > { %v1316_v45 = vpop.f32.mrf.mxu0 }
 0x1c7   : > { %vm1545_vm1 = vcmp.gt.f32.partialorder %v1470_v1, 0.0  ;;  %v1577_v44 = vmul.f32 0.2, %v1470_v1 }
 0x1c8   : > { %v886_v62 = vpop.f32.mrf.mxu2  ;;  %v1093_v10 = vpop.f32.mrf.mxu3 }
 0x1c9   : > { %v1609_v21 = vsel %vm1545_vm1, %v1470_v1, %v1577_v44  ;;  %v1094_v37 = vadd.f32 %v1093_v10, %v882_v0  ;;  %v887_v24 = vadd.f32 %v886_v62, %v3010_v19  ;;  %v3015_v44 = vld [vmem:[#allocation23_spill] sm:$0xff] }
 0x1ca   : > { %1641 = vst [vmem:[%s2684_s30 + $0x88] sm:$0xff] %v1609_v21 }
 0x1cb   : > { %v1313_v61 = vadd.f32 %v1312_v8, %v1094_v37 }
 0x1cc   : > { %v1477_v46 = vpop.f32.mrf.mxu1 }
 0x1cd   : > { %v1474_v3 = vadd.f32 %v1473_v56, %v1313_v61 }
 0x1ce   : > { %v1320_v25 = vpop.f32.mrf.mxu0 }
 0x1cf   : > { %vm1546_vm2 = vcmp.gt.f32.partialorder %v1474_v3, 0.0  ;;  %v1578_v6 = vmul.f32 0.2, %v1474_v3 }
 0x1d0   : > { %v891_v12 = vpop.f32.mrf.mxu2  ;;  %v1099_v16 = vpop.f32.mrf.mxu3 }
 0x1d1   : > { %v1610_v27 = vsel %vm1546_vm2, %v1474_v3, %v1578_v6  ;;  %v1100_v5 = vadd.f32 %v1099_v16, %v887_v24  ;;  %v892_v13 = vadd.f32 %v891_v12, %v3011_v18  ;;  %v3016_v6 = vld [vmem:[#allocation24_spill] sm:$0xff] }
 0x1d2   : > { %1642 = vst [vmem:[%s2684_s30 + $0x90] sm:$0xff] %v1610_v27 }
 0x1d3   : > { %v1317_v57 = vadd.f32 %v1316_v45, %v1100_v5 }
 0x1d4   : > { %v1481_v29 = vpop.f32.mrf.mxu1 }
 0x1d5   : > { %v1478_v41 = vadd.f32 %v1477_v46, %v1317_v57 }
 0x1d6   : > { %v1324_v20 = vpop.f32.mrf.mxu0 }
 0x1d7   : > { %vm1547_vm3 = vcmp.gt.f32.partialorder %v1478_v41, 0.0  ;;  %v1579_v22 = vmul.f32 0.2, %v1478_v41 }
 0x1d8   : > { %v896_v11 = vpop.f32.mrf.mxu2  ;;  %v1105_v49 = vpop.f32.mrf.mxu3 }
 0x1d9   : > { %v1611_v34 = vsel %vm1547_vm3, %v1478_v41, %v1579_v22  ;;  %v1106_v39 = vadd.f32 %v1105_v49, %v892_v13  ;;  %v897_v9 = vadd.f32 %v896_v11, %v3012_v47  ;;  %v3017_v13 = vld [vmem:[#allocation25_spill] sm:$0xff] }
 0x1da   : > { %1643 = vst [vmem:[%s2684_s30 + $0x98] sm:$0xff] %v1611_v34 }
 0x1db   : > { %v1321_v36 = vadd.f32 %v1320_v25, %v1106_v39 }
 0x1dc   : > { %v1485_v35 = vpop.f32.mrf.mxu1 }
 0x1dd   : > { %v1482_v28 = vadd.f32 %v1481_v29, %v1321_v36 }
 0x1de   : > { %v1328_v63 = vpop.f32.mrf.mxu0 }
 0x1df   : > { %vm1548_vm4 = vcmp.gt.f32.partialorder %v1482_v28, 0.0  ;;  %v1580_v51 = vmul.f32 0.2, %v1482_v28 }
 0x1e0   : > { %v901_v38 = vpop.f32.mrf.mxu2  ;;  %v1111_v52 = vpop.f32.mrf.mxu3 }
 0x1e1   : > { %v1612_v50 = vsel %vm1548_vm4, %v1482_v28, %v1580_v51  ;;  %v1112_v60 = vadd.f32 %v1111_v52, %v897_v9  ;;  %v902_v2 = vadd.f32 %v901_v38, %v3013_v4  ;;  %v3018_v9 = vld [vmem:[#allocation26_spill] sm:$0xff] }
 0x1e2   : > { %1644 = vst [vmem:[%s2684_s30 + $0xa0] sm:$0xff] %v1612_v50 }
 0x1e3   : > { %v1325_v55 = vadd.f32 %v1324_v20, %v1112_v60 }
 0x1e4   : > { %v1489_v7 = vpop.f32.mrf.mxu1 }
 0x1e5   : > { %v1486_v58 = vadd.f32 %v1485_v35, %v1325_v55 }
 0x1e6   : > { %v1332_v31 = vpop.f32.mrf.mxu0 }
 0x1e7   : > { %vm1549_vm5 = vcmp.gt.f32.partialorder %v1486_v58, 0.0  ;;  %v1581_v14 = vmul.f32 0.2, %v1486_v58 }
 0x1e8   : > { %v906_v30 = vpop.f32.mrf.mxu2  ;;  %v1117_v53 = vpop.f32.mrf.mxu3 }
 0x1e9   : > { %v1613_v32 = vsel %vm1549_vm5, %v1486_v58, %v1581_v14  ;;  %v1118_v15 = vadd.f32 %v1117_v53, %v902_v2  ;;  %v907_v33 = vadd.f32 %v906_v30, %v3014_v42  ;;  %v3019_v2 = vld [vmem:[#allocation27_spill] sm:$0xff] }
 0x1ea   : > { %1645 = vst [vmem:[%s2684_s30 + $0xa8] sm:$0xff] %v1613_v32 }
 0x1eb   : > { %v1329_v26 = vadd.f32 %v1328_v63, %v1118_v15 }
 0x1ec   : > { %v1493_v8 = vpop.f32.mrf.mxu1 }
 0x1ed   : > { %v1490_v40 = vadd.f32 %v1489_v7, %v1329_v26 }
 0x1ee   : > { %v1336_v54 = vpop.f32.mrf.mxu0 }
 0x1ef   : > { %vm1550_vm6 = vcmp.gt.f32.partialorder %v1490_v40, 0.0  ;;  %v1582_v43 = vmul.f32 0.2, %v1490_v40 }
 0x1f0   : > { %v911_v59 = vpop.f32.mrf.mxu2  ;;  %v1123_v23 = vpop.f32.mrf.mxu3 }
 0x1f1   : > { %v1614_v48 = vsel %vm1550_vm6, %v1490_v40, %v1582_v43  ;;  %v1124_v56 = vadd.f32 %v1123_v23, %v907_v33  ;;  %v912_v62 = vadd.f32 %v911_v59, %v3015_v44  ;;  %v3020_v33 = vld [vmem:[#allocation28_spill] sm:$0xff]  ;;  %v3021_v44 = vld [vmem:[#allocation29_spill] sm:$0xff] }
 0x1f2   : > { %1646 = vst [vmem:[%s2684_s30 + $0xb0] sm:$0xff] %v1614_v48 }
 0x1f3   : > { %v1333_v1 = vadd.f32 %v1332_v31, %v1124_v56 }
 0x1f4   : > { %v1497_v45 = vpop.f32.mrf.mxu1 }
 0x1f5   : > { %v1494_v17 = vadd.f32 %v1493_v8, %v1333_v1 }
 0x1f6   : > { %v1340_v0 = vpop.f32.mrf.mxu0 }
 0x1f7   : > { %vm1551_vm7 = vcmp.gt.f32.partialorder %v1494_v17, 0.0  ;;  %v1583_v10 = vmul.f32 0.2, %v1494_v17 }
 0x1f8   : > { %v916_v21 = vpop.f32.mrf.mxu2  ;;  %v1129_v37 = vpop.f32.mrf.mxu3 }
 0x1f9   : > { %v1615_v61 = vsel %vm1551_vm7, %v1494_v17, %v1583_v10  ;;  %v1130_v46 = vadd.f32 %v1129_v37, %v912_v62  ;;  %v917_v12 = vadd.f32 %v916_v21, %v3016_v6 }
 0x1fa   : > { %1647 = vst [vmem:[%s2684_s30 + $0xb8] sm:$0xff] %v1615_v61 }
 0x1fb   : > { %v1337_v3 = vadd.f32 %v1336_v54, %v1130_v46 }
 0x1fc   : > { %v1501_v25 = vpop.f32.mrf.mxu1 }
 0x1fd   : > { %v1498_v19 = vadd.f32 %v1497_v45, %v1337_v3 }
 0x1fe   : > { %v1344_v24 = vpop.f32.mrf.mxu0 }
 0x1ff   : > { %vm1552_vm8 = vcmp.gt.f32.partialorder %v1498_v19, 0.0  ;;  %v1584_v16 = vmul.f32 0.2, %v1498_v19 }
 0x200   : > { %v921_v27 = vpop.f32.mrf.mxu2  ;;  %v1135_v5 = vpop.f32.mrf.mxu3 }
 0x201   : > { %v1616_v57 = vsel %vm1552_vm8, %v1498_v19, %v1584_v16  ;;  %v1136_v29 = vadd.f32 %v1135_v5, %v917_v12  ;;  %v922_v22 = vadd.f32 %v921_v27, %v3017_v13 }
 0x202   : > { %1648 = vst [vmem:[%s2684_s30 + $0xc0] sm:$0xff] %v1616_v57 }
 0x203   : > { %v1341_v41 = vadd.f32 %v1340_v0, %v1136_v29 }
 0x204   : > { %v1505_v20 = vpop.f32.mrf.mxu1 }
 0x205   : > { %v1502_v18 = vadd.f32 %v1501_v25, %v1341_v41 }
 0x206   : > { %v1348_v49 = vpop.f32.mrf.mxu0 }
 0x207   : > { %vm1553_vm9 = vcmp.gt.f32.partialorder %v1502_v18, 0.0  ;;  %v1585_v11 = vmul.f32 0.2, %v1502_v18 }
 0x208   : > { %v926_v34 = vpop.f32.mrf.mxu2  ;;  %v1141_v39 = vpop.f32.mrf.mxu3 }
 0x209   : > { %v1617_v36 = vsel %vm1553_vm9, %v1502_v18, %v1585_v11  ;;  %v1142_v35 = vadd.f32 %v1141_v39, %v922_v22  ;;  %v927_v51 = vadd.f32 %v926_v34, %v3018_v9 }
 0x20a   : > { %1649 = vst [vmem:[%s2684_s30 + $0xc8] sm:$0xff] %v1617_v36 }
 0x20b   : > { %v1345_v28 = vadd.f32 %v1344_v24, %v1142_v35  ;;  %v3022_v24 = vld [vmem:[#allocation31_spill] sm:$0xff] }
 0x20c   : > { %v1509_v63 = vpop.f32.mrf.mxu1 }
 0x20d   : > { %v1506_v47 = vadd.f32 %v1505_v20, %v1345_v28 }
 0x20e   : > { %v1352_v7 = vpop.f32.mrf.mxu0 }
 0x20f   : > { %vm1554_vm10 = vcmp.gt.f32.partialorder %v1506_v47, 0.0  ;;  %v1586_v38 = vmul.f32 0.2, %v1506_v47 }
 0x210   : > { %v931_v52 = vpop.f32.mrf.mxu2  ;;  %v1147_v50 = vpop.f32.mrf.mxu3 }
 0x211   : > { %v1618_v60 = vsel %vm1554_vm10, %v1506_v47, %v1586_v38  ;;  %v1148_v55 = vadd.f32 %v1147_v50, %v927_v51  ;;  %v932_v14 = vadd.f32 %v931_v52, %v3019_v2 }
 0x212   : > { %1650 = vst [vmem:[%s2684_s30 + $0xd0] sm:$0xff] %v1618_v60 }
 0x213   : > { %v1349_v58 = vadd.f32 %v1348_v49, %v1148_v55 }
 0x214   : > { %v1513_v31 = vpop.f32.mrf.mxu1 }
 0x215   : > { %v1510_v4 = vadd.f32 %v1509_v63, %v1349_v58 }
 0x216   : > { %v1356_v40 = vpop.f32.mrf.mxu0 }
 0x217   : > { %vm1555_vm11 = vcmp.gt.f32.partialorder %v1510_v4, 0.0  ;;  %v1587_v30 = vmul.f32 0.2, %v1510_v4 }
 0x218   : > { %v936_v53 = vpop.f32.mrf.mxu2  ;;  %v1153_v32 = vpop.f32.mrf.mxu3 }
 0x219   : > { %v1619_v15 = vsel %vm1555_vm11, %v1510_v4, %v1587_v30  ;;  %v1154_v26 = vadd.f32 %v1153_v32, %v932_v14  ;;  %v937_v43 = vadd.f32 %v936_v53, %v3020_v33 }
 0x21a   : > { %1651 = vst [vmem:[%s2684_s30 + $0xd8] sm:$0xff] %v1619_v15 }
 0x21b   : > { %v1353_v8 = vadd.f32 %v1352_v7, %v1154_v26 }
 0x21c   : > { %v1517_v42 = vpop.f32.mrf.mxu1 }
 0x21d   : > { %v1514_v54 = vadd.f32 %v1513_v31, %v1353_v8 }
 0x21e   : > { %v1360_v0 = vpop.f32.mrf.mxu0 }
 0x21f   : > { %vm1556_vm12 = vcmp.gt.f32.partialorder %v1514_v54, 0.0  ;;  %v1588_v59 = vmul.f32 0.2, %v1514_v54 }
 0x220   : > { %v1159_v23 = vpop.f32.mrf.mxu3  ;;  %v941_v1 = vpop.f32.mrf.mxu2 }
 0x221   : > { %v1620_v48 = vsel %vm1556_vm12, %v1514_v54, %v1588_v59  ;;  %v1160_v56 = vadd.f32 %v1159_v23, %v937_v43  ;;  %v942_v62 = vadd.f32 %v941_v1, %v3021_v44 }
 0x222   : > { %1652 = vst [vmem:[%s2684_s30 + $0xe0] sm:$0xff] %v1620_v48 }
 0x223   : > { %v1357_v45 = vadd.f32 %v1356_v40, %v1160_v56 }
 0x224   : > { %v1521_v37 = vpop.f32.mrf.mxu1 }
 0x225   : > { %v1518_v17 = vadd.f32 %v1517_v42, %v1357_v45 }
 0x226   : > { %v1364_v27 = vpop.f32.mrf.mxu0 }
 0x227   : > { %vm1557_vm13 = vcmp.gt.f32.partialorder %v1518_v17, 0.0  ;;  %v1589_v10 = vmul.f32 0.2, %v1518_v17 }
 0x228   : > { %v1165_v21 = vpop.f32.mrf.mxu3  ;;  %v946_v25 = vpop.f32.mrf.mxu2 }
 0x229   : > { %v1621_v61 = vsel %vm1557_vm13, %v1518_v17, %v1589_v10  ;;  %v1166_v46 = vadd.f32 %v1165_v21, %v942_v62  ;;  %v947_v6 = vadd.f32 %v946_v25, %v3022_v24 }
 0x22a   : > { %1653 = vst [vmem:[%s2684_s30 + $0xe8] sm:$0xff] %v1621_v61 }
 0x22b   : > { %v1361_v3 = vadd.f32 %v1360_v0, %v1166_v46 }
 0x22c   : > { %v1525_v29 = vpop.f32.mrf.mxu1 }
 0x22d   : > { %v1522_v19 = vadd.f32 %v1521_v37, %v1361_v3 }
 0x22f   : > { %vm1558_vm14 = vcmp.gt.f32.partialorder %v1522_v19, 0.0  ;;  %v1590_v12 = vmul.f32 0.2, %v1522_v19 }
 0x230   : > { %v1171_v16 = vpop.f32.mrf.mxu3 }
 0x231   : > { %v1622_v5 = vsel %vm1558_vm14, %v1522_v19, %v1590_v12  ;;  %v1172_v57 = vadd.f32 %v1171_v16, %v947_v6 }
 0x232   : > { %1654 = vst [vmem:[%s2684_s30 + $0xf0] sm:$0xff] %v1622_v5 }
 0x233   : > { %v1365_v41 = vadd.f32 %v1364_v27, %v1172_v57 }
 0x235   : > { %v1526_v20 = vadd.f32 %v1525_v29, %v1365_v41 }
 0x237   : > { %vm1559_vm15 = vcmp.gt.f32.partialorder %v1526_v20, 0.0  ;;  %v1591_v18 = vmul.f32 0.2, %v1526_v20 }
 0x239   : > { %v1623_v13 = vsel %vm1559_vm15, %v1526_v20, %v1591_v18 }
 0x23a   : > { %1655 = vst [vmem:[%s2684_s30 + $0xf8] sm:$0xff] %v1623_v13 }
 0x23b PF: > { %s13_s12 = sadd.s32 1, %s1770_s12  }
 0x23c   : > { %p10_p4 = scmp.ge.s32.totalorder %s13_s12, 4  }
 0x23e   :  { %12 = sbr.rel (!%p10_p4) target bundleno = 1 (0x1), region = 62 }

// kernel: down_block.4
= control target key start
LH: loop header
LB: loop body
LE: loop exit
PB: predicated region body
PF: predicated region fallthrough
CT: control target
= control target key end

     0   :  { %s1649_s1 = inlined_call_operand.vmem [shape: f32[128,128], index: 1, kind: input, shape index: {}]   ;;  %s1650_s0 = inlined_call_operand.vmem [shape: f32[128,128], index: 0, kind: input, shape index: {}]   ;;  %s1651_s2 = inlined_call_operand.vmem [shape: f32[1,128], index: 2, kind: input, shape index: {}]   ;;  %s1652_s3 = inlined_call_operand.vmem [shape: f32[128,128], index: 3, kind: output, shape index: {}]  }
   0x1   :  { %v45_v0 = vld [vmem:[%s1649_s1 + $0x78] sm:$0xff]  ;;  %v44_v1 = vld [vmem:[%s1649_s1 + $0x70] sm:$0xff]  ;;  %v43_v2 = vld [vmem:[%s1649_s1 + $0x68] sm:$0xff] }
   0x2   :  { %v938_v3 = vand.u32 4294901760, %v45_v0  ;;  %v940_v4 = vand.u32 4294901760, %v44_v1  ;;  %v942_v5 = vand.u32 4294901760, %v43_v2  ;;  %v42_v6 = vld [vmem:[%s1649_s1 + $0x60] sm:$0xff]  ;;  %v41_v7 = vld [vmem:[%s1649_s1 + $0x58] sm:$0xff]  ;;  %v40_v8 = vld [vmem:[%s1649_s1 + $0x50] sm:$0xff] }
   0x3   :  { %v953_v9 = vand.u32 4294901760, %v42_v6  ;;  %v955_v10 = vand.u32 4294901760, %v41_v7  ;;  %v957_v11 = vand.u32 4294901760, %v40_v8  ;;  %v39_v12 = vld [vmem:[%s1649_s1 + $0x48] sm:$0xff]  ;;  %v38_v13 = vld [vmem:[%s1649_s1 + $0x40] sm:$0xff]  ;;  %v37_v17 = vld [vmem:[%s1649_s1 + $0x38] sm:$0xff] }
   0x4   :  { %876 = vmatpush.msra.mxu2 %v938_v3  ;;  %v967_v14 = vsub.f32 %v45_v0, %v938_v3  ;;  %v970_v15 = vsub.f32 %v44_v1, %v940_v4  ;;  %v973_v16 = vsub.f32 %v43_v2, %v942_v5  ;;  %51 = vmatpush.msra.mxu0 %v938_v3  ;;  %v979_v18 = vand.u32 4294901760, %v39_v12  ;;  %v36_v25 = vld [vmem:[%s1649_s1 + $0x30] sm:$0xff]  ;;  %v35_v33 = vld [vmem:[%s1649_s1 + $0x28] sm:$0xff]  ;;  %v34_v42 = vld [vmem:[%s1649_s1 + $0x20] sm:$0xff] }
   0x5   :  { %v982_v19 = vsub.f32 %v42_v6, %v953_v9  ;;  %v985_v20 = vsub.f32 %v41_v7, %v955_v10  ;;  %v991_v24 = vand.u32 4294901760, %v38_v13  ;;  %v998_v27 = vand.u32 4294901760, %v37_v17  ;;  %v22_v47 = vld [vmem:[%s1650_s0 + $0x40] sm:$0xff]  ;;  %v33_v49 = vld [vmem:[%s1649_s1 + $0x18] sm:$0xff]  ;;  %v32_v55 = vld [vmem:[%s1649_s1 + $0x10] sm:$0xff] }
   0x6   :  { %877 = vmatpush.msra.mxu2 %v940_v4  ;;  %v213_v21 = vand.u32 4294901760, %v967_v14  ;;  %v219_v22 = vand.u32 4294901760, %v970_v15  ;;  %v225_v23 = vand.u32 4294901760, %v973_v16  ;;  %53 = vmatpush.msra.mxu0 %v940_v4  ;;  %v1001_v28 = vsub.f32 %v40_v8, %v957_v11  ;;  %v31_v62 = vld [vmem:[%s1649_s1 + $0x8] sm:$0xff]  ;;  %v30_v2 = vld [vmem:[%s1649_s1] sm:$0xff] }
   0x7   :  { %v231_v26 = vand.u32 4294901760, %v982_v19  ;;  %v237_v32 = vand.u32 4294901760, %v985_v20  ;;  %v1021_v35 = vand.u32 4294901760, %v36_v25  ;;  %v1024_v36 = vsub.f32 %v39_v12, %v979_v18  ;;  %v14_v12 = vld [vmem:[%s1650_s0] sm:$0xff] }
   0x8   :  { %878 = vmatpush.msra.mxu2 %v942_v5  ;;  %v214_v29 = vsub.f32 %v967_v14, %v213_v21  ;;  %v220_v30 = vsub.f32 %v970_v15, %v219_v22  ;;  %v226_v31 = vsub.f32 %v973_v16, %v225_v23  ;;  %55 = vmatpush.msra.mxu0 %v942_v5  ;;  %v243_v39 = vand.u32 4294901760, %v1001_v28 }
   0x9   :  { %v232_v34 = vsub.f32 %v982_v19, %v231_v26  ;;  %v1030_v40 = vsub.f32 %v38_v13, %v991_v24  ;;  %v1032_v41 = vand.u32 4294901760, %v35_v33  ;;  %v238_v44 = vsub.f32 %v985_v20, %v237_v32 }
   0xa   :  { %879 = vmatpush.msra.mxu2 %v953_v9  ;;  %v215_v37 = vand.u32 4294901760, %v214_v29  ;;  %v221_v38 = vand.u32 4294901760, %v220_v30  ;;  %57 = vmatpush.msra.mxu0 %v953_v9  ;;  %v227_v43 = vand.u32 4294901760, %v226_v31  ;;  %v1663_v45 = vand.u32 4294901760, %v1024_v36  ;;  %v23_v30 = vld [vmem:[%s1650_s0 + $0x48] sm:$0xff] }
   0xb   :  { %v1043_v46 = vsub.f32 %v37_v17, %v998_v27  ;;  %v1662_v48 = vand.u32 4294901760, %v1030_v40  ;;  %v233_v50 = vand.u32 4294901760, %v232_v34  ;;  %v244_v51 = vsub.f32 %v1001_v28, %v243_v39 }
   0xc   :  { %880 = vmatpush.msra.mxu2 %v955_v10  ;;  %892 = vmatpush.msra.mxu3 %v215_v37  ;;  %v1057_v52 = vand.u32 4294901760, %v34_v42  ;;  %v1060_v53 = vsub.f32 %v36_v25, %v1021_v35  ;;  %v1067_v56 = vand.u32 4294901760, %v22_v47  ;;  %v239_v57 = vand.u32 4294901760, %v238_v44 }
   0xd   :  { %216 = vmatpush.msra.mxu1 %v215_v37  ;;  %59 = vmatpush.msra.mxu0 %v955_v10  ;;  %v1657_v54 = vand.u32 4294901760, %v1043_v46  ;;  %v250_v58 = vsub.f32 %v1024_v36, %v1663_v45  ;;  %v1073_v59 = vand.u32 4294901760, %v33_v49  ;;  %v1076_v60 = vsub.f32 %v35_v33, %v1032_v41 }
   0xe   :  { %881 = vmatpush.msra.mxu2 %v957_v11  ;;  %893 = vmatpush.msra.mxu3 %v221_v38  ;;  %v256_v61 = vsub.f32 %v1030_v40, %v1662_v48  ;;  %v245_v63 = vand.u32 4294901760, %v244_v51  ;;  %v1086_v0 = vand.u32 4294901760, %v32_v55  ;;  %v1656_v1 = vand.u32 4294901760, %v1060_v53 }
   0xf   :  { %222 = vmatpush.msra.mxu1 %v221_v38  ;;  %61 = vmatpush.msra.mxu0 %v957_v11  ;;  %v1093_v6 = vsub.f32 %v34_v42, %v1057_v52  ;;  %v262_v7 = vsub.f32 %v1043_v46, %v1657_v54  ;;  %v1100_v8 = vsub.f32 %v22_v47, %v1067_v56  ;;  %v251_v13 = vand.u32 4294901760, %v250_v58 }
  0x10   :  { %882 = vmatpush.msra.mxu2 %v979_v18  ;;  %894 = vmatpush.msra.mxu3 %v227_v43  ;;  %v1106_v17 = vand.u32 4294901760, %v31_v62  ;;  %v1655_v25 = vand.u32 4294901760, %v1076_v60  ;;  %v1110_v29 = vsub.f32 %v33_v49, %v1073_v59  ;;  %v257_v31 = vand.u32 4294901760, %v256_v61 }
  0x11   :  { %228 = vmatpush.msra.mxu1 %v227_v43  ;;  %63 = vmatpush.msra.mxu0 %v979_v18  ;;  %v1115_v33 = vand.u32 4294901760, %v30_v2  ;;  %v268_v34 = vsub.f32 %v1060_v53, %v1656_v1  ;;  %v1653_v37 = vand.u32 4294901760, %v1093_v6  ;;  %v1124_v38 = vsub.f32 %v32_v55, %v1086_v0 }
  0x12   :  { %883 = vmatpush.msra.mxu2 %v991_v24  ;;  %895 = vmatpush.msra.mxu3 %v233_v50  ;;  %v1126_v42 = vand.u32 4294901760, %v14_v12  ;;  %v263_v43 = vand.u32 4294901760, %v262_v7  ;;  %v1654_v44 = vand.u32 4294901760, %v1100_v8  ;;  %v1130_v47 = vand.u32 4294901760, %v23_v30 }
  0x13   :  { %234 = vmatpush.msra.mxu1 %v233_v50  ;;  %65 = vmatpush.msra.mxu0 %v991_v24  ;;  %v274_v49 = vsub.f32 %v1076_v60, %v1655_v25  ;;  %v1658_v50 = vand.u32 4294901760, %v1110_v29  ;;  %v1138_v51 = vsub.f32 %v31_v62, %v1106_v17  ;;  %v269_v58 = vand.u32 4294901760, %v268_v34  ;;  %v24_v34 = vld [vmem:[%s1650_s0 + $0x50] sm:$0xff] }
  0x14   :  { %884 = vmatpush.msra.mxu2 %v998_v27  ;;  %896 = vmatpush.msra.mxu3 %v239_v57  ;;  %v1141_v55 = vsub.f32 %v14_v12, %v1126_v42  ;;  %v280_v61 = vsub.f32 %v1093_v6, %v1653_v37  ;;  %v1659_v62 = vand.u32 4294901760, %v1124_v38  ;;  %v149_v7 = vsub.f32 %v1100_v8, %v1654_v44 }
  0x15   :  { %240 = vmatpush.msra.mxu1 %v239_v57  ;;  %67 = vmatpush.msra.mxu0 %v998_v27  ;;  %v15_v57 = vld [vmem:[%s1650_s0 + $0x8] sm:$0xff]  ;;  %v1160_v12 = vsub.f32 %v23_v30, %v1130_v47  ;;  %v1661_v44 = vand.u32 4294901760, %v1138_v51 }
  0x16   :  { %885 = vmatpush.msra.mxu2 %v1021_v35  ;;  %897 = vmatpush.msra.mxu3 %v245_v63  ;;  %v1166_v37 = vand.u32 4294901760, %v15_v57  ;;  %v281_v30 = vand.u32 4294901760, %v280_v61  ;;  %v292_v25 = vsub.f32 %v1124_v38, %v1659_v62  ;;  %v150_v54 = vand.u32 4294901760, %v149_v7 }
  0x17   :  { %246 = vmatpush.msra.mxu1 %v245_v63  ;;  %69 = vmatpush.msra.mxu0 %v1021_v35  ;;  %v1153_v63 = vsub.f32 %v30_v2, %v1115_v33  ;;  %v275_v2 = vand.u32 4294901760, %v274_v49  ;;  %v1179_v49 = vand.u32 4294901760, %v24_v34  ;;  %v298_v7 = vsub.f32 %v1138_v51, %v1661_v44 }
  0x18   :  { %886 = vmatpush.msra.mxu2 %v1032_v41  ;;  %898 = vmatpush.msra.mxu3 %v251_v13  ;;  %v1187_v61 = vsub.f32 %v15_v57, %v1166_v37  ;;  %v293_v57 = vand.u32 4294901760, %v292_v25  ;;  %v25_v25 = vld [vmem:[%s1650_s0 + $0x58] sm:$0xff] }
  0x19   :  { %252 = vmatpush.msra.mxu1 %v251_v13  ;;  %71 = vmatpush.msra.mxu0 %v1032_v41  ;;  %v1660_v13 = vand.u32 4294901760, %v1141_v55  ;;  %v1664_v1 = vand.u32 4294901760, %v1153_v63 }
  0x1a   :  { %887 = vmatpush.msra.mxu2 %v1057_v52  ;;  %899 = vmatpush.msra.mxu3 %v257_v31  ;;  %v92_v48 = vand.u32 4294901760, %v1187_v61 }
  0x1b   :  { %258 = vmatpush.msra.mxu1 %v257_v31  ;;  %73 = vmatpush.msra.mxu0 %v1057_v52  ;;  %v286_v31 = vsub.f32 %v1110_v29, %v1658_v50  ;;  %v1665_v50 = vand.u32 4294901760, %v1160_v12 }
  0x1c   :  { %888 = vmatpush.msra.mxu2 %v1073_v59  ;;  %900 = vmatpush.msra.mxu3 %v263_v43 }
  0x1d   :  { %264 = vmatpush.msra.mxu1 %v263_v43  ;;  %75 = vmatpush.msra.mxu0 %v1073_v59  ;;  %v85_v43 = vsub.f32 %v1141_v55, %v1660_v13  ;;  %v287_v62 = vand.u32 4294901760, %v286_v31  ;;  %v304_v13 = vsub.f32 %v1153_v63, %v1664_v1  ;;  %v1202_v31 = vsub.f32 %v24_v34, %v1179_v49 }
  0x1e   :  { %889 = vmatpush.msra.mxu2 %v1086_v0  ;;  %901 = vmatpush.msra.mxu3 %v269_v58  ;;  %v157_v44 = vsub.f32 %v1160_v12, %v1665_v50  ;;  %v299_v1 = vand.u32 4294901760, %v298_v7  ;;  %v1216_v34 = vand.u32 4294901760, %v25_v25  ;;  %v93_v7 = vsub.f32 %v1187_v61, %v92_v48 }
  0x1f   :  { %270 = vmatpush.msra.mxu1 %v269_v58  ;;  %77 = vmatpush.msra.mxu0 %v1086_v0  ;;  %v16_v58 = vld [vmem:[%s1650_s0 + $0x10] sm:$0xff] }
  0x20   :  { %890 = vmatpush.msra.mxu2 %v1106_v17  ;;  %902 = vmatpush.msra.mxu3 %v275_v2  ;;  %v1211_v45 = vand.u32 4294901760, %v16_v58 }
  0x21   :  { %276 = vmatpush.msra.mxu1 %v275_v2  ;;  %79 = vmatpush.msra.mxu0 %v1106_v17  ;;  %v86_v2 = vand.u32 4294901760, %v85_v43  ;;  %v164_v43 = vand.u32 4294901760, %v1202_v31 }
  0x22   :  { %891 = vmatpush.msra.mxu2 %v1115_v33  ;;  %903 = vmatpush.msra.mxu3 %v281_v30  ;;  %v1223_v50 = vsub.f32 %v16_v58, %v1211_v45  ;;  %v94_v58 = vand.u32 4294901760, %v93_v7 }
  0x23   :  { %151 = vmatmul.f32.vlgmr.msra.gmra.mxu2 %v150_v54  ;;  %282 = vmatpush.msra.mxu1 %v281_v30  ;;  %v305_v54 = vand.u32 4294901760, %v304_v13  ;;  %v158_v30 = vand.u32 4294901760, %v157_v44  ;;  %v1233_v44 = vsub.f32 %v25_v25, %v1216_v34  ;;  %v165_v13 = vsub.f32 %v1202_v31, %v164_v43 }
  0x24   :  { %904 = vmatpush.msra.mxu3 %v287_v62  ;;  %374 = vmatpush.msrb.mxu2 %v967_v14  ;;  %v26_v14 = vld [vmem:[%s1650_s0 + $0x60] sm:$0xff] }
  0x25   :  { %288 = vmatpush.msra.mxu1 %v287_v62  ;;  %81 = vmatpush.msra.mxu0 %v1115_v33  ;;  %v17_v62 = vld [vmem:[%s1650_s0 + $0x18] sm:$0xff]  ;;  %v172_v25 = vand.u32 4294901760, %v1233_v44 }
  0x26   :  { %905 = vmatpush.msra.mxu3 %v293_v57  ;;  %377 = vmatpush.msrb.mxu2 %v970_v15 }
  0x27   :  { %294 = vmatpush.msra.mxu1 %v293_v57  ;;  %87 = vmatmul.f32.vlgmr.msra.gmra.mxu0 %v86_v2  ;;  %v100_v57 = vand.u32 4294901760, %v1223_v50  ;;  %v166_v2 = vand.u32 4294901760, %v165_v13 }
  0x28   :  { %906 = vmatpush.msra.mxu3 %v299_v1  ;;  %380 = vmatpush.msrb.mxu2 %v973_v16 }
  0x29   :  { %300 = vmatpush.msra.mxu1 %v299_v1  ;;  %633 = vmatpush.msrb.mxu0 %v213_v21  ;;  %v1243_v21 = vand.u32 4294901760, %v17_v62  ;;  %v1251_v1 = vand.u32 4294901760, %v26_v14 }
  0x2a   :  { %907 = vmatpush.msra.mxu3 %v305_v54  ;;  %383 = vmatpush.msrb.mxu2 %v982_v19 }
  0x2b   :  { %159 = vmatmul.f32.gmra.mxu2 %v158_v30  ;;  %340 = vmatmul.f32.vlgmr.msra.gmra.mxu3 %v1067_v56  ;;  %v1259_v30 = vsub.f32 %v17_v62, %v1243_v21  ;;  %v1272_v15 = vsub.f32 %v26_v14, %v1251_v1  ;;  %v28_v14 = vld [vmem:[%s1650_s0 + $0x70] sm:$0xff] }
  0x2c   :  { %502 = vmatpush.msrb.mxu3 %v938_v3  ;;  %306 = vmatpush.msra.mxu1 %v305_v54  ;;  %v101_v54 = vsub.f32 %v1223_v50, %v100_v57 }
  0x2d   :  { %308 = vmatmul.f32.vlgmr.msra.gmra.mxu1 %v1126_v42  ;;  %637 = vmatpush.msrb.mxu0 %v219_v22  ;;  %v108_v16 = vand.u32 4294901760, %v1259_v30  ;;  %v180_v7 = vand.u32 4294901760, %v1272_v15 }
  0x2e   :  { %504 = vmatpush.msrb.mxu3 %v940_v4  ;;  %760 = vmatpush.msrb.mxu1 %v938_v3  ;;  %v18_v3 = vld [vmem:[%s1650_s0 + $0x20] sm:$0xff]  ;;  %v102_v22 = vand.u32 4294901760, %v101_v54 }
  0x2f   :  { %386 = vmatpush.msrb.mxu2 %v985_v20  ;;  %95 = vmatmul.f32.gmra.mxu0 %v94_v58  ;;  %v109_v19 = vsub.f32 %v1259_v30, %v108_v16  ;;  %v181_v58 = vsub.f32 %v1272_v15, %v180_v7 }
  0x30   :  { %506 = vmatpush.msrb.mxu3 %v942_v5  ;;  %762 = vmatpush.msrb.mxu1 %v940_v4  ;;  %v173_v4 = vsub.f32 %v1233_v44, %v172_v25 }
  0x31   :  { %641 = vmatpush.msrb.mxu0 %v225_v23  ;;  %389 = vmatpush.msrb.mxu2 %v1001_v28  ;;  %v1279_v23 = vand.u32 4294901760, %v18_v3  ;;  %v110_v20 = vand.u32 4294901760, %v109_v19  ;;  %v1666_v28 = vand.u32 4294901760, %v1024_v36  ;;  %v182_v54 = vand.u32 4294901760, %v181_v58 }
  0x32   :  { %508 = vmatpush.msrb.mxu3 %v953_v9  ;;  %764 = vmatpush.msrb.mxu1 %v942_v5  ;;  %v27_v5 = vld [vmem:[%s1650_s0 + $0x68] sm:$0xff]  ;;  %v174_v62 = vand.u32 4294901760, %v173_v4 }
  0x33   :  { %167 = vmatmul.f32.gmra.mxu2 %v166_v2  ;;  %344 = vmatmul.f32.gmra.mxu3 %v1130_v47  ;;  %v1299_v13 = vsub.f32 %v18_v3, %v1279_v23 }
  0x34   :  { %510 = vmatpush.msrb.mxu3 %v955_v10  ;;  %645 = vmatpush.msrb.mxu0 %v231_v26  ;;  %v1296_v26 = vand.u32 4294901760, %v27_v5 }
  0x35   :  { %312 = vmatmul.f32.gmra.mxu1 %v1166_v37  ;;  %392 = vmatpush.msrb.mxu2 %v1024_v36  ;;  %v1667_v36 = vand.u32 4294901760, %v1030_v40 }
  0x36   :  { %512 = vmatpush.msrb.mxu3 %v957_v11  ;;  %766 = vmatpush.msrb.mxu1 %v953_v9  ;;  %v19_v9 = vld [vmem:[%s1650_s0 + $0x28] sm:$0xff] }
  0x37   :  { %103 = vmatmul.f32.gmra.mxu0 %v102_v22  ;;  %395 = vmatpush.msrb.mxu2 %v1030_v40  ;;  %v1323_v2 = vand.u32 4294901760, %v19_v9 }
  0x38   :  { %514 = vmatpush.msrb.mxu3 %v979_v18  ;;  %649 = vmatpush.msrb.mxu0 %v237_v32  ;;  %v1317_v32 = vsub.f32 %v27_v5, %v1296_v26  ;;  %v1668_v5 = vand.u32 4294901760, %v1043_v46 }
  0x39   :  { %768 = vmatpush.msrb.mxu1 %v955_v10  ;;  %398 = vmatpush.msrb.mxu2 %v1043_v46  ;;  %v116_v10 = vand.u32 4294901760, %v1299_v13  ;;  %v1340_v4 = vsub.f32 %v19_v9, %v1323_v2  ;;  %v29_v46 = vld [vmem:[%s1650_s0 + $0x78] sm:$0xff]  ;;  %v1669_v9 = vand.u32 4294901760, %v1060_v53 }
  0x3a   :  { %516 = vmatpush.msrb.mxu3 %v991_v24  ;;  %653 = vmatpush.msrb.mxu0 %v243_v39  ;;  %v1332_v39 = vand.u32 4294901760, %v28_v14  ;;  %v188_v3 = vand.u32 4294901760, %v1317_v32 }
  0x3b   :  { %175 = vmatmul.f32.gmra.mxu2 %v174_v62  ;;  %348 = vmatmul.f32.gmra.mxu3 %v1179_v49 }
  0x3c   :  { %770 = vmatpush.msrb.mxu1 %v957_v11  ;;  %518 = vmatpush.msrb.mxu3 %v998_v27  ;;  %v117_v11 = vsub.f32 %v1299_v13, %v116_v10  ;;  %v1351_v22 = vsub.f32 %v28_v14, %v1332_v39  ;;  %v189_v40 = vsub.f32 %v1317_v32, %v188_v3  ;;  %v1377_v14 = vand.u32 4294901760, %v29_v46 }
  0x3d   :  { %316 = vmatmul.f32.gmra.mxu1 %v1211_v45  ;;  %657 = vmatpush.msrb.mxu0 %v1666_v28 }
  0x3e   :  { %401 = vmatpush.msrb.mxu2 %v1060_v53  ;;  %772 = vmatpush.msrb.mxu1 %v979_v18  ;;  %v20_v18 = vld [vmem:[%s1650_s0 + $0x30] sm:$0xff]  ;;  %v118_v62 = vand.u32 4294901760, %v117_v11  ;;  %v196_v58 = vand.u32 4294901760, %v1351_v22  ;;  %v1670_v53 = vand.u32 4294901760, %v1076_v60  ;;  %v1671_v11 = vand.u32 4294901760, %v1093_v6 }
  0x3f   :  { %111 = vmatmul.f32.gmra.mxu0 %v110_v20  ;;  %520 = vmatpush.msrb.mxu3 %v1021_v35  ;;  %v1361_v19 = vand.u32 4294901760, %v20_v18  ;;  %v190_v20 = vand.u32 4294901760, %v189_v40 }
  0x40   :  { %661 = vmatpush.msrb.mxu0 %v1667_v36  ;;  %404 = vmatpush.msrb.mxu2 %v1076_v60  ;;  %v1399_v36 = vsub.f32 %v29_v46, %v1377_v14  ;;  %v1673_v46 = vand.u32 4294901760, %v1124_v38 }
  0x41   :  { %774 = vmatpush.msrb.mxu1 %v991_v24  ;;  %522 = vmatpush.msrb.mxu3 %v1032_v41  ;;  %v124_v24 = vand.u32 4294901760, %v1340_v4  ;;  %v1381_v28 = vsub.f32 %v20_v18, %v1361_v19 }
  0x42   :  { %665 = vmatpush.msrb.mxu0 %v1668_v5  ;;  %407 = vmatpush.msrb.mxu2 %v1093_v6  ;;  %v1672_v6 = vand.u32 4294901760, %v1110_v29  ;;  %v204_v40 = vand.u32 4294901760, %v1399_v36 }
  0x43   :  { %183 = vmatmul.f32.gmra.mxu2 %v182_v54  ;;  %352 = vmatmul.f32.gmra.mxu3 %v1216_v34  ;;  %v197_v54 = vsub.f32 %v1351_v22, %v196_v58 }
  0x44   :  { %776 = vmatpush.msrb.mxu1 %v998_v27  ;;  %524 = vmatpush.msrb.mxu3 %v1057_v52  ;;  %v125_v27 = vsub.f32 %v1340_v4, %v124_v24 }
  0x45   :  { %320 = vmatmul.f32.gmra.mxu1 %v1243_v21  ;;  %669 = vmatpush.msrb.mxu0 %v1669_v9  ;;  %v198_v5 = vand.u32 4294901760, %v197_v54 }
  0x46   :  { %410 = vmatpush.msrb.mxu2 %v1110_v29  ;;  %778 = vmatpush.msrb.mxu1 %v1021_v35  ;;  %v21_v35 = vld [vmem:[%s1650_s0 + $0x38] sm:$0xff]  ;;  %v126_v60 = vand.u32 4294901760, %v125_v27  ;;  %v1674_v29 = vand.u32 4294901760, %v1138_v51  ;;  %v1675_v27 = vand.u32 4294901760, %v1153_v63 }
  0x47   :  { %119 = vmatmul.f32.gmra.mxu0 %v118_v62  ;;  %526 = vmatpush.msrb.mxu3 %v1073_v59  ;;  %v1402_v18 = vand.u32 4294901760, %v21_v35 }
  0x48   :  { %673 = vmatpush.msrb.mxu0 %v1670_v53  ;;  %413 = vmatpush.msrb.mxu2 %v1124_v38 }
  0x49   :  { %780 = vmatpush.msrb.mxu1 %v1032_v41  ;;  %528 = vmatpush.msrb.mxu3 %v1086_v0  ;;  %v132_v41 = vand.u32 4294901760, %v1381_v28 }
  0x4a   :  { %677 = vmatpush.msrb.mxu0 %v1671_v11  ;;  %416 = vmatpush.msrb.mxu2 %v1138_v51  ;;  %v1677_v51 = vand.u32 4294901760, %v1100_v8 }
  0x4b   :  { %191 = vmatmul.f32.gmra.mxu2 %v190_v20  ;;  %356 = vmatmul.f32.gmra.mxu3 %v1251_v1  ;;  %v133_v62 = vsub.f32 %v1381_v28, %v132_v41 }
  0x4c   :  { %782 = vmatpush.msrb.mxu1 %v1057_v52  ;;  %419 = vmatpush.msrb.mxu2 %v1153_v63  ;;  %v139_v52 = vsub.f32 %v21_v35, %v1402_v18 }
  0x4d   :  { %324 = vmatmul.f32.gmra.mxu1 %v1279_v23  ;;  %530 = vmatpush.msrb.mxu3 %v1106_v17  ;;  %v134_v9 = vand.u32 4294901760, %v133_v62 }
  0x4e   :  { %681 = vmatpush.msrb.mxu0 %v1672_v6  ;;  %784 = vmatpush.msrb.mxu1 %v1073_v59  ;;  %v205_v59 = vsub.f32 %v1399_v36, %v204_v40  ;;  %v140_v20 = vand.u32 4294901760, %v139_v52 }
  0x4f   :  { %127 = vmatmul.f32.gmra.mxu0 %v126_v60  ;;  %532 = vmatpush.msrb.mxu3 %v1115_v33 }
  0x50   :  { %685 = vmatpush.msrb.mxu0 %v1673_v46  ;;  %786 = vmatpush.msrb.mxu1 %v1086_v0  ;;  %v206_v0 = vand.u32 4294901760, %v205_v59  ;;  %v141_v38 = vsub.f32 %v139_v52, %v140_v20 }
  0x52   :  { %689 = vmatpush.msrb.mxu0 %v1674_v29  ;;  %788 = vmatpush.msrb.mxu1 %v1106_v17  ;;  %v142_v17 = vand.u32 4294901760, %v141_v38 }
  0x53   :  { %199 = vmatmul.f32.gmra.mxu2 %v198_v5  ;;  %360 = vmatmul.f32.gmra.mxu3 %v1296_v26 }
  0x54   :  { %693 = vmatpush.msrb.mxu0 %v1675_v27  ;;  %790 = vmatpush.msrb.mxu1 %v1115_v33  ;;  %v1676_v33 = vand.u32 4294901760, %v1141_v55 }
  0x55   :  { %328 = vmatmul.f32.gmra.mxu1 %v1323_v2 }
  0x57   :  { %135 = vmatmul.f32.gmra.mxu0 %v134_v9 }
  0x5b   :  { %207 = vmatmul.f32.gmra.mxu2 %v206_v0  ;;  %364 = vmatmul.f32.gmra.mxu3 %v1332_v39 }
  0x5d   :  { %332 = vmatmul.f32.gmra.mxu1 %v1361_v19 }
  0x5f   :  { %143 = vmatmul.f32.gmra.mxu0 %v142_v17 }
  0x63   :  { %368 = vmatmul.f32.gmra.mxu3 %v1377_v14  ;;  %422 = vmatmul.f32.vlgmr.msrb.gmra.mxu2 %v1141_v55 }
  0x65   :  { %336 = vmatmul.f32.gmra.mxu1 %v1402_v18 }
  0x67   :  { %695 = vmatmul.f32.vlgmr.msrb.gmra.mxu0 %v1126_v42 }
  0x6b   :  { %427 = vmatmul.f32.gmra.mxu2 %v1187_v61  ;;  %536 = vmatmul.f32.vlgmr.msrb.gmra.mxu3 %v1676_v33 }
  0x6d   :  { %792 = vmatmul.f32.vlgmr.msrb.gmra.mxu1 %v1126_v42 }
  0x6f   :  { %699 = vmatmul.f32.gmra.mxu0 %v1166_v37 }
  0x73   :  { %432 = vmatmul.f32.gmra.mxu2 %v1223_v50  ;;  %542 = vmatmul.f32.gmra.mxu3 %v92_v48 }
  0x75   :  { %796 = vmatmul.f32.gmra.mxu1 %v1166_v37 }
  0x77   :  { %703 = vmatmul.f32.gmra.mxu0 %v1211_v45 }
  0x7b   :  { %437 = vmatmul.f32.gmra.mxu2 %v1259_v30  ;;  %548 = vmatmul.f32.gmra.mxu3 %v100_v57 }
  0x7d   :  { %800 = vmatmul.f32.gmra.mxu1 %v1211_v45  ;;  %v1471_v45 = vld [vmem:[%s1651_s2] ss:$0 sm:$0xff] }
  0x7f   :  { %707 = vmatmul.f32.gmra.mxu0 %v1243_v21 }
  0x83   :  { %442 = vmatmul.f32.gmra.mxu2 %v1299_v13  ;;  %554 = vmatmul.f32.gmra.mxu3 %v108_v16  ;;  %v1678_v16 = vand.u32 4294901760, %v1160_v12 }
  0x85   :  { %804 = vmatmul.f32.gmra.mxu1 %v1243_v21 }
  0x87   :  { %711 = vmatmul.f32.gmra.mxu0 %v1279_v23 }
  0x8b   :  { %447 = vmatmul.f32.gmra.mxu2 %v1340_v4  ;;  %560 = vmatmul.f32.gmra.mxu3 %v116_v10 }
  0x8d   :  { %808 = vmatmul.f32.gmra.mxu1 %v1279_v23 }
  0x8f   :  { %715 = vmatmul.f32.gmra.mxu0 %v1323_v2 }
  0x93   :  { %452 = vmatmul.f32.gmra.mxu2 %v1381_v28  ;;  %566 = vmatmul.f32.gmra.mxu3 %v124_v24 }
  0x95   :  { %812 = vmatmul.f32.gmra.mxu1 %v1323_v2 }
  0x97   :  { %719 = vmatmul.f32.gmra.mxu0 %v1361_v19 }
  0x9b   :  { %457 = vmatmul.f32.gmra.mxu2 %v139_v52  ;;  %572 = vmatmul.f32.gmra.mxu3 %v132_v41 }
  0x9d   :  { %816 = vmatmul.f32.gmra.mxu1 %v1361_v19 }
  0x9f   :  { %723 = vmatmul.f32.gmra.mxu0 %v1402_v18 }
  0xa3   :  { %462 = vmatmul.f32.gmra.mxu2 %v1100_v8  ;;  %578 = vmatmul.f32.gmra.mxu3 %v140_v20 }
  0xa4   :  { %v1473_v48 = vpop.f32.mrf.mxu0 }
  0xa5   :  { %820 = vmatmul.f32.gmra.mxu1 %v1402_v18 }
  0xa6   :  { %v152_v37 = vpop.f32.mrf.mxu2 }
  0xa7   :  { %v153_v42 = vadd.f32 %v1471_v45, %v152_v37  ;;  %727 = vmatmul.f32.gmra.mxu0 %v1067_v56 }
  0xaa   :  { %v1478_v50 = vpop.f32.mrf.mxu1 }
  0xab   :  { %467 = vmatmul.f32.gmra.mxu2 %v1160_v12  ;;  %584 = vmatmul.f32.gmra.mxu3 %v1677_v51 }
  0xac   :  { %v1483_v55 = vpop.f32.mrf.mxu0 }
  0xad   :  { %824 = vmatmul.f32.gmra.mxu1 %v1067_v56 }
  0xae   :  { %v160_v63 = vpop.f32.mrf.mxu2  ;;  %v341_v61 = vpop.f32.mrf.mxu3 }
  0xaf   :  { %v161_v57 = vadd.f32 %v1471_v45, %v160_v63  ;;  %v1487_v21 = vadd.f32 %v341_v61, %v153_v42  ;;  %731 = vmatmul.f32.gmra.mxu0 %v1130_v47 }
  0xb2   :  { %v1490_v30 = vpop.f32.mrf.mxu1 }
  0xb3   :  { %472 = vmatmul.f32.gmra.mxu2 %v1202_v31  ;;  %590 = vmatmul.f32.gmra.mxu3 %v1678_v16 }
  0xb4   :  { %v1495_v8 = vpop.f32.mrf.mxu0 }
  0xb5   :  { %828 = vmatmul.f32.gmra.mxu1 %v1130_v47  ;;  %v105_v61 = vadd.f32 %v1471_v45, %v1495_v8 }
  0xb6   :  { %v168_v56 = vpop.f32.mrf.mxu2  ;;  %v345_v23 = vpop.f32.mrf.mxu3 }
  0xb7   :  { %v169_v13 = vadd.f32 %v1471_v45, %v168_v56  ;;  %v1499_v10 = vadd.f32 %v345_v23, %v161_v57  ;;  %735 = vmatmul.f32.gmra.mxu0 %v1179_v49 }
  0xba   :  { %v1502_v2 = vpop.f32.mrf.mxu1 }
  0xbb   :  { %477 = vmatmul.f32.gmra.mxu2 %v1233_v44  ;;  %596 = vmatmul.f32.gmra.mxu3 %v164_v43  ;;  %v318_v56 = vadd.f32 %v1502_v2, %v105_v61 }
  0xbc   :  { %v1507_v12 = vpop.f32.mrf.mxu0 }
  0xbd   :  { %832 = vmatmul.f32.gmra.mxu1 %v1179_v49 }
  0xbe   :  { %v176_v47 = vpop.f32.mrf.mxu2  ;;  %v349_v4 = vpop.f32.mrf.mxu3 }
  0xbf   :  { %v177_v24 = vadd.f32 %v1471_v45, %v176_v47  ;;  %v1511_v19 = vadd.f32 %v349_v4, %v169_v13  ;;  %739 = vmatmul.f32.gmra.mxu0 %v1216_v34 }
  0xc2   :  { %v1514_v28 = vpop.f32.mrf.mxu1 }
  0xc3   :  { %482 = vmatmul.f32.gmra.mxu2 %v1272_v15  ;;  %602 = vmatmul.f32.gmra.mxu3 %v172_v25 }
  0xc4   :  { %v1519_v31 = vpop.f32.mrf.mxu0 }
  0xc5   :  { %836 = vmatmul.f32.gmra.mxu1 %v1216_v34 }
  0xc6   :  { %v184_v49 = vpop.f32.mrf.mxu2  ;;  %v353_v43 = vpop.f32.mrf.mxu3 }
  0xc7   :  { %v185_v53 = vadd.f32 %v1471_v45, %v184_v49  ;;  %v1523_v35 = vadd.f32 %v353_v43, %v177_v24  ;;  %743 = vmatmul.f32.gmra.mxu0 %v1251_v1  ;;  %v113_v24 = vadd.f32 %v1471_v45, %v1507_v12 }
  0xca   :  { %v1526_v54 = vpop.f32.mrf.mxu1 }
  0xcb   :  { %487 = vmatmul.f32.gmra.mxu2 %v1317_v32  ;;  %608 = vmatmul.f32.gmra.mxu3 %v180_v7 }
  0xcc   :  { %v1531_v44 = vpop.f32.mrf.mxu0 }
  0xcd   :  { %840 = vmatmul.f32.gmra.mxu1 %v1251_v1 }
  0xce   :  { %v192_v34 = vpop.f32.mrf.mxu2  ;;  %v357_v25 = vpop.f32.mrf.mxu3 }
  0xcf   :  { %v193_v11 = vadd.f32 %v1471_v45, %v192_v34  ;;  %v1535_v60 = vadd.f32 %v357_v25, %v185_v53  ;;  %747 = vmatmul.f32.gmra.mxu0 %v1296_v26  ;;  %v322_v53 = vadd.f32 %v1514_v28, %v113_v24 }
  0xd2   :  { %v1538_v41 = vpop.f32.mrf.mxu1 }
  0xd3   :  { %492 = vmatmul.f32.gmra.mxu2 %v1351_v22  ;;  %614 = vmatmul.f32.gmra.mxu3 %v188_v3 }
  0xd4   :  { %v1543_v15 = vpop.f32.mrf.mxu0 }
  0xd5   :  { %844 = vmatmul.f32.gmra.mxu1 %v1296_v26 }
  0xd6   :  { %v200_v1 = vpop.f32.mrf.mxu2  ;;  %v361_v7 = vpop.f32.mrf.mxu3 }
  0xd7   :  { %v201_v18 = vadd.f32 %v1471_v45, %v200_v1  ;;  %v1547_v6 = vadd.f32 %v361_v7, %v193_v11  ;;  %751 = vmatmul.f32.gmra.mxu0 %v1332_v39  ;;  %v121_v7 = vadd.f32 %v1471_v45, %v1519_v31 }
  0xda   :  { %v1550_v5 = vpop.f32.mrf.mxu1 }
  0xdb   :  { %497 = vmatmul.f32.gmra.mxu2 %v1399_v36  ;;  %620 = vmatmul.f32.gmra.mxu3 %v196_v58  ;;  %v97_v36 = vadd.f32 %v1471_v45, %v1483_v55 }
  0xdc   :  { %v1555_v32 = vpop.f32.mrf.mxu0 }
  0xdd   :  { %848 = vmatmul.f32.gmra.mxu1 %v1332_v39  ;;  %v89_v39 = vadd.f32 %v1471_v45, %v1473_v48  ;;  %v314_v37 = vadd.f32 %v1490_v30, %v97_v36 }
  0xde   :  { %v208_v26 = vpop.f32.mrf.mxu2  ;;  %v365_v3 = vpop.f32.mrf.mxu3 }
  0xdf   :  { %v209_v62 = vadd.f32 %v1471_v45, %v208_v26  ;;  %v1559_v52 = vadd.f32 %v365_v3, %v201_v18  ;;  %755 = vmatmul.f32.gmra.mxu0 %v1377_v14  ;;  %v310_v20 = vadd.f32 %v1478_v50, %v89_v39  ;;  %v326_v3 = vadd.f32 %v1526_v54, %v121_v7 }
  0xe0   :  { %v129_v39 = vadd.f32 %v1471_v45, %v1531_v44 }
  0xe2   :  { %v1562_v46 = vpop.f32.mrf.mxu1 }
  0xe3   :  { %626 = vmatmul.f32.gmra.mxu3 %v204_v40 }
  0xe4   :  { %v696_v29 = vpop.f32.mrf.mxu0 }
  0xe5   :  { %852 = vmatmul.f32.gmra.mxu1 %v1377_v14 }
  0xe6   :  { %v369_v22 = vpop.f32.mrf.mxu3  ;;  %v423_v58 = vpop.f32.mrf.mxu2 }
  0xe7   :  { %v1569_v59 = vadd.f32 %v369_v22, %v209_v62  ;;  %v424_v0 = vadd.f32 %v423_v58, %v310_v20 }
  0xea   :  { %v793_v9 = vpop.f32.mrf.mxu1 }
  0xec   :  { %v700_v27 = vpop.f32.mrf.mxu0 }
  0xee   :  { %v428_v38 = vpop.f32.mrf.mxu2  ;;  %v537_v17 = vpop.f32.mrf.mxu3 }
  0xef   :  { %v538_v40 = vadd.f32 %v537_v17, %v424_v0  ;;  %v429_v48 = vadd.f32 %v428_v38, %v314_v37 }
  0xf1   :  { %v697_v33 = vadd.f32 %v696_v29, %v538_v40  ;;  %v137_v40 = vadd.f32 %v1471_v45, %v1543_v15 }
  0xf2   :  { %v797_v14 = vpop.f32.mrf.mxu1 }
  0xf3   :  { %v794_v42 = vadd.f32 %v793_v9, %v697_v33  ;;  %v334_v37 = vadd.f32 %v1550_v5, %v137_v40 }
  0xf4   :  { %v704_v51 = vpop.f32.mrf.mxu0 }
  0xf5   :  { %856 = vst [vmem:[%s1652_s3] sm:$0xff] %v794_v42 }
  0xf6   :  { %v433_v50 = vpop.f32.mrf.mxu2  ;;  %v543_v63 = vpop.f32.mrf.mxu3 }
  0xf7   :  { %v544_v57 = vadd.f32 %v543_v63, %v429_v48  ;;  %v434_v30 = vadd.f32 %v433_v50, %v318_v56  ;;  %v145_v63 = vadd.f32 %v1471_v45, %v1555_v32 }
  0xf9   :  { %v701_v16 = vadd.f32 %v700_v27, %v544_v57  ;;  %v330_v27 = vadd.f32 %v1538_v41, %v129_v39 }
  0xfa   :  { %v801_v55 = vpop.f32.mrf.mxu1 }
  0xfb   :  { %v798_v23 = vadd.f32 %v797_v14, %v701_v16  ;;  %v338_v16 = vadd.f32 %v1562_v46, %v145_v63 }
  0xfc   :  { %v708_v13 = vpop.f32.mrf.mxu0 }
  0xfd   :  { %857 = vst [vmem:[%s1652_s3 + $0x8] sm:$0xff] %v798_v23 }
  0xfe   :  { %v438_v47 = vpop.f32.mrf.mxu2  ;;  %v549_v4 = vpop.f32.mrf.mxu3 }
  0xff   :  { %v550_v49 = vadd.f32 %v549_v4, %v434_v30  ;;  %v439_v2 = vadd.f32 %v438_v47, %v322_v53 }
 0x101   :  { %v705_v43 = vadd.f32 %v704_v51, %v550_v49 }
 0x102   :  { %v805_v8 = vpop.f32.mrf.mxu1 }
 0x103   :  { %v802_v34 = vadd.f32 %v801_v55, %v705_v43 }
 0x104   :  { %v712_v25 = vpop.f32.mrf.mxu0 }
 0x105   :  { %858 = vst [vmem:[%s1652_s3 + $0x10] sm:$0xff] %v802_v34 }
 0x106   :  { %v443_v11 = vpop.f32.mrf.mxu2  ;;  %v555_v1 = vpop.f32.mrf.mxu3 }
 0x107   :  { %v556_v18 = vadd.f32 %v555_v1, %v439_v2  ;;  %v444_v28 = vadd.f32 %v443_v11, %v326_v3 }
 0x109   :  { %v709_v26 = vadd.f32 %v708_v13, %v556_v18 }
 0x10a   :  { %v809_v12 = vpop.f32.mrf.mxu1 }
 0x10b   :  { %v806_v62 = vadd.f32 %v805_v8, %v709_v26 }
 0x10c   :  { %v716_v29 = vpop.f32.mrf.mxu0 }
 0x10d   :  { %859 = vst [vmem:[%s1652_s3 + $0x18] sm:$0xff] %v806_v62 }
 0x10e   :  { %v448_v22 = vpop.f32.mrf.mxu2  ;;  %v561_v58 = vpop.f32.mrf.mxu3 }
 0x10f   :  { %v562_v9 = vadd.f32 %v561_v58, %v444_v28  ;;  %v449_v54 = vadd.f32 %v448_v22, %v330_v27 }
 0x111   :  { %v713_v20 = vadd.f32 %v712_v25, %v562_v9 }
 0x112   :  { %v813_v31 = vpop.f32.mrf.mxu1 }
 0x113   :  { %v810_v0 = vadd.f32 %v809_v12, %v713_v20 }
 0x114   :  { %v720_v38 = vpop.f32.mrf.mxu0 }
 0x115   :  { %860 = vst [vmem:[%s1652_s3 + $0x20] sm:$0xff] %v810_v0 }
 0x116   :  { %v453_v17 = vpop.f32.mrf.mxu2  ;;  %v567_v36 = vpop.f32.mrf.mxu3 }
 0x117   :  { %v568_v33 = vadd.f32 %v567_v36, %v449_v54  ;;  %v454_v41 = vadd.f32 %v453_v17, %v334_v37 }
 0x119   :  { %v717_v14 = vadd.f32 %v716_v29, %v568_v33 }
 0x11a   :  { %v817_v44 = vpop.f32.mrf.mxu1 }
 0x11b   :  { %v814_v42 = vadd.f32 %v813_v31, %v717_v14 }
 0x11c   :  { %v724_v51 = vpop.f32.mrf.mxu0 }
 0x11d   :  { %861 = vst [vmem:[%s1652_s3 + $0x28] sm:$0xff] %v814_v42 }
 0x11e   :  { %v458_v48 = vpop.f32.mrf.mxu2  ;;  %v573_v50 = vpop.f32.mrf.mxu3 }
 0x11f   :  { %v574_v61 = vadd.f32 %v573_v50, %v454_v41  ;;  %v459_v5 = vadd.f32 %v458_v48, %v338_v16 }
 0x121   :  { %v721_v57 = vadd.f32 %v720_v38, %v574_v61 }
 0x122   :  { %v821_v15 = vpop.f32.mrf.mxu1 }
 0x123   :  { %v818_v55 = vadd.f32 %v817_v44, %v721_v57 }
 0x124   :  { %v728_v56 = vpop.f32.mrf.mxu0 }
 0x125   :  { %862 = vst [vmem:[%s1652_s3 + $0x30] sm:$0xff] %v818_v55 }
 0x126   :  { %v463_v23 = vpop.f32.mrf.mxu2  ;;  %v579_v13 = vpop.f32.mrf.mxu3 }
 0x127   :  { %v580_v30 = vadd.f32 %v579_v13, %v459_v5  ;;  %v464_v45 = vadd.f32 %v463_v23, %v1487_v21 }
 0x129   :  { %v725_v47 = vadd.f32 %v724_v51, %v580_v30 }
 0x12a   :  { %v825_v4 = vpop.f32.mrf.mxu1 }
 0x12b   :  { %v822_v24 = vadd.f32 %v821_v15, %v725_v47 }
 0x12c   :  { %v732_v49 = vpop.f32.mrf.mxu0 }
 0x12d   :  { %863 = vst [vmem:[%s1652_s3 + $0x38] sm:$0xff] %v822_v24 }
 0x12e   :  { %v468_v32 = vpop.f32.mrf.mxu2  ;;  %v585_v46 = vpop.f32.mrf.mxu3 }
 0x12f   :  { %v586_v43 = vadd.f32 %v585_v46, %v464_v45  ;;  %v469_v2 = vadd.f32 %v468_v32, %v1499_v10 }
 0x131   :  { %v729_v8 = vadd.f32 %v728_v56, %v586_v43 }
 0x132   :  { %v829_v53 = vpop.f32.mrf.mxu1 }
 0x133   :  { %v826_v34 = vadd.f32 %v825_v4, %v729_v8 }
 0x134   :  { %v736_v25 = vpop.f32.mrf.mxu0 }
 0x135   :  { %864 = vst [vmem:[%s1652_s3 + $0x40] sm:$0xff] %v826_v34 }
 0x136   :  { %v473_v11 = vpop.f32.mrf.mxu2  ;;  %v591_v1 = vpop.f32.mrf.mxu3 }
 0x137   :  { %v592_v21 = vadd.f32 %v591_v1, %v469_v2  ;;  %v474_v12 = vadd.f32 %v473_v11, %v1511_v19 }
 0x139   :  { %v733_v7 = vadd.f32 %v732_v49, %v592_v21 }
 0x13a   :  { %v833_v18 = vpop.f32.mrf.mxu1 }
 0x13b   :  { %v830_v26 = vadd.f32 %v829_v53, %v733_v7 }
 0x13c   :  { %v740_v3 = vpop.f32.mrf.mxu0 }
 0x13d   :  { %865 = vst [vmem:[%s1652_s3 + $0x48] sm:$0xff] %v830_v26 }
 0x13e   :  { %v478_v62 = vpop.f32.mrf.mxu2  ;;  %v597_v29 = vpop.f32.mrf.mxu3 }
 0x13f   :  { %v598_v10 = vadd.f32 %v597_v29, %v474_v12  ;;  %v479_v39 = vadd.f32 %v478_v62, %v1523_v35 }
 0x141   :  { %v737_v28 = vadd.f32 %v736_v25, %v598_v10 }
 0x142   :  { %v837_v22 = vpop.f32.mrf.mxu1 }
 0x143   :  { %v834_v58 = vadd.f32 %v833_v18, %v737_v28 }
 0x144   :  { %v744_v31 = vpop.f32.mrf.mxu0 }
 0x145   :  { %866 = vst [vmem:[%s1652_s3 + $0x50] sm:$0xff] %v834_v58 }
 0x146   :  { %v483_v9 = vpop.f32.mrf.mxu2  ;;  %v603_v20 = vpop.f32.mrf.mxu3 }
 0x147   :  { %v604_v19 = vadd.f32 %v603_v20, %v479_v39  ;;  %v484_v54 = vadd.f32 %v483_v9, %v1535_v60 }
 0x149   :  { %v741_v27 = vadd.f32 %v740_v3, %v604_v19 }
 0x14a   :  { %v841_v0 = vpop.f32.mrf.mxu1 }
 0x14b   :  { %v838_v38 = vadd.f32 %v837_v22, %v741_v27 }
 0x14c   :  { %v748_v33 = vpop.f32.mrf.mxu0 }
 0x14d   :  { %867 = vst [vmem:[%s1652_s3 + $0x58] sm:$0xff] %v838_v38 }
 0x14e   :  { %v488_v17 = vpop.f32.mrf.mxu2  ;;  %v609_v36 = vpop.f32.mrf.mxu3 }
 0x14f   :  { %v610_v35 = vadd.f32 %v609_v36, %v484_v54  ;;  %v489_v37 = vadd.f32 %v488_v17, %v1547_v6 }
 0x151   :  { %v745_v40 = vadd.f32 %v744_v31, %v610_v35 }
 0x152   :  { %v845_v44 = vpop.f32.mrf.mxu1 }
 0x153   :  { %v842_v14 = vadd.f32 %v841_v0, %v745_v40 }
 0x154   :  { %v752_v50 = vpop.f32.mrf.mxu0 }
 0x155   :  { %868 = vst [vmem:[%s1652_s3 + $0x60] sm:$0xff] %v842_v14 }
 0x156   :  { %v615_v42 = vpop.f32.mrf.mxu3  ;;  %v493_v60 = vpop.f32.mrf.mxu2 }
 0x157   :  { %v616_v51 = vadd.f32 %v615_v42, %v489_v37  ;;  %v494_v63 = vadd.f32 %v493_v60, %v1559_v52 }
 0x159   :  { %v749_v41 = vadd.f32 %v748_v33, %v616_v51 }
 0x15a   :  { %v849_v57 = vpop.f32.mrf.mxu1 }
 0x15b   :  { %v846_v48 = vadd.f32 %v845_v44, %v749_v41 }
 0x15c   :  { %v756_v23 = vpop.f32.mrf.mxu0 }
 0x15d   :  { %869 = vst [vmem:[%s1652_s3 + $0x68] sm:$0xff] %v846_v48 }
 0x15e   :  { %v621_v61 = vpop.f32.mrf.mxu3  ;;  %v498_v16 = vpop.f32.mrf.mxu2 }
 0x15f   :  { %v622_v15 = vadd.f32 %v621_v61, %v494_v63  ;;  %v499_v56 = vadd.f32 %v498_v16, %v1569_v59 }
 0x161   :  { %v753_v6 = vadd.f32 %v752_v50, %v622_v15 }
 0x162   :  { %v853_v52 = vpop.f32.mrf.mxu1 }
 0x163   :  { %v850_v55 = vadd.f32 %v849_v57, %v753_v6 }
 0x165   :  { %870 = vst [vmem:[%s1652_s3 + $0x70] sm:$0xff] %v850_v55 }
 0x166   :  { %v627_v5 = vpop.f32.mrf.mxu3 }
 0x167   :  { %v628_v13 = vadd.f32 %v627_v5, %v499_v56 }
 0x169   :  { %v757_v30 = vadd.f32 %v756_v23, %v628_v13 }
 0x16b   :  { %v854_v47 = vadd.f32 %v853_v52, %v757_v30 }
 0x16d   :  { %871 = vst [vmem:[%s1652_s3 + $0x78] sm:$0xff] %v854_v47 }

// kernel: down_block.7
= control target key start
LH: loop header
LB: loop body
LE: loop exit
PB: predicated region body
PF: predicated region fallthrough
CT: control target
= control target key end

     0   :  { %s1737_s1 = inlined_call_operand.vmem [shape: f32[128,128], index: 1, kind: input, shape index: {}]   ;;  %s1738_s0 = inlined_call_operand.vmem [shape: f32[128,128], index: 0, kind: input, shape index: {}]   ;;  %s1739_s2 = inlined_call_operand.vmem [shape: f32[1,128], index: 2, kind: input, shape index: {}]   ;;  %s1740_s3 = inlined_call_operand.vmem [shape: f32[128,128], index: 3, kind: input, shape index: {}]   ;;  %s1741_s4 = inlined_call_operand.vmem [shape: f32[128,128], index: 4, kind: output, shape index: {}]  }
   0x1   :  { %v48_v0 = vld [vmem:[%s1737_s1 + $0x78] sm:$0xff]  ;;  %v47_v1 = vld [vmem:[%s1737_s1 + $0x70] sm:$0xff]  ;;  %v46_v2 = vld [vmem:[%s1737_s1 + $0x68] sm:$0xff] }
   0x2   :  { %v978_v3 = vand.u32 4294901760, %v48_v0  ;;  %v980_v4 = vand.u32 4294901760, %v47_v1  ;;  %v982_v5 = vand.u32 4294901760, %v46_v2  ;;  %v45_v6 = vld [vmem:[%s1737_s1 + $0x60] sm:$0xff]  ;;  %v44_v7 = vld [vmem:[%s1737_s1 + $0x58] sm:$0xff]  ;;  %v43_v8 = vld [vmem:[%s1737_s1 + $0x50] sm:$0xff] }
   0x3   :  { %v993_v9 = vand.u32 4294901760, %v45_v6  ;;  %v995_v10 = vand.u32 4294901760, %v44_v7  ;;  %v997_v11 = vand.u32 4294901760, %v43_v8  ;;  %v42_v12 = vld [vmem:[%s1737_s1 + $0x48] sm:$0xff]  ;;  %v41_v13 = vld [vmem:[%s1737_s1 + $0x40] sm:$0xff]  ;;  %v40_v17 = vld [vmem:[%s1737_s1 + $0x38] sm:$0xff] }
   0x4   :  { %911 = vmatpush.msra.mxu2 %v978_v3  ;;  %v1007_v14 = vsub.f32 %v48_v0, %v978_v3  ;;  %v1010_v15 = vsub.f32 %v47_v1, %v980_v4  ;;  %v1013_v16 = vsub.f32 %v46_v2, %v982_v5  ;;  %54 = vmatpush.msra.mxu0 %v978_v3  ;;  %v1019_v18 = vand.u32 4294901760, %v42_v12  ;;  %v39_v25 = vld [vmem:[%s1737_s1 + $0x30] sm:$0xff]  ;;  %v38_v33 = vld [vmem:[%s1737_s1 + $0x28] sm:$0xff]  ;;  %v37_v42 = vld [vmem:[%s1737_s1 + $0x20] sm:$0xff] }
   0x5   :  { %v1022_v19 = vsub.f32 %v45_v6, %v993_v9  ;;  %v1025_v20 = vsub.f32 %v44_v7, %v995_v10  ;;  %v1031_v24 = vand.u32 4294901760, %v41_v13  ;;  %v1038_v27 = vand.u32 4294901760, %v40_v17  ;;  %v25_v47 = vld [vmem:[%s1738_s0 + $0x40] sm:$0xff]  ;;  %v36_v49 = vld [vmem:[%s1737_s1 + $0x18] sm:$0xff]  ;;  %v35_v55 = vld [vmem:[%s1737_s1 + $0x10] sm:$0xff] }
   0x6   :  { %912 = vmatpush.msra.mxu2 %v980_v4  ;;  %v216_v21 = vand.u32 4294901760, %v1007_v14  ;;  %v222_v22 = vand.u32 4294901760, %v1010_v15  ;;  %v228_v23 = vand.u32 4294901760, %v1013_v16  ;;  %56 = vmatpush.msra.mxu0 %v980_v4  ;;  %v1041_v28 = vsub.f32 %v43_v8, %v997_v11  ;;  %v34_v62 = vld [vmem:[%s1737_s1 + $0x8] sm:$0xff]  ;;  %v33_v2 = vld [vmem:[%s1737_s1] sm:$0xff] }
   0x7   :  { %v234_v26 = vand.u32 4294901760, %v1022_v19  ;;  %v240_v32 = vand.u32 4294901760, %v1025_v20  ;;  %v1061_v35 = vand.u32 4294901760, %v39_v25  ;;  %v1064_v36 = vsub.f32 %v42_v12, %v1019_v18  ;;  %v17_v12 = vld [vmem:[%s1738_s0] sm:$0xff] }
   0x8   :  { %913 = vmatpush.msra.mxu2 %v982_v5  ;;  %v217_v29 = vsub.f32 %v1007_v14, %v216_v21  ;;  %v223_v30 = vsub.f32 %v1010_v15, %v222_v22  ;;  %v229_v31 = vsub.f32 %v1013_v16, %v228_v23  ;;  %58 = vmatpush.msra.mxu0 %v982_v5  ;;  %v246_v39 = vand.u32 4294901760, %v1041_v28 }
   0x9   :  { %v235_v34 = vsub.f32 %v1022_v19, %v234_v26  ;;  %v1070_v40 = vsub.f32 %v41_v13, %v1031_v24  ;;  %v1072_v41 = vand.u32 4294901760, %v38_v33  ;;  %v241_v44 = vsub.f32 %v1025_v20, %v240_v32 }
   0xa   :  { %914 = vmatpush.msra.mxu2 %v993_v9  ;;  %v218_v37 = vand.u32 4294901760, %v217_v29  ;;  %v224_v38 = vand.u32 4294901760, %v223_v30  ;;  %60 = vmatpush.msra.mxu0 %v993_v9  ;;  %v230_v43 = vand.u32 4294901760, %v229_v31  ;;  %v1752_v45 = vand.u32 4294901760, %v1064_v36  ;;  %v26_v30 = vld [vmem:[%s1738_s0 + $0x48] sm:$0xff] }
   0xb   :  { %v1083_v46 = vsub.f32 %v40_v17, %v1038_v27  ;;  %v1751_v48 = vand.u32 4294901760, %v1070_v40  ;;  %v236_v50 = vand.u32 4294901760, %v235_v34  ;;  %v247_v51 = vsub.f32 %v1041_v28, %v246_v39 }
   0xc   :  { %915 = vmatpush.msra.mxu2 %v995_v10  ;;  %927 = vmatpush.msra.mxu3 %v218_v37  ;;  %v1097_v52 = vand.u32 4294901760, %v37_v42  ;;  %v1100_v53 = vsub.f32 %v39_v25, %v1061_v35  ;;  %v1107_v56 = vand.u32 4294901760, %v25_v47  ;;  %v242_v57 = vand.u32 4294901760, %v241_v44 }
   0xd   :  { %219 = vmatpush.msra.mxu1 %v218_v37  ;;  %62 = vmatpush.msra.mxu0 %v995_v10  ;;  %v1746_v54 = vand.u32 4294901760, %v1083_v46  ;;  %v253_v58 = vsub.f32 %v1064_v36, %v1752_v45  ;;  %v1113_v59 = vand.u32 4294901760, %v36_v49  ;;  %v1116_v60 = vsub.f32 %v38_v33, %v1072_v41 }
   0xe   :  { %916 = vmatpush.msra.mxu2 %v997_v11  ;;  %928 = vmatpush.msra.mxu3 %v224_v38  ;;  %v259_v61 = vsub.f32 %v1070_v40, %v1751_v48  ;;  %v248_v63 = vand.u32 4294901760, %v247_v51  ;;  %v1126_v0 = vand.u32 4294901760, %v35_v55  ;;  %v1745_v1 = vand.u32 4294901760, %v1100_v53 }
   0xf   :  { %225 = vmatpush.msra.mxu1 %v224_v38  ;;  %64 = vmatpush.msra.mxu0 %v997_v11  ;;  %v1133_v6 = vsub.f32 %v37_v42, %v1097_v52  ;;  %v265_v7 = vsub.f32 %v1083_v46, %v1746_v54  ;;  %v1140_v8 = vsub.f32 %v25_v47, %v1107_v56  ;;  %v254_v13 = vand.u32 4294901760, %v253_v58 }
  0x10   :  { %917 = vmatpush.msra.mxu2 %v1019_v18  ;;  %929 = vmatpush.msra.mxu3 %v230_v43  ;;  %v1146_v17 = vand.u32 4294901760, %v34_v62  ;;  %v1744_v25 = vand.u32 4294901760, %v1116_v60  ;;  %v1150_v29 = vsub.f32 %v36_v49, %v1113_v59  ;;  %v260_v31 = vand.u32 4294901760, %v259_v61 }
  0x11   :  { %231 = vmatpush.msra.mxu1 %v230_v43  ;;  %66 = vmatpush.msra.mxu0 %v1019_v18  ;;  %v1155_v33 = vand.u32 4294901760, %v33_v2  ;;  %v271_v34 = vsub.f32 %v1100_v53, %v1745_v1  ;;  %v1742_v37 = vand.u32 4294901760, %v1133_v6  ;;  %v1164_v38 = vsub.f32 %v35_v55, %v1126_v0 }
  0x12   :  { %918 = vmatpush.msra.mxu2 %v1031_v24  ;;  %930 = vmatpush.msra.mxu3 %v236_v50  ;;  %v1166_v42 = vand.u32 4294901760, %v17_v12  ;;  %v266_v43 = vand.u32 4294901760, %v265_v7  ;;  %v1743_v44 = vand.u32 4294901760, %v1140_v8  ;;  %v1170_v47 = vand.u32 4294901760, %v26_v30 }
  0x13   :  { %237 = vmatpush.msra.mxu1 %v236_v50  ;;  %68 = vmatpush.msra.mxu0 %v1031_v24  ;;  %v277_v49 = vsub.f32 %v1116_v60, %v1744_v25  ;;  %v1747_v50 = vand.u32 4294901760, %v1150_v29  ;;  %v1178_v51 = vsub.f32 %v34_v62, %v1146_v17  ;;  %v272_v58 = vand.u32 4294901760, %v271_v34  ;;  %v27_v34 = vld [vmem:[%s1738_s0 + $0x50] sm:$0xff] }
  0x14   :  { %919 = vmatpush.msra.mxu2 %v1038_v27  ;;  %931 = vmatpush.msra.mxu3 %v242_v57  ;;  %v1181_v55 = vsub.f32 %v17_v12, %v1166_v42  ;;  %v283_v61 = vsub.f32 %v1133_v6, %v1742_v37  ;;  %v1748_v62 = vand.u32 4294901760, %v1164_v38  ;;  %v152_v7 = vsub.f32 %v1140_v8, %v1743_v44 }
  0x15   :  { %243 = vmatpush.msra.mxu1 %v242_v57  ;;  %70 = vmatpush.msra.mxu0 %v1038_v27  ;;  %v18_v57 = vld [vmem:[%s1738_s0 + $0x8] sm:$0xff]  ;;  %v1200_v12 = vsub.f32 %v26_v30, %v1170_v47  ;;  %v1750_v44 = vand.u32 4294901760, %v1178_v51 }
  0x16   :  { %920 = vmatpush.msra.mxu2 %v1061_v35  ;;  %932 = vmatpush.msra.mxu3 %v248_v63  ;;  %v1206_v37 = vand.u32 4294901760, %v18_v57  ;;  %v284_v30 = vand.u32 4294901760, %v283_v61  ;;  %v295_v25 = vsub.f32 %v1164_v38, %v1748_v62  ;;  %v153_v54 = vand.u32 4294901760, %v152_v7 }
  0x17   :  { %249 = vmatpush.msra.mxu1 %v248_v63  ;;  %72 = vmatpush.msra.mxu0 %v1061_v35  ;;  %v1193_v63 = vsub.f32 %v33_v2, %v1155_v33  ;;  %v278_v2 = vand.u32 4294901760, %v277_v49  ;;  %v1219_v49 = vand.u32 4294901760, %v27_v34  ;;  %v301_v7 = vsub.f32 %v1178_v51, %v1750_v44 }
  0x18   :  { %921 = vmatpush.msra.mxu2 %v1072_v41  ;;  %933 = vmatpush.msra.mxu3 %v254_v13  ;;  %v1227_v61 = vsub.f32 %v18_v57, %v1206_v37  ;;  %v296_v57 = vand.u32 4294901760, %v295_v25  ;;  %v28_v25 = vld [vmem:[%s1738_s0 + $0x58] sm:$0xff] }
  0x19   :  { %255 = vmatpush.msra.mxu1 %v254_v13  ;;  %74 = vmatpush.msra.mxu0 %v1072_v41  ;;  %v1749_v13 = vand.u32 4294901760, %v1181_v55  ;;  %v1753_v1 = vand.u32 4294901760, %v1193_v63 }
  0x1a   :  { %922 = vmatpush.msra.mxu2 %v1097_v52  ;;  %934 = vmatpush.msra.mxu3 %v260_v31  ;;  %v95_v48 = vand.u32 4294901760, %v1227_v61 }
  0x1b   :  { %261 = vmatpush.msra.mxu1 %v260_v31  ;;  %76 = vmatpush.msra.mxu0 %v1097_v52  ;;  %v289_v31 = vsub.f32 %v1150_v29, %v1747_v50  ;;  %v1754_v50 = vand.u32 4294901760, %v1200_v12 }
  0x1c   :  { %923 = vmatpush.msra.mxu2 %v1113_v59  ;;  %935 = vmatpush.msra.mxu3 %v266_v43 }
  0x1d   :  { %267 = vmatpush.msra.mxu1 %v266_v43  ;;  %78 = vmatpush.msra.mxu0 %v1113_v59  ;;  %v88_v43 = vsub.f32 %v1181_v55, %v1749_v13  ;;  %v290_v62 = vand.u32 4294901760, %v289_v31  ;;  %v307_v13 = vsub.f32 %v1193_v63, %v1753_v1  ;;  %v1242_v31 = vsub.f32 %v27_v34, %v1219_v49 }
  0x1e   :  { %924 = vmatpush.msra.mxu2 %v1126_v0  ;;  %936 = vmatpush.msra.mxu3 %v272_v58  ;;  %v160_v44 = vsub.f32 %v1200_v12, %v1754_v50  ;;  %v302_v1 = vand.u32 4294901760, %v301_v7  ;;  %v1256_v34 = vand.u32 4294901760, %v28_v25  ;;  %v96_v7 = vsub.f32 %v1227_v61, %v95_v48 }
  0x1f   :  { %273 = vmatpush.msra.mxu1 %v272_v58  ;;  %80 = vmatpush.msra.mxu0 %v1126_v0  ;;  %v19_v58 = vld [vmem:[%s1738_s0 + $0x10] sm:$0xff] }
  0x20   :  { %925 = vmatpush.msra.mxu2 %v1146_v17  ;;  %937 = vmatpush.msra.mxu3 %v278_v2  ;;  %v1251_v45 = vand.u32 4294901760, %v19_v58 }
  0x21   :  { %279 = vmatpush.msra.mxu1 %v278_v2  ;;  %82 = vmatpush.msra.mxu0 %v1146_v17  ;;  %v89_v2 = vand.u32 4294901760, %v88_v43  ;;  %v167_v43 = vand.u32 4294901760, %v1242_v31 }
  0x22   :  { %926 = vmatpush.msra.mxu2 %v1155_v33  ;;  %938 = vmatpush.msra.mxu3 %v284_v30  ;;  %v1263_v50 = vsub.f32 %v19_v58, %v1251_v45  ;;  %v97_v58 = vand.u32 4294901760, %v96_v7 }
  0x23   :  { %154 = vmatmul.f32.vlgmr.msra.gmra.mxu2 %v153_v54  ;;  %285 = vmatpush.msra.mxu1 %v284_v30  ;;  %v308_v54 = vand.u32 4294901760, %v307_v13  ;;  %v161_v30 = vand.u32 4294901760, %v160_v44  ;;  %v1273_v44 = vsub.f32 %v28_v25, %v1256_v34  ;;  %v168_v13 = vsub.f32 %v1242_v31, %v167_v43 }
  0x24   :  { %939 = vmatpush.msra.mxu3 %v290_v62  ;;  %377 = vmatpush.msrb.mxu2 %v1007_v14  ;;  %v29_v14 = vld [vmem:[%s1738_s0 + $0x60] sm:$0xff] }
  0x25   :  { %291 = vmatpush.msra.mxu1 %v290_v62  ;;  %84 = vmatpush.msra.mxu0 %v1155_v33  ;;  %v20_v62 = vld [vmem:[%s1738_s0 + $0x18] sm:$0xff]  ;;  %v175_v25 = vand.u32 4294901760, %v1273_v44 }
  0x26   :  { %940 = vmatpush.msra.mxu3 %v296_v57  ;;  %380 = vmatpush.msrb.mxu2 %v1010_v15 }
  0x27   :  { %297 = vmatpush.msra.mxu1 %v296_v57  ;;  %90 = vmatmul.f32.vlgmr.msra.gmra.mxu0 %v89_v2  ;;  %v103_v57 = vand.u32 4294901760, %v1263_v50  ;;  %v169_v2 = vand.u32 4294901760, %v168_v13 }
  0x28   :  { %941 = vmatpush.msra.mxu3 %v302_v1  ;;  %383 = vmatpush.msrb.mxu2 %v1013_v16 }
  0x29   :  { %303 = vmatpush.msra.mxu1 %v302_v1  ;;  %636 = vmatpush.msrb.mxu0 %v216_v21  ;;  %v1283_v21 = vand.u32 4294901760, %v20_v62  ;;  %v1291_v1 = vand.u32 4294901760, %v29_v14 }
  0x2a   :  { %942 = vmatpush.msra.mxu3 %v308_v54  ;;  %386 = vmatpush.msrb.mxu2 %v1022_v19 }
  0x2b   :  { %162 = vmatmul.f32.gmra.mxu2 %v161_v30  ;;  %343 = vmatmul.f32.vlgmr.msra.gmra.mxu3 %v1107_v56  ;;  %v1299_v30 = vsub.f32 %v20_v62, %v1283_v21  ;;  %v1312_v15 = vsub.f32 %v29_v14, %v1291_v1  ;;  %v31_v14 = vld [vmem:[%s1738_s0 + $0x70] sm:$0xff] }
  0x2c   :  { %505 = vmatpush.msrb.mxu3 %v978_v3  ;;  %309 = vmatpush.msra.mxu1 %v308_v54  ;;  %v104_v54 = vsub.f32 %v1263_v50, %v103_v57 }
  0x2d   :  { %311 = vmatmul.f32.vlgmr.msra.gmra.mxu1 %v1166_v42  ;;  %640 = vmatpush.msrb.mxu0 %v222_v22  ;;  %v111_v16 = vand.u32 4294901760, %v1299_v30  ;;  %v183_v7 = vand.u32 4294901760, %v1312_v15 }
  0x2e   :  { %507 = vmatpush.msrb.mxu3 %v980_v4  ;;  %763 = vmatpush.msrb.mxu1 %v978_v3  ;;  %v21_v3 = vld [vmem:[%s1738_s0 + $0x20] sm:$0xff]  ;;  %v105_v22 = vand.u32 4294901760, %v104_v54 }
  0x2f   :  { %389 = vmatpush.msrb.mxu2 %v1025_v20  ;;  %98 = vmatmul.f32.gmra.mxu0 %v97_v58  ;;  %v112_v19 = vsub.f32 %v1299_v30, %v111_v16  ;;  %v184_v58 = vsub.f32 %v1312_v15, %v183_v7 }
  0x30   :  { %509 = vmatpush.msrb.mxu3 %v982_v5  ;;  %765 = vmatpush.msrb.mxu1 %v980_v4  ;;  %v176_v4 = vsub.f32 %v1273_v44, %v175_v25 }
  0x31   :  { %644 = vmatpush.msrb.mxu0 %v228_v23  ;;  %392 = vmatpush.msrb.mxu2 %v1041_v28  ;;  %v1319_v23 = vand.u32 4294901760, %v21_v3  ;;  %v113_v20 = vand.u32 4294901760, %v112_v19  ;;  %v1755_v28 = vand.u32 4294901760, %v1064_v36  ;;  %v185_v54 = vand.u32 4294901760, %v184_v58 }
  0x32   :  { %511 = vmatpush.msrb.mxu3 %v993_v9  ;;  %767 = vmatpush.msrb.mxu1 %v982_v5  ;;  %v30_v5 = vld [vmem:[%s1738_s0 + $0x68] sm:$0xff]  ;;  %v177_v62 = vand.u32 4294901760, %v176_v4 }
  0x33   :  { %170 = vmatmul.f32.gmra.mxu2 %v169_v2  ;;  %347 = vmatmul.f32.gmra.mxu3 %v1170_v47  ;;  %v1339_v13 = vsub.f32 %v21_v3, %v1319_v23 }
  0x34   :  { %513 = vmatpush.msrb.mxu3 %v995_v10  ;;  %648 = vmatpush.msrb.mxu0 %v234_v26  ;;  %v1336_v26 = vand.u32 4294901760, %v30_v5 }
  0x35   :  { %315 = vmatmul.f32.gmra.mxu1 %v1206_v37  ;;  %395 = vmatpush.msrb.mxu2 %v1064_v36  ;;  %v1756_v36 = vand.u32 4294901760, %v1070_v40 }
  0x36   :  { %515 = vmatpush.msrb.mxu3 %v997_v11  ;;  %769 = vmatpush.msrb.mxu1 %v993_v9  ;;  %v22_v9 = vld [vmem:[%s1738_s0 + $0x28] sm:$0xff] }
  0x37   :  { %106 = vmatmul.f32.gmra.mxu0 %v105_v22  ;;  %398 = vmatpush.msrb.mxu2 %v1070_v40  ;;  %v1363_v2 = vand.u32 4294901760, %v22_v9 }
  0x38   :  { %517 = vmatpush.msrb.mxu3 %v1019_v18  ;;  %652 = vmatpush.msrb.mxu0 %v240_v32  ;;  %v1357_v32 = vsub.f32 %v30_v5, %v1336_v26  ;;  %v1757_v5 = vand.u32 4294901760, %v1083_v46 }
  0x39   :  { %771 = vmatpush.msrb.mxu1 %v995_v10  ;;  %401 = vmatpush.msrb.mxu2 %v1083_v46  ;;  %v119_v10 = vand.u32 4294901760, %v1339_v13  ;;  %v1380_v4 = vsub.f32 %v22_v9, %v1363_v2  ;;  %v32_v46 = vld [vmem:[%s1738_s0 + $0x78] sm:$0xff]  ;;  %v1758_v9 = vand.u32 4294901760, %v1100_v53 }
  0x3a   :  { %519 = vmatpush.msrb.mxu3 %v1031_v24  ;;  %656 = vmatpush.msrb.mxu0 %v246_v39  ;;  %v1372_v39 = vand.u32 4294901760, %v31_v14  ;;  %v191_v3 = vand.u32 4294901760, %v1357_v32 }
  0x3b   :  { %178 = vmatmul.f32.gmra.mxu2 %v177_v62  ;;  %351 = vmatmul.f32.gmra.mxu3 %v1219_v49 }
  0x3c   :  { %773 = vmatpush.msrb.mxu1 %v997_v11  ;;  %521 = vmatpush.msrb.mxu3 %v1038_v27  ;;  %v120_v11 = vsub.f32 %v1339_v13, %v119_v10  ;;  %v1391_v22 = vsub.f32 %v31_v14, %v1372_v39  ;;  %v192_v40 = vsub.f32 %v1357_v32, %v191_v3  ;;  %v1417_v14 = vand.u32 4294901760, %v32_v46 }
  0x3d   :  { %319 = vmatmul.f32.gmra.mxu1 %v1251_v45  ;;  %660 = vmatpush.msrb.mxu0 %v1755_v28 }
  0x3e   :  { %404 = vmatpush.msrb.mxu2 %v1100_v53  ;;  %775 = vmatpush.msrb.mxu1 %v1019_v18  ;;  %v23_v18 = vld [vmem:[%s1738_s0 + $0x30] sm:$0xff]  ;;  %v121_v62 = vand.u32 4294901760, %v120_v11  ;;  %v199_v58 = vand.u32 4294901760, %v1391_v22  ;;  %v1759_v53 = vand.u32 4294901760, %v1116_v60  ;;  %v1760_v11 = vand.u32 4294901760, %v1133_v6 }
  0x3f   :  { %114 = vmatmul.f32.gmra.mxu0 %v113_v20  ;;  %523 = vmatpush.msrb.mxu3 %v1061_v35  ;;  %v1401_v19 = vand.u32 4294901760, %v23_v18  ;;  %v193_v20 = vand.u32 4294901760, %v192_v40 }
  0x40   :  { %664 = vmatpush.msrb.mxu0 %v1756_v36  ;;  %407 = vmatpush.msrb.mxu2 %v1116_v60  ;;  %v1439_v36 = vsub.f32 %v32_v46, %v1417_v14  ;;  %v1762_v46 = vand.u32 4294901760, %v1164_v38 }
  0x41   :  { %777 = vmatpush.msrb.mxu1 %v1031_v24  ;;  %525 = vmatpush.msrb.mxu3 %v1072_v41  ;;  %v127_v24 = vand.u32 4294901760, %v1380_v4  ;;  %v1421_v28 = vsub.f32 %v23_v18, %v1401_v19 }
  0x42   :  { %668 = vmatpush.msrb.mxu0 %v1757_v5  ;;  %410 = vmatpush.msrb.mxu2 %v1133_v6  ;;  %v1761_v6 = vand.u32 4294901760, %v1150_v29  ;;  %v207_v40 = vand.u32 4294901760, %v1439_v36 }
  0x43   :  { %186 = vmatmul.f32.gmra.mxu2 %v185_v54  ;;  %355 = vmatmul.f32.gmra.mxu3 %v1256_v34  ;;  %v200_v54 = vsub.f32 %v1391_v22, %v199_v58 }
  0x44   :  { %779 = vmatpush.msrb.mxu1 %v1038_v27  ;;  %527 = vmatpush.msrb.mxu3 %v1097_v52  ;;  %v128_v27 = vsub.f32 %v1380_v4, %v127_v24 }
  0x45   :  { %323 = vmatmul.f32.gmra.mxu1 %v1283_v21  ;;  %672 = vmatpush.msrb.mxu0 %v1758_v9  ;;  %v201_v5 = vand.u32 4294901760, %v200_v54 }
  0x46   :  { %413 = vmatpush.msrb.mxu2 %v1150_v29  ;;  %781 = vmatpush.msrb.mxu1 %v1061_v35  ;;  %v24_v35 = vld [vmem:[%s1738_s0 + $0x38] sm:$0xff]  ;;  %v129_v60 = vand.u32 4294901760, %v128_v27  ;;  %v1763_v29 = vand.u32 4294901760, %v1178_v51  ;;  %v1764_v27 = vand.u32 4294901760, %v1193_v63 }
  0x47   :  { %122 = vmatmul.f32.gmra.mxu0 %v121_v62  ;;  %529 = vmatpush.msrb.mxu3 %v1113_v59  ;;  %v1442_v18 = vand.u32 4294901760, %v24_v35 }
  0x48   :  { %676 = vmatpush.msrb.mxu0 %v1759_v53  ;;  %416 = vmatpush.msrb.mxu2 %v1164_v38 }
  0x49   :  { %783 = vmatpush.msrb.mxu1 %v1072_v41  ;;  %531 = vmatpush.msrb.mxu3 %v1126_v0  ;;  %v135_v41 = vand.u32 4294901760, %v1421_v28 }
  0x4a   :  { %680 = vmatpush.msrb.mxu0 %v1760_v11  ;;  %419 = vmatpush.msrb.mxu2 %v1178_v51  ;;  %v1766_v51 = vand.u32 4294901760, %v1140_v8 }
  0x4b   :  { %194 = vmatmul.f32.gmra.mxu2 %v193_v20  ;;  %359 = vmatmul.f32.gmra.mxu3 %v1291_v1  ;;  %v136_v62 = vsub.f32 %v1421_v28, %v135_v41 }
  0x4c   :  { %785 = vmatpush.msrb.mxu1 %v1097_v52  ;;  %422 = vmatpush.msrb.mxu2 %v1193_v63  ;;  %v142_v52 = vsub.f32 %v24_v35, %v1442_v18 }
  0x4d   :  { %327 = vmatmul.f32.gmra.mxu1 %v1319_v23  ;;  %533 = vmatpush.msrb.mxu3 %v1146_v17  ;;  %v137_v9 = vand.u32 4294901760, %v136_v62 }
  0x4e   :  { %684 = vmatpush.msrb.mxu0 %v1761_v6  ;;  %787 = vmatpush.msrb.mxu1 %v1113_v59  ;;  %v208_v59 = vsub.f32 %v1439_v36, %v207_v40  ;;  %v143_v20 = vand.u32 4294901760, %v142_v52 }
  0x4f   :  { %130 = vmatmul.f32.gmra.mxu0 %v129_v60  ;;  %535 = vmatpush.msrb.mxu3 %v1155_v33 }
  0x50   :  { %688 = vmatpush.msrb.mxu0 %v1762_v46  ;;  %789 = vmatpush.msrb.mxu1 %v1126_v0  ;;  %v209_v0 = vand.u32 4294901760, %v208_v59  ;;  %v144_v38 = vsub.f32 %v142_v52, %v143_v20 }
  0x52   :  { %692 = vmatpush.msrb.mxu0 %v1763_v29  ;;  %791 = vmatpush.msrb.mxu1 %v1146_v17  ;;  %v145_v17 = vand.u32 4294901760, %v144_v38 }
  0x53   :  { %202 = vmatmul.f32.gmra.mxu2 %v201_v5  ;;  %363 = vmatmul.f32.gmra.mxu3 %v1336_v26 }
  0x54   :  { %696 = vmatpush.msrb.mxu0 %v1764_v27  ;;  %793 = vmatpush.msrb.mxu1 %v1155_v33  ;;  %v1765_v33 = vand.u32 4294901760, %v1181_v55 }
  0x55   :  { %331 = vmatmul.f32.gmra.mxu1 %v1363_v2 }
  0x57   :  { %138 = vmatmul.f32.gmra.mxu0 %v137_v9 }
  0x5b   :  { %210 = vmatmul.f32.gmra.mxu2 %v209_v0  ;;  %367 = vmatmul.f32.gmra.mxu3 %v1372_v39 }
  0x5d   :  { %335 = vmatmul.f32.gmra.mxu1 %v1401_v19 }
  0x5f   :  { %146 = vmatmul.f32.gmra.mxu0 %v145_v17 }
  0x63   :  { %371 = vmatmul.f32.gmra.mxu3 %v1417_v14  ;;  %425 = vmatmul.f32.vlgmr.msrb.gmra.mxu2 %v1181_v55 }
  0x65   :  { %339 = vmatmul.f32.gmra.mxu1 %v1442_v18 }
  0x67   :  { %698 = vmatmul.f32.vlgmr.msrb.gmra.mxu0 %v1166_v42 }
  0x6b   :  { %430 = vmatmul.f32.gmra.mxu2 %v1227_v61  ;;  %539 = vmatmul.f32.vlgmr.msrb.gmra.mxu3 %v1765_v33 }
  0x6d   :  { %795 = vmatmul.f32.vlgmr.msrb.gmra.mxu1 %v1166_v42 }
  0x6f   :  { %702 = vmatmul.f32.gmra.mxu0 %v1206_v37 }
  0x73   :  { %435 = vmatmul.f32.gmra.mxu2 %v1263_v50  ;;  %545 = vmatmul.f32.gmra.mxu3 %v95_v48 }
  0x75   :  { %799 = vmatmul.f32.gmra.mxu1 %v1206_v37 }
  0x77   :  { %706 = vmatmul.f32.gmra.mxu0 %v1251_v45 }
  0x7b   :  { %440 = vmatmul.f32.gmra.mxu2 %v1299_v30  ;;  %551 = vmatmul.f32.gmra.mxu3 %v103_v57 }
  0x7d   :  { %803 = vmatmul.f32.gmra.mxu1 %v1251_v45  ;;  %v1511_v45 = vld [vmem:[%s1739_s2] ss:$0 sm:$0xff] }
  0x7f   :  { %710 = vmatmul.f32.gmra.mxu0 %v1283_v21 }
  0x83   :  { %445 = vmatmul.f32.gmra.mxu2 %v1339_v13  ;;  %557 = vmatmul.f32.gmra.mxu3 %v111_v16  ;;  %v1767_v16 = vand.u32 4294901760, %v1200_v12 }
  0x85   :  { %807 = vmatmul.f32.gmra.mxu1 %v1283_v21 }
  0x87   :  { %714 = vmatmul.f32.gmra.mxu0 %v1319_v23 }
  0x8b   :  { %450 = vmatmul.f32.gmra.mxu2 %v1380_v4  ;;  %563 = vmatmul.f32.gmra.mxu3 %v119_v10 }
  0x8d   :  { %811 = vmatmul.f32.gmra.mxu1 %v1319_v23 }
  0x8f   :  { %718 = vmatmul.f32.gmra.mxu0 %v1363_v2 }
  0x93   :  { %455 = vmatmul.f32.gmra.mxu2 %v1421_v28  ;;  %569 = vmatmul.f32.gmra.mxu3 %v127_v24 }
  0x95   :  { %815 = vmatmul.f32.gmra.mxu1 %v1363_v2 }
  0x97   :  { %722 = vmatmul.f32.gmra.mxu0 %v1401_v19 }
  0x9b   :  { %460 = vmatmul.f32.gmra.mxu2 %v142_v52  ;;  %575 = vmatmul.f32.gmra.mxu3 %v135_v41 }
  0x9d   :  { %819 = vmatmul.f32.gmra.mxu1 %v1401_v19 }
  0x9f   :  { %726 = vmatmul.f32.gmra.mxu0 %v1442_v18 }
  0xa3   :  { %465 = vmatmul.f32.gmra.mxu2 %v1140_v8  ;;  %581 = vmatmul.f32.gmra.mxu3 %v143_v20 }
  0xa4   :  { %v1513_v48 = vpop.f32.mrf.mxu0 }
  0xa5   :  { %823 = vmatmul.f32.gmra.mxu1 %v1442_v18 }
  0xa6   :  { %v155_v37 = vpop.f32.mrf.mxu2 }
  0xa7   :  { %v156_v42 = vadd.f32 %v1511_v45, %v155_v37  ;;  %730 = vmatmul.f32.gmra.mxu0 %v1107_v56 }
  0xaa   :  { %v1518_v50 = vpop.f32.mrf.mxu1 }
  0xab   :  { %470 = vmatmul.f32.gmra.mxu2 %v1200_v12  ;;  %587 = vmatmul.f32.gmra.mxu3 %v1766_v51 }
  0xac   :  { %v1523_v55 = vpop.f32.mrf.mxu0 }
  0xad   :  { %827 = vmatmul.f32.gmra.mxu1 %v1107_v56 }
  0xae   :  { %v163_v63 = vpop.f32.mrf.mxu2  ;;  %v344_v61 = vpop.f32.mrf.mxu3 }
  0xaf   :  { %v164_v57 = vadd.f32 %v1511_v45, %v163_v63  ;;  %v1527_v21 = vadd.f32 %v344_v61, %v156_v42  ;;  %734 = vmatmul.f32.gmra.mxu0 %v1170_v47 }
  0xb2   :  { %v1530_v30 = vpop.f32.mrf.mxu1 }
  0xb3   :  { %475 = vmatmul.f32.gmra.mxu2 %v1242_v31  ;;  %593 = vmatmul.f32.gmra.mxu3 %v1767_v16 }
  0xb4   :  { %v1535_v8 = vpop.f32.mrf.mxu0 }
  0xb5   :  { %831 = vmatmul.f32.gmra.mxu1 %v1170_v47  ;;  %v108_v16 = vadd.f32 %v1511_v45, %v1535_v8 }
  0xb6   :  { %v171_v56 = vpop.f32.mrf.mxu2  ;;  %v348_v23 = vpop.f32.mrf.mxu3 }
  0xb7   :  { %v172_v13 = vadd.f32 %v1511_v45, %v171_v56  ;;  %v1539_v10 = vadd.f32 %v348_v23, %v164_v57  ;;  %738 = vmatmul.f32.gmra.mxu0 %v1219_v49  ;;  %v860_v23 = vld [vmem:[%s1740_s3 + $0x8] sm:$0xff] }
  0xba   :  { %v1542_v2 = vpop.f32.mrf.mxu1 }
  0xbb   :  { %480 = vmatmul.f32.gmra.mxu2 %v1273_v44  ;;  %599 = vmatmul.f32.gmra.mxu3 %v167_v43 }
  0xbc   :  { %v1547_v12 = vpop.f32.mrf.mxu0 }
  0xbd   :  { %835 = vmatmul.f32.gmra.mxu1 %v1219_v49  ;;  %v116_v8 = vadd.f32 %v1511_v45, %v1547_v12 }
  0xbe   :  { %v179_v47 = vpop.f32.mrf.mxu2  ;;  %v352_v4 = vpop.f32.mrf.mxu3 }
  0xbf   :  { %v180_v24 = vadd.f32 %v1511_v45, %v179_v47  ;;  %v1551_v19 = vadd.f32 %v352_v4, %v172_v13  ;;  %742 = vmatmul.f32.gmra.mxu0 %v1256_v34  ;;  %v321_v13 = vadd.f32 %v1542_v2, %v108_v16 }
  0xc2   :  { %v1554_v28 = vpop.f32.mrf.mxu1 }
  0xc3   :  { %485 = vmatmul.f32.gmra.mxu2 %v1312_v15  ;;  %605 = vmatmul.f32.gmra.mxu3 %v175_v25 }
  0xc4   :  { %v1559_v31 = vpop.f32.mrf.mxu0 }
  0xc5   :  { %839 = vmatmul.f32.gmra.mxu1 %v1256_v34  ;;  %v124_v12 = vadd.f32 %v1511_v45, %v1559_v31 }
  0xc6   :  { %v187_v49 = vpop.f32.mrf.mxu2  ;;  %v356_v43 = vpop.f32.mrf.mxu3 }
  0xc7   :  { %v188_v53 = vadd.f32 %v1511_v45, %v187_v49  ;;  %v1563_v35 = vadd.f32 %v356_v43, %v180_v24  ;;  %746 = vmatmul.f32.gmra.mxu0 %v1291_v1 }
  0xca   :  { %v1566_v54 = vpop.f32.mrf.mxu1 }
  0xcb   :  { %490 = vmatmul.f32.gmra.mxu2 %v1357_v32  ;;  %611 = vmatmul.f32.gmra.mxu3 %v183_v7 }
  0xcc   :  { %v1571_v44 = vpop.f32.mrf.mxu0 }
  0xcd   :  { %843 = vmatmul.f32.gmra.mxu1 %v1291_v1  ;;  %v132_v31 = vadd.f32 %v1511_v45, %v1571_v44 }
  0xce   :  { %v195_v34 = vpop.f32.mrf.mxu2  ;;  %v360_v25 = vpop.f32.mrf.mxu3 }
  0xcf   :  { %v196_v11 = vadd.f32 %v1511_v45, %v195_v34  ;;  %v1575_v60 = vadd.f32 %v360_v25, %v188_v53  ;;  %750 = vmatmul.f32.gmra.mxu0 %v1336_v26 }
  0xd2   :  { %v1578_v41 = vpop.f32.mrf.mxu1 }
  0xd3   :  { %495 = vmatmul.f32.gmra.mxu2 %v1391_v22  ;;  %617 = vmatmul.f32.gmra.mxu3 %v191_v3 }
  0xd4   :  { %v1583_v15 = vpop.f32.mrf.mxu0 }
  0xd5   :  { %847 = vmatmul.f32.gmra.mxu1 %v1336_v26  ;;  %v140_v44 = vadd.f32 %v1511_v45, %v1583_v15 }
  0xd6   :  { %v203_v1 = vpop.f32.mrf.mxu2  ;;  %v364_v7 = vpop.f32.mrf.mxu3 }
  0xd7   :  { %v204_v18 = vadd.f32 %v1511_v45, %v203_v1  ;;  %v1587_v6 = vadd.f32 %v364_v7, %v196_v11  ;;  %754 = vmatmul.f32.gmra.mxu0 %v1372_v39  ;;  %v861_v11 = vld [vmem:[%s1740_s3 + $0x10] sm:$0xff]  ;;  %v325_v1 = vadd.f32 %v1554_v28, %v116_v8 }
  0xda   :  { %v1590_v5 = vpop.f32.mrf.mxu1 }
  0xdb   :  { %500 = vmatmul.f32.gmra.mxu2 %v1439_v36  ;;  %623 = vmatmul.f32.gmra.mxu3 %v199_v58  ;;  %v100_v36 = vadd.f32 %v1511_v45, %v1523_v55 }
  0xdc   :  { %v1595_v32 = vpop.f32.mrf.mxu0 }
  0xdd   :  { %851 = vmatmul.f32.gmra.mxu1 %v1372_v39  ;;  %v92_v39 = vadd.f32 %v1511_v45, %v1513_v48  ;;  %v317_v48 = vadd.f32 %v1530_v30, %v100_v36  ;;  %v148_v15 = vadd.f32 %v1511_v45, %v1595_v32 }
  0xde   :  { %v211_v26 = vpop.f32.mrf.mxu2  ;;  %v368_v3 = vpop.f32.mrf.mxu3 }
  0xdf   :  { %v212_v62 = vadd.f32 %v1511_v45, %v211_v26  ;;  %v1599_v52 = vadd.f32 %v368_v3, %v204_v18  ;;  %758 = vmatmul.f32.gmra.mxu0 %v1417_v14  ;;  %v313_v20 = vadd.f32 %v1518_v50, %v92_v39  ;;  %v862_v39 = vld [vmem:[%s1740_s3 + $0x18] sm:$0xff] }
  0xe2   :  { %v1602_v46 = vpop.f32.mrf.mxu1 }
  0xe3   :  { %629 = vmatmul.f32.gmra.mxu3 %v207_v40  ;;  %v341_v8 = vadd.f32 %v1602_v46, %v148_v15 }
  0xe4   :  { %v699_v29 = vpop.f32.mrf.mxu0 }
  0xe5   :  { %855 = vmatmul.f32.gmra.mxu1 %v1417_v14  ;;  %v859_v14 = vld [vmem:[%s1740_s3] sm:$0xff] }
  0xe6   :  { %v372_v22 = vpop.f32.mrf.mxu3  ;;  %v426_v58 = vpop.f32.mrf.mxu2 }
  0xe7   :  { %v1609_v59 = vadd.f32 %v372_v22, %v212_v62  ;;  %v427_v0 = vadd.f32 %v426_v58, %v313_v20 }
  0xea   :  { %v796_v9 = vpop.f32.mrf.mxu1 }
  0xec   :  { %v703_v27 = vpop.f32.mrf.mxu0 }
  0xee   :  { %v431_v38 = vpop.f32.mrf.mxu2  ;;  %v540_v17 = vpop.f32.mrf.mxu3 }
  0xef   :  { %v541_v40 = vadd.f32 %v540_v17, %v427_v0  ;;  %v432_v63 = vadd.f32 %v431_v38, %v317_v48 }
  0xf1   :  { %v700_v33 = vadd.f32 %v699_v29, %v541_v40 }
  0xf2   :  { %v800_v37 = vpop.f32.mrf.mxu1 }
  0xf3   :  { %v797_v42 = vadd.f32 %v796_v9, %v700_v33  ;;  %v329_v9 = vadd.f32 %v1566_v54, %v124_v12 }
  0xf4   :  { %v707_v51 = vpop.f32.mrf.mxu0 }
  0xf5   :  { %v875_v50 = vadd.f32 %v859_v14, %v797_v42  ;;  %v863_v14 = vld [vmem:[%s1740_s3 + $0x20] sm:$0xff] }
  0xf6   :  { %v436_v61 = vpop.f32.mrf.mxu2  ;;  %v546_v57 = vpop.f32.mrf.mxu3 }
  0xf7   :  { %891 = vst [vmem:[%s1741_s4] sm:$0xff] %v875_v50  ;;  %v547_v55 = vadd.f32 %v546_v57, %v432_v63  ;;  %v437_v24 = vadd.f32 %v436_v61, %v321_v13 }
  0xf9   :  { %v704_v56 = vadd.f32 %v703_v27, %v547_v55  ;;  %v864_v55 = vld [vmem:[%s1740_s3 + $0x28] sm:$0xff] }
  0xfa   :  { %v804_v30 = vpop.f32.mrf.mxu1 }
  0xfb   :  { %v801_v47 = vadd.f32 %v800_v37, %v704_v56  ;;  %v333_v37 = vadd.f32 %v1578_v41, %v132_v31  ;;  %v337_v56 = vadd.f32 %v1590_v5, %v140_v44 }
  0xfc   :  { %v711_v4 = vpop.f32.mrf.mxu0 }
  0xfd   :  { %v876_v49 = vadd.f32 %v860_v23, %v801_v47 }
  0xfe   :  { %v441_v43 = vpop.f32.mrf.mxu2  ;;  %v552_v53 = vpop.f32.mrf.mxu3 }
  0xff   :  { %892 = vst [vmem:[%s1741_s4 + $0x8] sm:$0xff] %v876_v49  ;;  %v553_v34 = vadd.f32 %v552_v53, %v437_v24  ;;  %v442_v26 = vadd.f32 %v441_v43, %v325_v1  ;;  %v865_v53 = vld [vmem:[%s1740_s3 + $0x30] sm:$0xff] }
 0x101   :  { %v708_v25 = vadd.f32 %v707_v51, %v553_v34 }
 0x102   :  { %v808_v2 = vpop.f32.mrf.mxu1 }
 0x103   :  { %v805_v7 = vadd.f32 %v804_v30, %v708_v25 }
 0x104   :  { %v715_v18 = vpop.f32.mrf.mxu0 }
 0x105   :  { %v877_v3 = vadd.f32 %v861_v11, %v805_v7 }
 0x106   :  { %v446_v62 = vpop.f32.mrf.mxu2  ;;  %v558_v29 = vpop.f32.mrf.mxu3 }
 0x107   :  { %893 = vst [vmem:[%s1741_s4 + $0x10] sm:$0xff] %v877_v3  ;;  %v559_v22 = vadd.f32 %v558_v29, %v442_v26  ;;  %v447_v0 = vadd.f32 %v446_v62, %v329_v9 }
 0x109   :  { %v712_v58 = vadd.f32 %v711_v4, %v559_v22 }
 0x10a   :  { %v812_v28 = vpop.f32.mrf.mxu1 }
 0x10b   :  { %v809_v20 = vadd.f32 %v808_v2, %v712_v58 }
 0x10c   :  { %v719_v27 = vpop.f32.mrf.mxu0 }
 0x10d   :  { %v878_v38 = vadd.f32 %v862_v39, %v809_v20 }
 0x10e   :  { %v451_v17 = vpop.f32.mrf.mxu2  ;;  %v564_v36 = vpop.f32.mrf.mxu3 }
 0x10f   :  { %894 = vst [vmem:[%s1741_s4 + $0x18] sm:$0xff] %v878_v38  ;;  %v565_v40 = vadd.f32 %v564_v36, %v447_v0  ;;  %v452_v51 = vadd.f32 %v451_v17, %v333_v37 }
 0x111   :  { %v716_v33 = vadd.f32 %v715_v18, %v565_v40  ;;  %v866_v18 = vld [vmem:[%s1740_s3 + $0x38] sm:$0xff]  ;;  %v868_v40 = vld [vmem:[%s1740_s3 + $0x48] sm:$0xff] }
 0x112   :  { %v816_v54 = vpop.f32.mrf.mxu1 }
 0x113   :  { %v813_v48 = vadd.f32 %v812_v28, %v716_v33  ;;  %v867_v28 = vld [vmem:[%s1740_s3 + $0x40] sm:$0xff] }
 0x114   :  { %v723_v42 = vpop.f32.mrf.mxu0 }
 0x115   :  { %v879_v63 = vadd.f32 %v863_v14, %v813_v48 }
 0x116   :  { %v456_v50 = vpop.f32.mrf.mxu2  ;;  %v570_v61 = vpop.f32.mrf.mxu3 }
 0x117   :  { %895 = vst [vmem:[%s1741_s4 + $0x20] sm:$0xff] %v879_v63  ;;  %v571_v57 = vadd.f32 %v570_v61, %v452_v51  ;;  %v457_v13 = vadd.f32 %v456_v50, %v337_v56  ;;  %v869_v50 = vld [vmem:[%s1740_s3 + $0x50] sm:$0xff] }
 0x119   :  { %v720_v16 = vadd.f32 %v719_v27, %v571_v57 }
 0x11a   :  { %v820_v41 = vpop.f32.mrf.mxu1 }
 0x11b   :  { %v817_v23 = vadd.f32 %v816_v54, %v720_v16 }
 0x11c   :  { %v727_v30 = vpop.f32.mrf.mxu0 }
 0x11d   :  { %v880_v47 = vadd.f32 %v864_v55, %v817_v23 }
 0x11e   :  { %v461_v4 = vpop.f32.mrf.mxu2  ;;  %v576_v24 = vpop.f32.mrf.mxu3 }
 0x11f   :  { %896 = vst [vmem:[%s1741_s4 + $0x28] sm:$0xff] %v880_v47  ;;  %v577_v49 = vadd.f32 %v576_v24, %v457_v13  ;;  %v462_v11 = vadd.f32 %v461_v4, %v341_v8 }
 0x121   :  { %v724_v43 = vadd.f32 %v723_v42, %v577_v49 }
 0x122   :  { %v824_v5 = vpop.f32.mrf.mxu1 }
 0x123   :  { %v821_v34 = vadd.f32 %v820_v41, %v724_v43 }
 0x124   :  { %v731_v25 = vpop.f32.mrf.mxu0 }
 0x125   :  { %v881_v2 = vadd.f32 %v865_v53, %v821_v34  ;;  %v871_v53 = vld [vmem:[%s1740_s3 + $0x60] sm:$0xff] }
 0x126   :  { %v466_v1 = vpop.f32.mrf.mxu2  ;;  %v582_v7 = vpop.f32.mrf.mxu3 }
 0x127   :  { %897 = vst [vmem:[%s1741_s4 + $0x30] sm:$0xff] %v881_v2  ;;  %v583_v45 = vadd.f32 %v582_v7, %v462_v11  ;;  %v467_v46 = vadd.f32 %v466_v1, %v1527_v21 }
 0x129   :  { %v728_v32 = vadd.f32 %v727_v30, %v583_v45  ;;  %v870_v30 = vld [vmem:[%s1740_s3 + $0x58] sm:$0xff]  ;;  %v872_v45 = vld [vmem:[%s1740_s3 + $0x68] sm:$0xff] }
 0x12a   :  { %v828_v26 = vpop.f32.mrf.mxu1 }
 0x12b   :  { %v825_v3 = vadd.f32 %v824_v5, %v728_v32 }
 0x12c   :  { %v735_v62 = vpop.f32.mrf.mxu0 }
 0x12d   :  { %v882_v29 = vadd.f32 %v866_v18, %v825_v3 }
 0x12e   :  { %v471_v12 = vpop.f32.mrf.mxu2  ;;  %v588_v22 = vpop.f32.mrf.mxu3 }
 0x12f   :  { %898 = vst [vmem:[%s1741_s4 + $0x38] sm:$0xff] %v882_v29  ;;  %v589_v58 = vadd.f32 %v588_v22, %v467_v46  ;;  %v472_v0 = vadd.f32 %v471_v12, %v1539_v10  ;;  %v873_v22 = vld [vmem:[%s1740_s3 + $0x70] sm:$0xff] }
 0x131   :  { %v732_v39 = vadd.f32 %v731_v25, %v589_v58 }
 0x132   :  { %v832_v9 = vpop.f32.mrf.mxu1 }
 0x133   :  { %v829_v20 = vadd.f32 %v828_v26, %v732_v39 }
 0x134   :  { %v739_v27 = vpop.f32.mrf.mxu0 }
 0x135   :  { %v883_v38 = vadd.f32 %v867_v28, %v829_v20 }
 0x136   :  { %v476_v21 = vpop.f32.mrf.mxu2  ;;  %v594_v17 = vpop.f32.mrf.mxu3 }
 0x137   :  { %899 = vst [vmem:[%s1741_s4 + $0x40] sm:$0xff] %v883_v38  ;;  %v595_v36 = vadd.f32 %v594_v17, %v472_v0  ;;  %v477_v54 = vadd.f32 %v476_v21, %v1551_v19  ;;  %v874_v38 = vld [vmem:[%s1740_s3 + $0x78] sm:$0xff] }
 0x139   :  { %v736_v31 = vadd.f32 %v735_v62, %v595_v36 }
 0x13a   :  { %v836_v33 = vpop.f32.mrf.mxu1 }
 0x13b   :  { %v833_v14 = vadd.f32 %v832_v9, %v736_v31 }
 0x13c   :  { %v743_v48 = vpop.f32.mrf.mxu0 }
 0x13d   :  { %v884_v37 = vadd.f32 %v868_v40, %v833_v14 }
 0x13e   :  { %v481_v10 = vpop.f32.mrf.mxu2  ;;  %v600_v42 = vpop.f32.mrf.mxu3 }
 0x13f   :  { %900 = vst [vmem:[%s1741_s4 + $0x48] sm:$0xff] %v884_v37  ;;  %v601_v51 = vadd.f32 %v600_v42, %v477_v54  ;;  %v482_v57 = vadd.f32 %v481_v10, %v1563_v35 }
 0x141   :  { %v740_v63 = vadd.f32 %v739_v27, %v601_v51 }
 0x142   :  { %v840_v61 = vpop.f32.mrf.mxu1 }
 0x143   :  { %v837_v44 = vadd.f32 %v836_v33, %v740_v63 }
 0x144   :  { %v747_v56 = vpop.f32.mrf.mxu0 }
 0x145   :  { %v885_v16 = vadd.f32 %v869_v50, %v837_v44 }
 0x146   :  { %v486_v19 = vpop.f32.mrf.mxu2  ;;  %v606_v55 = vpop.f32.mrf.mxu3 }
 0x147   :  { %901 = vst [vmem:[%s1741_s4 + $0x50] sm:$0xff] %v885_v16  ;;  %v607_v41 = vadd.f32 %v606_v55, %v482_v57  ;;  %v487_v4 = vadd.f32 %v486_v19, %v1575_v60 }
 0x149   :  { %v744_v23 = vadd.f32 %v743_v48, %v607_v41 }
 0x14a   :  { %v844_v13 = vpop.f32.mrf.mxu1 }
 0x14b   :  { %v841_v47 = vadd.f32 %v840_v61, %v744_v23 }
 0x14c   :  { %v751_v5 = vpop.f32.mrf.mxu0 }
 0x14d   :  { %v886_v24 = vadd.f32 %v870_v30, %v841_v47 }
 0x14e   :  { %v491_v35 = vpop.f32.mrf.mxu2  ;;  %v612_v15 = vpop.f32.mrf.mxu3 }
 0x14f   :  { %902 = vst [vmem:[%s1741_s4 + $0x58] sm:$0xff] %v886_v24  ;;  %v613_v49 = vadd.f32 %v612_v15, %v487_v4  ;;  %v492_v25 = vadd.f32 %v491_v35, %v1587_v6 }
 0x151   :  { %v748_v43 = vadd.f32 %v747_v56, %v613_v49 }
 0x152   :  { %v848_v34 = vpop.f32.mrf.mxu1 }
 0x153   :  { %v845_v8 = vadd.f32 %v844_v13, %v748_v43 }
 0x154   :  { %v755_v18 = vpop.f32.mrf.mxu0 }
 0x155   :  { %v887_v11 = vadd.f32 %v871_v53, %v845_v8 }
 0x156   :  { %v618_v60 = vpop.f32.mrf.mxu3  ;;  %v496_v1 = vpop.f32.mrf.mxu2 }
 0x157   :  { %903 = vst [vmem:[%s1741_s4 + $0x60] sm:$0xff] %v887_v11  ;;  %v619_v2 = vadd.f32 %v618_v60, %v492_v25  ;;  %v497_v26 = vadd.f32 %v496_v1, %v1599_v52 }
 0x159   :  { %v752_v7 = vadd.f32 %v751_v5, %v619_v2 }
 0x15a   :  { %v852_v6 = vpop.f32.mrf.mxu1 }
 0x15b   :  { %v849_v32 = vadd.f32 %v848_v34, %v752_v7 }
 0x15c   :  { %v759_v52 = vpop.f32.mrf.mxu0 }
 0x15d   :  { %v888_v3 = vadd.f32 %v872_v45, %v849_v32 }
 0x15e   :  { %v624_v62 = vpop.f32.mrf.mxu3  ;;  %v501_v12 = vpop.f32.mrf.mxu2 }
 0x15f   :  { %904 = vst [vmem:[%s1741_s4 + $0x68] sm:$0xff] %v888_v3  ;;  %v625_v46 = vadd.f32 %v624_v62, %v497_v26  ;;  %v502_v39 = vadd.f32 %v501_v12, %v1609_v59 }
 0x161   :  { %v756_v29 = vadd.f32 %v755_v18, %v625_v46 }
 0x162   :  { %v856_v27 = vpop.f32.mrf.mxu1 }
 0x163   :  { %v853_v58 = vadd.f32 %v852_v6, %v756_v29 }
 0x165   :  { %v889_v28 = vadd.f32 %v873_v22, %v853_v58 }
 0x166   :  { %v630_v9 = vpop.f32.mrf.mxu3 }
 0x167   :  { %905 = vst [vmem:[%s1741_s4 + $0x70] sm:$0xff] %v889_v28  ;;  %v631_v20 = vadd.f32 %v630_v9, %v502_v39 }
 0x169   :  { %v760_v0 = vadd.f32 %v759_v52, %v631_v20 }
 0x16b   :  { %v857_v21 = vadd.f32 %v856_v27, %v760_v0 }
 0x16d   :  { %v890_v17 = vadd.f32 %v874_v38, %v857_v21 }
 0x16f   :  { %906 = vst [vmem:[%s1741_s4 + $0x78] sm:$0xff] %v890_v17 }

</bundles_post_ra>
